<compile_context>
chip_gen: v7x
topology: tpu7x:2x2x1
jax: 0.10.0
libtpu: 0.0.40
codegen_flags: <defaults>
</compile_context>

<pallas_src>
import functools

import jax
import jax.numpy as jnp
from jax.experimental import pallas as pl
from jax.experimental.pallas import tpu as pltpu


# ----------------------------- fused Pallas kernel ---------------------------

def _build_fused_kernel(n, k, channels, n_idgcn, n_dgcn, n_branches, pre_slot):
    """Whole InceptionFeatureExtractor forward (minus graph build / FPS) in one kernel."""
    C = channels
    kn = k * n

    def tree_max_over_k(msg):
        # msg: [k*n, C] f32, rows kk*n+i = message from neighbor kk of node i.
        # Balanced-tree max over the K neighbor slices (log2(K) VPU depth).
        parts = [msg[kk * n:(kk + 1) * n, :] for kk in range(k)]
        while len(parts) > 1:
            nxt = [jnp.maximum(parts[i], parts[i + 1])
                   for i in range(0, len(parts) - 1, 2)]
            if len(parts) % 2:
                nxt.append(parts[-1])
            parts = nxt
        return parts[0]

    def kernel(pos_ref, d_all_ref, pre_w_ref, *rest):
        w1_refs = rest[:n_dgcn]                       # [n_idgcn*n_branches, C*(1+b), C] bf16
        w2_refs = rest[n_dgcn:2 * n_dgcn]             # same shapes as w1
        lin_ref = rest[2 * n_dgcn]                    # [n_idgcn*n_branches, C*(1+n_dgcn), C] bf16
        bias_ref = rest[2 * n_dgcn + 1]               # [n_bias, 1, C] f32
        out_ref = rest[2 * n_dgcn + 2]

        d_all = d_all_ref[...]                        # bf16 [n_stack*kn, n], {-1,0,1}
        d_branches = d_all[:n_branches * kn, :]       # batched-gather operand
        d_pre = d_all[pre_slot * kn:(pre_slot + 1) * kn, :]

        # ---- pre_gcn: EdgeConv 3 -> C on the dilation-1 graph (bf16 MXU, f32 acc).
        #      EdgeConv(linear MLP, max agg) factorizes as x_i@W1 + b + max_j((x_j-x_i)@W2).
        # TODO(synk): valid only for a single-linear EdgeConv MLP; an activation/norm
        #             inside the neighbor aggregation would break this factorization.
        pos_b = pos_ref[...].astype(jnp.bfloat16)
        center = bias_ref[0] + jnp.dot(pos_b, pre_w_ref[0],
                                       preferred_element_type=jnp.float32)
        pos_w2 = jnp.dot(pos_b, pre_w_ref[1],
                         preferred_element_type=jnp.float32).astype(jnp.bfloat16)
        pre_msg = jnp.dot(d_pre, pos_w2, preferred_element_type=jnp.float32)
        x = center + tree_max_over_k(pre_msg)         # f32 [n, C]

        # ---- n_idgcn InceptionDenseGCN layers; residual sum stays in VMEM/registers ----
        res = jnp.zeros((n, C), jnp.float32)
        for li in range(n_idgcn):
            xb = x.astype(jnp.bfloat16)
            # Gather (x_j - x_i) of the shared layer input for ALL branches in one MXU call.
            diff0_all = jnp.dot(d_branches, xb,
                                preferred_element_type=jnp.float32).astype(jnp.bfloat16)
            layer_out = None
            for br in range(n_branches):
                wi = li * n_branches + br
                bbase = 1 + wi * (n_dgcn + 1)
                dense = xb                             # growing [n, j*C] bf16 (dense skip)
                diffs = diff0_all[br * kn:(br + 1) * kn, :]   # growing [kn, j*C] bf16
                for bidx in range(n_dgcn):
                    w1 = w1_refs[bidx][wi]             # [C*(1+bidx), C] bf16
                    w2 = w2_refs[bidx][wi]
                    cen = bias_ref[bbase + bidx] + jnp.dot(
                        dense, w1, preferred_element_type=jnp.float32)
                    msg = jnp.dot(diffs, w2, preferred_element_type=jnp.float32)
                    out = cen + tree_max_over_k(msg)
                    out_b = out.astype(jnp.bfloat16)
                    dense = jnp.concatenate([dense, out_b], axis=-1)
                    if bidx + 1 < n_dgcn:              # diff only needed by later blocks
                        d_br = d_all[br * kn:(br + 1) * kn, :]
                        new_diff = jnp.dot(d_br, out_b,
                                           preferred_element_type=jnp.float32)
                        diffs = jnp.concatenate(
                            [diffs, new_diff.astype(jnp.bfloat16)], axis=-1)
                # lin_down over the dense-concatenated features: one wide-K matmul.
                h = bias_ref[bbase + n_dgcn] + jnp.dot(
                    dense, lin_ref[wi], preferred_element_type=jnp.float32)
                layer_out = h if layer_out is None else jnp.maximum(layer_out, h)
            x = layer_out
            res = res + x                              # residual epilogue (free VPU)
        out_ref[...] = (res * (1.0 / n_idgcn)).astype(out_ref.dtype)

    return kernel


# ------------------------------ graph / fps glue ------------------------------

def _dilated_knn_order(pos, k, max_dilation):
    """Sorted nearest-neighbor index table [N, k*max_dilation] (matmul-distance + top_k)."""
    # TODO(synk): the PyTorch module uses radius_graph (variable node degree); no clean
    # fixed-shape TPU equivalent, so a fixed-degree dilated knn graph is used instead.
    n = pos.shape[0]
    sq = jnp.sum(pos * pos, axis=-1)
    d2 = sq[:, None] + sq[None, :] - 2.0 * (pos @ pos.T)
    d2 = d2 + jnp.eye(n, dtype=pos.dtype) * 1e10              # exclude self loops
    _, order = jax.lax.top_k(-d2, k * max_dilation)           # ascending distance
    return order.astype(jnp.int32)


def _gather_diff_matrix(nbr_idx, n, dtype):
    """[N, K] neighbor table -> [K*N, N] matrix D with (D @ X)[kk*N+i] = X[nbr[i,kk]] - X[i]."""
    k = nbr_idx.shape[1]
    onehot = jax.nn.one_hot(nbr_idx.T.reshape(k * n), n, dtype=jnp.float32)
    eye = jnp.tile(jnp.eye(n, dtype=jnp.float32), (k, 1))
    return (onehot - eye).astype(dtype)


def farthest_point_sampling(feats, ratio):
    """Deterministic FPS. Sequential -> plain JAX fori_loop."""
    # TODO(synk): torch_geometric.fps uses a random start point; deterministic start (node 0).
    n = feats.shape[0]
    m = int(n * ratio)
    sel0 = jnp.zeros((m,), jnp.int32)
    dist0 = jnp.full((n,), jnp.inf, jnp.float32)

    def body(i, state):
        sel, dist, last = state
        d = jnp.sum((feats - feats[last]) ** 2, axis=-1)
        dist = jnp.minimum(dist, d)
        nxt = jnp.argmax(dist).astype(jnp.int32)
        return sel.at[i].set(nxt), dist, nxt

    sel, _, _ = jax.lax.fori_loop(1, m, body, (sel0, dist0, jnp.int32(0)))
    return sel


# ------------------------------ module forward --------------------------------

def inception_feature_extractor_forward(pos, params, *, k, dilations, n_idgcn, radio):
    """pos: [N, 3] point coordinates -> sampled features [int(N*radio), channels]."""
    n = pos.shape[0]
    channels = params["pre"][0].shape[1]
    n_dgcn = len(params["layers"][0][0]["blocks"])
    n_branches = len(dilations)

    # ---- graph construction (plain JAX glue, once per forward) ----
    order = _dilated_knn_order(pos, k, max(max(dilations), 1))
    d_mats = [_gather_diff_matrix(order[:, 0:k * d:d], n, jnp.bfloat16) for d in dilations]
    if 1 in dilations:                      # reuse the dilation-1 branch slice for pre_gcn
        pre_slot = dilations.index(1)
    else:                                   # rare: append a dedicated base-graph slice
        pre_slot = n_branches
        d_mats.append(_gather_diff_matrix(order[:, :k], n, jnp.bfloat16))
    d_all = jnp.concatenate(d_mats, axis=0)                     # bf16 [n_stack*k*n, n]

    # ---- pack parameters into a few stacked operands (bf16 MXU weights, f32 biases) ----
    pw, pb = params["pre"]
    pre_w = jnp.stack([pw[:3], pw[3:]], axis=0).astype(jnp.bfloat16)        # [2, 3, C]

    w1_stacks, w2_stacks = [], []
    for bidx in range(n_dgcn):
        cin = channels * (1 + bidx)
        w1s, w2s = [], []
        for branches in params["layers"]:
            for br in branches:
                w, _ = br["blocks"][bidx]
                w1s.append(w[:cin])
                w2s.append(w[cin:])
        w1_stacks.append(jnp.stack(w1s).astype(jnp.bfloat16))   # [n_idgcn*n_br, cin, C]
        w2_stacks.append(jnp.stack(w2s).astype(jnp.bfloat16))

    lin_w = jnp.stack([br["lin"][0] for branches in params["layers"] for br in branches]
                      ).astype(jnp.bfloat16)                    # [n_idgcn*n_br, (1+n_dgcn)C, C]

    biases = [pb.reshape(1, channels)]
    for branches in params["layers"]:
        for br in branches:
            for (_, b) in br["blocks"]:
                biases.append(b.reshape(1, channels))
            biases.append(br["lin"][1].reshape(1, channels))
    bias_all = jnp.stack(biases).astype(jnp.float32)            # [n_bias, 1, C]

    inputs = [pos, d_all, pre_w] + w1_stacks + w2_stacks + [lin_w, bias_all]

    kernel = _build_fused_kernel(n, k, channels, n_idgcn, n_dgcn, n_branches, pre_slot)

    def full_spec(a):
        nd = a.ndim
        return pl.BlockSpec(a.shape, lambda i, nd=nd: (0,) * nd)

    # Single grid step: 9 input DMAs total; every operand and the dense-skip buffers fit
    # comfortably in VMEM at this size (well under the v7x 64 MiB budget).
    res = pl.pallas_call(
        kernel,
        out_shape=jax.ShapeDtypeStruct((n, channels), jnp.float32),
        grid=(1,),
        in_specs=[full_spec(a) for a in inputs],
        out_specs=pl.BlockSpec((n, channels), lambda i: (0, 0)),
        compiler_params=pltpu.CompilerParams(dimension_semantics=("arbitrary",)),
    )(*inputs)

    # Farthest point sampling + index select (sequential / gather -> plain JAX glue).
    idx = farthest_point_sampling(res, radio)
    return res[idx]


# ------------------------------ parameter init --------------------------------

def _init_linear(key, fan_in, fan_out):
    kw, kb = jax.random.split(key)
    s = 1.0 / (fan_in ** 0.5)
    w = jax.random.uniform(kw, (fan_in, fan_out), jnp.float32, -s, s)
    b = jax.random.uniform(kb, (fan_out,), jnp.float32, -s, s)
    return w, b


def init_params(key, channels, dilations, n_idgcn, n_dgcn):
    n_keys = 1 + n_idgcn * len(dilations) * (n_dgcn + 1)
    keys = iter(jax.random.split(key, n_keys))
    params = {"pre": _init_linear(next(keys), 2 * 3, channels), "layers": []}
    for _ in range(n_idgcn):
        branches = []
        for _ in dilations:
            blocks = []
            for bidx in range(n_dgcn):
                cin = channels * (1 + bidx)            # dense growth: in_channels + i*growth
                blocks.append(_init_linear(next(keys), 2 * cin, channels))
            lin = _init_linear(next(keys), channels * (1 + n_dgcn), channels)
            branches.append({"blocks": blocks, "lin": lin})
        params["layers"].append(branches)
    return params


# ------------------------------------ main ------------------------------------

if __name__ == "__main__":
    N, K = 64, 4
    channels = 16
    dilations = (1, 2)
    n_idgcn_blocks = 2
    n_dgcn_blocks = 2
    radio = 0.5

    key = jax.random.PRNGKey(0)
    k_pos, k_par = jax.random.split(key)
    pos = jax.random.normal(k_pos, (N, 3), jnp.float32)          # input point cloud [N, 3]
    params = init_params(k_par, channels, dilations, n_idgcn_blocks, n_dgcn_blocks)

    fwd = jax.jit(functools.partial(
        inception_feature_extractor_forward,
        k=K, dilations=dilations, n_idgcn=n_idgcn_blocks, radio=radio))

    out = fwd(pos, params)
    out = jax.block_until_ready(out)
    assert out.shape == (int(N * radio), channels), out.shape
    assert out.dtype == jnp.float32
    print("KERNEL_OK")
</pallas_src>

<mosaic_0001>
module attributes {stable_mosaic.version = 11 : i64} {
  func.func @kernel(%arg0: i32, %arg1: memref<64x3xf32, #tpu.memory_space<vmem>>, %arg2: memref<512x64xbf16, #tpu.memory_space<vmem>>, %arg3: memref<2x3x16xbf16, #tpu.memory_space<vmem>>, %arg4: memref<4x16x16xbf16, #tpu.memory_space<vmem>>, %arg5: memref<4x32x16xbf16, #tpu.memory_space<vmem>>, %arg6: memref<4x16x16xbf16, #tpu.memory_space<vmem>>, %arg7: memref<4x32x16xbf16, #tpu.memory_space<vmem>>, %arg8: memref<4x48x16xbf16, #tpu.memory_space<vmem>>, %arg9: memref<13x1x16xf32, #tpu.memory_space<vmem>>, %arg10: memref<64x16xf32, #tpu.memory_space<vmem>>) attributes {dimension_semantics = [#tpu.dimension_semantics<arbitrary>], iteration_bounds = array<i64: 1>, scalar_prefetch = 0 : i64, scratch_operands = 0 : i64, tpu.core_type = #tpu.core_type<tc>, window_params = [{pipeline_mode = #tpu.pipeline_mode<synchronous>, transform_indices = @transform_0, window_bounds = array<i64: 64, 3>}, {pipeline_mode = #tpu.pipeline_mode<synchronous>, transform_indices = @transform_1, window_bounds = array<i64: 512, 64>}, {pipeline_mode = #tpu.pipeline_mode<synchronous>, transform_indices = @transform_2, window_bounds = array<i64: 2, 3, 16>}, {pipeline_mode = #tpu.pipeline_mode<synchronous>, transform_indices = @transform_3, window_bounds = array<i64: 4, 16, 16>}, {pipeline_mode = #tpu.pipeline_mode<synchronous>, transform_indices = @transform_4, window_bounds = array<i64: 4, 32, 16>}, {pipeline_mode = #tpu.pipeline_mode<synchronous>, transform_indices = @transform_5, window_bounds = array<i64: 4, 16, 16>}, {pipeline_mode = #tpu.pipeline_mode<synchronous>, transform_indices = @transform_6, window_bounds = array<i64: 4, 32, 16>}, {pipeline_mode = #tpu.pipeline_mode<synchronous>, transform_indices = @transform_7, window_bounds = array<i64: 4, 48, 16>}, {pipeline_mode = #tpu.pipeline_mode<synchronous>, transform_indices = @transform_8, window_bounds = array<i64: 13, 1, 16>}, {pipeline_mode = #tpu.pipeline_mode<synchronous>, transform_indices = @transform_9, window_bounds = array<i64: 64, 16>}]} {
    %c0 = arith.constant 0 : index
    %c0_0 = arith.constant 0 : index
    %0 = vector.load %arg2[%c0, %c0_0] : memref<512x64xbf16, #tpu.memory_space<vmem>>, vector<512x64xbf16>
    %1 = vector.extract_strided_slice %0 {offsets = [0, 0], sizes = [256, 64], strides = [1, 1]} : vector<512x64xbf16> to vector<256x64xbf16>
    %c0_1 = arith.constant 0 : index
    %c0_2 = arith.constant 0 : index
    %2 = vector.load %arg1[%c0_1, %c0_2] : memref<64x3xf32, #tpu.memory_space<vmem>>, vector<64x3xf32>
    %3 = arith.truncf %2 : vector<64x3xf32> to vector<64x3xbf16>
    %c0_3 = arith.constant 0 : index
    %c0_4 = arith.constant 0 : index
    %c0_5 = arith.constant 0 : index
    %4 = vector.load %arg9[%c0_3, %c0_4, %c0_5] : memref<13x1x16xf32, #tpu.memory_space<vmem>>, vector<1x1x16xf32>
    %5 = vector.shape_cast %4 : vector<1x1x16xf32> to vector<1x16xf32>
    %c0_6 = arith.constant 0 : index
    %c0_7 = arith.constant 0 : index
    %c0_8 = arith.constant 0 : index
    %6 = vector.load %arg3[%c0_6, %c0_7, %c0_8] : memref<2x3x16xbf16, #tpu.memory_space<vmem>>, vector<1x3x16xbf16>
    %7 = vector.shape_cast %6 : vector<1x3x16xbf16> to vector<3x16xbf16>
    %cst = arith.constant dense<0.000000e+00> : vector<64x16xf32>
    %8 = tpu.matmul %3, %7, %cst {dimension_numbers = #tpu.dot_dimension_numbers<[1], [0], [0], [1], [0, 0, 1, 1], [], []>} : vector<64x3xbf16>, vector<3x16xbf16>, vector<64x16xf32> -> vector<64x16xf32>
    %9 = vector.broadcast %5 : vector<1x16xf32> to vector<64x16xf32>
    %10 = arith.addf %9, %8 : vector<64x16xf32>
    %c1 = arith.constant 1 : index
    %c0_9 = arith.constant 0 : index
    %c0_10 = arith.constant 0 : index
    %11 = vector.load %arg3[%c1, %c0_9, %c0_10] : memref<2x3x16xbf16, #tpu.memory_space<vmem>>, vector<1x3x16xbf16>
    %12 = vector.shape_cast %11 : vector<1x3x16xbf16> to vector<3x16xbf16>
    %cst_11 = arith.constant dense<0.000000e+00> : vector<64x16xf32>
    %13 = tpu.matmul %3, %12, %cst_11 {dimension_numbers = #tpu.dot_dimension_numbers<[1], [0], [0], [1], [0, 0, 1, 1], [], []>} : vector<64x3xbf16>, vector<3x16xbf16>, vector<64x16xf32> -> vector<64x16xf32>
    %14 = arith.truncf %13 : vector<64x16xf32> to vector<64x16xbf16>
    %cst_12 = arith.constant dense<0.000000e+00> : vector<256x16xf32>
    %15 = tpu.matmul %1, %14, %cst_12 {dimension_numbers = #tpu.dot_dimension_numbers<[1], [0], [0], [1], [0, 0, 1, 1], [], []>} : vector<256x64xbf16>, vector<64x16xbf16>, vector<256x16xf32> -> vector<256x16xf32>
    %16 = vector.extract_strided_slice %15 {offsets = [0, 0], sizes = [64, 16], strides = [1, 1]} : vector<256x16xf32> to vector<64x16xf32>
    %17 = vector.extract_strided_slice %15 {offsets = [64, 0], sizes = [64, 16], strides = [1, 1]} : vector<256x16xf32> to vector<64x16xf32>
    %18 = vector.extract_strided_slice %15 {offsets = [128, 0], sizes = [64, 16], strides = [1, 1]} : vector<256x16xf32> to vector<64x16xf32>
    %19 = vector.extract_strided_slice %15 {offsets = [192, 0], sizes = [64, 16], strides = [1, 1]} : vector<256x16xf32> to vector<64x16xf32>
    %20 = arith.maximumf %16, %17 : vector<64x16xf32>
    %21 = arith.maximumf %18, %19 : vector<64x16xf32>
    %22 = arith.maximumf %20, %21 : vector<64x16xf32>
    %23 = arith.addf %10, %22 : vector<64x16xf32>
    %cst_13 = arith.constant 0.000000e+00 : f32
    %24 = vector.broadcast %cst_13 : f32 to vector<64x16xf32>
    %25 = arith.truncf %23 : vector<64x16xf32> to vector<64x16xbf16>
    %cst_14 = arith.constant dense<0.000000e+00> : vector<512x16xf32>
    %26 = tpu.matmul %0, %25, %cst_14 {dimension_numbers = #tpu.dot_dimension_numbers<[1], [0], [0], [1], [0, 0, 1, 1], [], []>} : vector<512x64xbf16>, vector<64x16xbf16>, vector<512x16xf32> -> vector<512x16xf32>
    %27 = arith.truncf %26 : vector<512x16xf32> to vector<512x16xbf16>
    %28 = vector.extract_strided_slice %27 {offsets = [0, 0], sizes = [256, 16], strides = [1, 1]} : vector<512x16xbf16> to vector<256x16xbf16>
    %c0_15 = arith.constant 0 : index
    %c0_16 = arith.constant 0 : index
    %c0_17 = arith.constant 0 : index
    %29 = vector.load %arg4[%c0_15, %c0_16, %c0_17] : memref<4x16x16xbf16, #tpu.memory_space<vmem>>, vector<1x16x16xbf16>
    %30 = vector.shape_cast %29 : vector<1x16x16xbf16> to vector<16x16xbf16>
    %c0_18 = arith.constant 0 : index
    %c0_19 = arith.constant 0 : index
    %c0_20 = arith.constant 0 : index
    %31 = vector.load %arg6[%c0_18, %c0_19, %c0_20] : memref<4x16x16xbf16, #tpu.memory_space<vmem>>, vector<1x16x16xbf16>
    %32 = vector.shape_cast %31 : vector<1x16x16xbf16> to vector<16x16xbf16>
    %c1_21 = arith.constant 1 : index
    %c0_22 = arith.constant 0 : index
    %c0_23 = arith.constant 0 : index
    %33 = vector.load %arg9[%c1_21, %c0_22, %c0_23] : memref<13x1x16xf32, #tpu.memory_space<vmem>>, vector<1x1x16xf32>
    %34 = vector.shape_cast %33 : vector<1x1x16xf32> to vector<1x16xf32>
    %cst_24 = arith.constant dense<0.000000e+00> : vector<64x16xf32>
    %35 = tpu.matmul %25, %30, %cst_24 {dimension_numbers = #tpu.dot_dimension_numbers<[1], [0], [0], [1], [0, 0, 1, 1], [], []>} : vector<64x16xbf16>, vector<16x16xbf16>, vector<64x16xf32> -> vector<64x16xf32>
    %36 = vector.broadcast %34 : vector<1x16xf32> to vector<64x16xf32>
    %37 = arith.addf %36, %35 : vector<64x16xf32>
    %cst_25 = arith.constant dense<0.000000e+00> : vector<256x16xf32>
    %38 = tpu.matmul %28, %32, %cst_25 {dimension_numbers = #tpu.dot_dimension_numbers<[1], [0], [0], [1], [0, 0, 1, 1], [], []>} : vector<256x16xbf16>, vector<16x16xbf16>, vector<256x16xf32> -> vector<256x16xf32>
    %39 = vector.extract_strided_slice %38 {offsets = [0, 0], sizes = [64, 16], strides = [1, 1]} : vector<256x16xf32> to vector<64x16xf32>
    %40 = vector.extract_strided_slice %38 {offsets = [64, 0], sizes = [64, 16], strides = [1, 1]} : vector<256x16xf32> to vector<64x16xf32>
    %41 = vector.extract_strided_slice %38 {offsets = [128, 0], sizes = [64, 16], strides = [1, 1]} : vector<256x16xf32> to vector<64x16xf32>
    %42 = vector.extract_strided_slice %38 {offsets = [192, 0], sizes = [64, 16], strides = [1, 1]} : vector<256x16xf32> to vector<64x16xf32>
    %43 = arith.maximumf %39, %40 : vector<64x16xf32>
    %44 = arith.maximumf %41, %42 : vector<64x16xf32>
    %45 = arith.maximumf %43, %44 : vector<64x16xf32>
    %46 = arith.addf %37, %45 : vector<64x16xf32>
    %47 = arith.truncf %46 : vector<64x16xf32> to vector<64x16xbf16>
    %48 = tpu.concatenate %25, %47 in 1 : vector<64x16xbf16>, vector<64x16xbf16> -> vector<64x32xbf16>
    %49 = vector.extract_strided_slice %0 {offsets = [0, 0], sizes = [256, 64], strides = [1, 1]} : vector<512x64xbf16> to vector<256x64xbf16>
    %cst_26 = arith.constant dense<0.000000e+00> : vector<256x16xf32>
    %50 = tpu.matmul %49, %47, %cst_26 {dimension_numbers = #tpu.dot_dimension_numbers<[1], [0], [0], [1], [0, 0, 1, 1], [], []>} : vector<256x64xbf16>, vector<64x16xbf16>, vector<256x16xf32> -> vector<256x16xf32>
    %51 = arith.truncf %50 : vector<256x16xf32> to vector<256x16xbf16>
    %52 = tpu.concatenate %28, %51 in 1 : vector<256x16xbf16>, vector<256x16xbf16> -> vector<256x32xbf16>
    %c0_27 = arith.constant 0 : index
    %c0_28 = arith.constant 0 : index
    %c0_29 = arith.constant 0 : index
    %53 = vector.load %arg5[%c0_27, %c0_28, %c0_29] : memref<4x32x16xbf16, #tpu.memory_space<vmem>>, vector<1x32x16xbf16>
    %54 = vector.shape_cast %53 : vector<1x32x16xbf16> to vector<32x16xbf16>
    %c0_30 = arith.constant 0 : index
    %c0_31 = arith.constant 0 : index
    %c0_32 = arith.constant 0 : index
    %55 = vector.load %arg7[%c0_30, %c0_31, %c0_32] : memref<4x32x16xbf16, #tpu.memory_space<vmem>>, vector<1x32x16xbf16>
    %56 = vector.shape_cast %55 : vector<1x32x16xbf16> to vector<32x16xbf16>
    %c2 = arith.constant 2 : index
    %c0_33 = arith.constant 0 : index
    %c0_34 = arith.constant 0 : index
    %57 = vector.load %arg9[%c2, %c0_33, %c0_34] : memref<13x1x16xf32, #tpu.memory_space<vmem>>, vector<1x1x16xf32>
    %58 = vector.shape_cast %57 : vector<1x1x16xf32> to vector<1x16xf32>
    %cst_35 = arith.constant dense<0.000000e+00> : vector<64x16xf32>
    %59 = tpu.matmul %48, %54, %cst_35 {dimension_numbers = #tpu.dot_dimension_numbers<[1], [0], [0], [1], [0, 0, 1, 1], [], []>} : vector<64x32xbf16>, vector<32x16xbf16>, vector<64x16xf32> -> vector<64x16xf32>
    %60 = vector.broadcast %58 : vector<1x16xf32> to vector<64x16xf32>
    %61 = arith.addf %60, %59 : vector<64x16xf32>
    %cst_36 = arith.constant dense<0.000000e+00> : vector<256x16xf32>
    %62 = tpu.matmul %52, %56, %cst_36 {dimension_numbers = #tpu.dot_dimension_numbers<[1], [0], [0], [1], [0, 0, 1, 1], [], []>} : vector<256x32xbf16>, vector<32x16xbf16>, vector<256x16xf32> -> vector<256x16xf32>
    %63 = vector.extract_strided_slice %62 {offsets = [0, 0], sizes = [64, 16], strides = [1, 1]} : vector<256x16xf32> to vector<64x16xf32>
    %64 = vector.extract_strided_slice %62 {offsets = [64, 0], sizes = [64, 16], strides = [1, 1]} : vector<256x16xf32> to vector<64x16xf32>
    %65 = vector.extract_strided_slice %62 {offsets = [128, 0], sizes = [64, 16], strides = [1, 1]} : vector<256x16xf32> to vector<64x16xf32>
    %66 = vector.extract_strided_slice %62 {offsets = [192, 0], sizes = [64, 16], strides = [1, 1]} : vector<256x16xf32> to vector<64x16xf32>
    %67 = arith.maximumf %63, %64 : vector<64x16xf32>
    %68 = arith.maximumf %65, %66 : vector<64x16xf32>
    %69 = arith.maximumf %67, %68 : vector<64x16xf32>
    %70 = arith.addf %61, %69 : vector<64x16xf32>
    %71 = arith.truncf %70 : vector<64x16xf32> to vector<64x16xbf16>
    %72 = tpu.concatenate %48, %71 in 1 : vector<64x32xbf16>, vector<64x16xbf16> -> vector<64x48xbf16>
    %c3 = arith.constant 3 : index
    %c0_37 = arith.constant 0 : index
    %c0_38 = arith.constant 0 : index
    %73 = vector.load %arg9[%c3, %c0_37, %c0_38] : memref<13x1x16xf32, #tpu.memory_space<vmem>>, vector<1x1x16xf32>
    %74 = vector.shape_cast %73 : vector<1x1x16xf32> to vector<1x16xf32>
    %c0_39 = arith.constant 0 : index
    %c0_40 = arith.constant 0 : index
    %c0_41 = arith.constant 0 : index
    %75 = vector.load %arg8[%c0_39, %c0_40, %c0_41] : memref<4x48x16xbf16, #tpu.memory_space<vmem>>, vector<1x48x16xbf16>
    %76 = vector.shape_cast %75 : vector<1x48x16xbf16> to vector<48x16xbf16>
    %cst_42 = arith.constant dense<0.000000e+00> : vector<64x16xf32>
    %77 = tpu.matmul %72, %76, %cst_42 {dimension_numbers = #tpu.dot_dimension_numbers<[1], [0], [0], [1], [0, 0, 1, 1], [], []>} : vector<64x48xbf16>, vector<48x16xbf16>, vector<64x16xf32> -> vector<64x16xf32>
    %78 = vector.broadcast %74 : vector<1x16xf32> to vector<64x16xf32>
    %79 = arith.addf %78, %77 : vector<64x16xf32>
    %80 = vector.extract_strided_slice %27 {offsets = [256, 0], sizes = [256, 16], strides = [1, 1]} : vector<512x16xbf16> to vector<256x16xbf16>
    %c1_43 = arith.constant 1 : index
    %c0_44 = arith.constant 0 : index
    %c0_45 = arith.constant 0 : index
    %81 = vector.load %arg4[%c1_43, %c0_44, %c0_45] : memref<4x16x16xbf16, #tpu.memory_space<vmem>>, vector<1x16x16xbf16>
    %82 = vector.shape_cast %81 : vector<1x16x16xbf16> to vector<16x16xbf16>
    %c1_46 = arith.constant 1 : index
    %c0_47 = arith.constant 0 : index
    %c0_48 = arith.constant 0 : index
    %83 = vector.load %arg6[%c1_46, %c0_47, %c0_48] : memref<4x16x16xbf16, #tpu.memory_space<vmem>>, vector<1x16x16xbf16>
    %84 = vector.shape_cast %83 : vector<1x16x16xbf16> to vector<16x16xbf16>
    %c4 = arith.constant 4 : index
    %c0_49 = arith.constant 0 : index
    %c0_50 = arith.constant 0 : index
    %85 = vector.load %arg9[%c4, %c0_49, %c0_50] : memref<13x1x16xf32, #tpu.memory_space<vmem>>, vector<1x1x16xf32>
    %86 = vector.shape_cast %85 : vector<1x1x16xf32> to vector<1x16xf32>
    %cst_51 = arith.constant dense<0.000000e+00> : vector<64x16xf32>
    %87 = tpu.matmul %25, %82, %cst_51 {dimension_numbers = #tpu.dot_dimension_numbers<[1], [0], [0], [1], [0, 0, 1, 1], [], []>} : vector<64x16xbf16>, vector<16x16xbf16>, vector<64x16xf32> -> vector<64x16xf32>
    %88 = vector.broadcast %86 : vector<1x16xf32> to vector<64x16xf32>
    %89 = arith.addf %88, %87 : vector<64x16xf32>
    %cst_52 = arith.constant dense<0.000000e+00> : vector<256x16xf32>
    %90 = tpu.matmul %80, %84, %cst_52 {dimension_numbers = #tpu.dot_dimension_numbers<[1], [0], [0], [1], [0, 0, 1, 1], [], []>} : vector<256x16xbf16>, vector<16x16xbf16>, vector<256x16xf32> -> vector<256x16xf32>
    %91 = vector.extract_strided_slice %90 {offsets = [0, 0], sizes = [64, 16], strides = [1, 1]} : vector<256x16xf32> to vector<64x16xf32>
    %92 = vector.extract_strided_slice %90 {offsets = [64, 0], sizes = [64, 16], strides = [1, 1]} : vector<256x16xf32> to vector<64x16xf32>
    %93 = vector.extract_strided_slice %90 {offsets = [128, 0], sizes = [64, 16], strides = [1, 1]} : vector<256x16xf32> to vector<64x16xf32>
    %94 = vector.extract_strided_slice %90 {offsets = [192, 0], sizes = [64, 16], strides = [1, 1]} : vector<256x16xf32> to vector<64x16xf32>
    %95 = arith.maximumf %91, %92 : vector<64x16xf32>
    %96 = arith.maximumf %93, %94 : vector<64x16xf32>
    %97 = arith.maximumf %95, %96 : vector<64x16xf32>
    %98 = arith.addf %89, %97 : vector<64x16xf32>
    %99 = arith.truncf %98 : vector<64x16xf32> to vector<64x16xbf16>
    %100 = tpu.concatenate %25, %99 in 1 : vector<64x16xbf16>, vector<64x16xbf16> -> vector<64x32xbf16>
    %101 = vector.extract_strided_slice %0 {offsets = [256, 0], sizes = [256, 64], strides = [1, 1]} : vector<512x64xbf16> to vector<256x64xbf16>
    %cst_53 = arith.constant dense<0.000000e+00> : vector<256x16xf32>
    %102 = tpu.matmul %101, %99, %cst_53 {dimension_numbers = #tpu.dot_dimension_numbers<[1], [0], [0], [1], [0, 0, 1, 1], [], []>} : vector<256x64xbf16>, vector<64x16xbf16>, vector<256x16xf32> -> vector<256x16xf32>
    %103 = arith.truncf %102 : vector<256x16xf32> to vector<256x16xbf16>
    %104 = tpu.concatenate %80, %103 in 1 : vector<256x16xbf16>, vector<256x16xbf16> -> vector<256x32xbf16>
    %c1_54 = arith.constant 1 : index
    %c0_55 = arith.constant 0 : index
    %c0_56 = arith.constant 0 : index
    %105 = vector.load %arg5[%c1_54, %c0_55, %c0_56] : memref<4x32x16xbf16, #tpu.memory_space<vmem>>, vector<1x32x16xbf16>
    %106 = vector.shape_cast %105 : vector<1x32x16xbf16> to vector<32x16xbf16>
    %c1_57 = arith.constant 1 : index
    %c0_58 = arith.constant 0 : index
    %c0_59 = arith.constant 0 : index
    %107 = vector.load %arg7[%c1_57, %c0_58, %c0_59] : memref<4x32x16xbf16, #tpu.memory_space<vmem>>, vector<1x32x16xbf16>
    %108 = vector.shape_cast %107 : vector<1x32x16xbf16> to vector<32x16xbf16>
    %c5 = arith.constant 5 : index
    %c0_60 = arith.constant 0 : index
    %c0_61 = arith.constant 0 : index
    %109 = vector.load %arg9[%c5, %c0_60, %c0_61] : memref<13x1x16xf32, #tpu.memory_space<vmem>>, vector<1x1x16xf32>
    %110 = vector.shape_cast %109 : vector<1x1x16xf32> to vector<1x16xf32>
    %cst_62 = arith.constant dense<0.000000e+00> : vector<64x16xf32>
    %111 = tpu.matmul %100, %106, %cst_62 {dimension_numbers = #tpu.dot_dimension_numbers<[1], [0], [0], [1], [0, 0, 1, 1], [], []>} : vector<64x32xbf16>, vector<32x16xbf16>, vector<64x16xf32> -> vector<64x16xf32>
    %112 = vector.broadcast %110 : vector<1x16xf32> to vector<64x16xf32>
    %113 = arith.addf %112, %111 : vector<64x16xf32>
    %cst_63 = arith.constant dense<0.000000e+00> : vector<256x16xf32>
    %114 = tpu.matmul %104, %108, %cst_63 {dimension_numbers = #tpu.dot_dimension_numbers<[1], [0], [0], [1], [0, 0, 1, 1], [], []>} : vector<256x32xbf16>, vector<32x16xbf16>, vector<256x16xf32> -> vector<256x16xf32>
    %115 = vector.extract_strided_slice %114 {offsets = [0, 0], sizes = [64, 16], strides = [1, 1]} : vector<256x16xf32> to vector<64x16xf32>
    %116 = vector.extract_strided_slice %114 {offsets = [64, 0], sizes = [64, 16], strides = [1, 1]} : vector<256x16xf32> to vector<64x16xf32>
    %117 = vector.extract_strided_slice %114 {offsets = [128, 0], sizes = [64, 16], strides = [1, 1]} : vector<256x16xf32> to vector<64x16xf32>
    %118 = vector.extract_strided_slice %114 {offsets = [192, 0], sizes = [64, 16], strides = [1, 1]} : vector<256x16xf32> to vector<64x16xf32>
    %119 = arith.maximumf %115, %116 : vector<64x16xf32>
    %120 = arith.maximumf %117, %118 : vector<64x16xf32>
    %121 = arith.maximumf %119, %120 : vector<64x16xf32>
    %122 = arith.addf %113, %121 : vector<64x16xf32>
    %123 = arith.truncf %122 : vector<64x16xf32> to vector<64x16xbf16>
    %124 = tpu.concatenate %100, %123 in 1 : vector<64x32xbf16>, vector<64x16xbf16> -> vector<64x48xbf16>
    %c6 = arith.constant 6 : index
    %c0_64 = arith.constant 0 : index
    %c0_65 = arith.constant 0 : index
    %125 = vector.load %arg9[%c6, %c0_64, %c0_65] : memref<13x1x16xf32, #tpu.memory_space<vmem>>, vector<1x1x16xf32>
    %126 = vector.shape_cast %125 : vector<1x1x16xf32> to vector<1x16xf32>
    %c1_66 = arith.constant 1 : index
    %c0_67 = arith.constant 0 : index
    %c0_68 = arith.constant 0 : index
    %127 = vector.load %arg8[%c1_66, %c0_67, %c0_68] : memref<4x48x16xbf16, #tpu.memory_space<vmem>>, vector<1x48x16xbf16>
    %128 = vector.shape_cast %127 : vector<1x48x16xbf16> to vector<48x16xbf16>
    %cst_69 = arith.constant dense<0.000000e+00> : vector<64x16xf32>
    %129 = tpu.matmul %124, %128, %cst_69 {dimension_numbers = #tpu.dot_dimension_numbers<[1], [0], [0], [1], [0, 0, 1, 1], [], []>} : vector<64x48xbf16>, vector<48x16xbf16>, vector<64x16xf32> -> vector<64x16xf32>
    %130 = vector.broadcast %126 : vector<1x16xf32> to vector<64x16xf32>
    %131 = arith.addf %130, %129 : vector<64x16xf32>
    %132 = arith.maximumf %79, %131 : vector<64x16xf32>
    %133 = arith.addf %24, %132 : vector<64x16xf32>
    %134 = arith.truncf %132 : vector<64x16xf32> to vector<64x16xbf16>
    %cst_70 = arith.constant dense<0.000000e+00> : vector<512x16xf32>
    %135 = tpu.matmul %0, %134, %cst_70 {dimension_numbers = #tpu.dot_dimension_numbers<[1], [0], [0], [1], [0, 0, 1, 1], [], []>} : vector<512x64xbf16>, vector<64x16xbf16>, vector<512x16xf32> -> vector<512x16xf32>
    %136 = arith.truncf %135 : vector<512x16xf32> to vector<512x16xbf16>
    %137 = vector.extract_strided_slice %136 {offsets = [0, 0], sizes = [256, 16], strides = [1, 1]} : vector<512x16xbf16> to vector<256x16xbf16>
    %c2_71 = arith.constant 2 : index
    %c0_72 = arith.constant 0 : index
    %c0_73 = arith.constant 0 : index
    %138 = vector.load %arg4[%c2_71, %c0_72, %c0_73] : memref<4x16x16xbf16, #tpu.memory_space<vmem>>, vector<1x16x16xbf16>
    %139 = vector.shape_cast %138 : vector<1x16x16xbf16> to vector<16x16xbf16>
    %c2_74 = arith.constant 2 : index
    %c0_75 = arith.constant 0 : index
    %c0_76 = arith.constant 0 : index
    %140 = vector.load %arg6[%c2_74, %c0_75, %c0_76] : memref<4x16x16xbf16, #tpu.memory_space<vmem>>, vector<1x16x16xbf16>
    %141 = vector.shape_cast %140 : vector<1x16x16xbf16> to vector<16x16xbf16>
    %c7 = arith.constant 7 : index
    %c0_77 = arith.constant 0 : index
    %c0_78 = arith.constant 0 : index
    %142 = vector.load %arg9[%c7, %c0_77, %c0_78] : memref<13x1x16xf32, #tpu.memory_space<vmem>>, vector<1x1x16xf32>
    %143 = vector.shape_cast %142 : vector<1x1x16xf32> to vector<1x16xf32>
    %cst_79 = arith.constant dense<0.000000e+00> : vector<64x16xf32>
    %144 = tpu.matmul %134, %139, %cst_79 {dimension_numbers = #tpu.dot_dimension_numbers<[1], [0], [0], [1], [0, 0, 1, 1], [], []>} : vector<64x16xbf16>, vector<16x16xbf16>, vector<64x16xf32> -> vector<64x16xf32>
    %145 = vector.broadcast %143 : vector<1x16xf32> to vector<64x16xf32>
    %146 = arith.addf %145, %144 : vector<64x16xf32>
    %cst_80 = arith.constant dense<0.000000e+00> : vector<256x16xf32>
    %147 = tpu.matmul %137, %141, %cst_80 {dimension_numbers = #tpu.dot_dimension_numbers<[1], [0], [0], [1], [0, 0, 1, 1], [], []>} : vector<256x16xbf16>, vector<16x16xbf16>, vector<256x16xf32> -> vector<256x16xf32>
    %148 = vector.extract_strided_slice %147 {offsets = [0, 0], sizes = [64, 16], strides = [1, 1]} : vector<256x16xf32> to vector<64x16xf32>
    %149 = vector.extract_strided_slice %147 {offsets = [64, 0], sizes = [64, 16], strides = [1, 1]} : vector<256x16xf32> to vector<64x16xf32>
    %150 = vector.extract_strided_slice %147 {offsets = [128, 0], sizes = [64, 16], strides = [1, 1]} : vector<256x16xf32> to vector<64x16xf32>
    %151 = vector.extract_strided_slice %147 {offsets = [192, 0], sizes = [64, 16], strides = [1, 1]} : vector<256x16xf32> to vector<64x16xf32>
    %152 = arith.maximumf %148, %149 : vector<64x16xf32>
    %153 = arith.maximumf %150, %151 : vector<64x16xf32>
    %154 = arith.maximumf %152, %153 : vector<64x16xf32>
    %155 = arith.addf %146, %154 : vector<64x16xf32>
    %156 = arith.truncf %155 : vector<64x16xf32> to vector<64x16xbf16>
    %157 = tpu.concatenate %134, %156 in 1 : vector<64x16xbf16>, vector<64x16xbf16> -> vector<64x32xbf16>
    %158 = vector.extract_strided_slice %0 {offsets = [0, 0], sizes = [256, 64], strides = [1, 1]} : vector<512x64xbf16> to vector<256x64xbf16>
    %cst_81 = arith.constant dense<0.000000e+00> : vector<256x16xf32>
    %159 = tpu.matmul %158, %156, %cst_81 {dimension_numbers = #tpu.dot_dimension_numbers<[1], [0], [0], [1], [0, 0, 1, 1], [], []>} : vector<256x64xbf16>, vector<64x16xbf16>, vector<256x16xf32> -> vector<256x16xf32>
    %160 = arith.truncf %159 : vector<256x16xf32> to vector<256x16xbf16>
    %161 = tpu.concatenate %137, %160 in 1 : vector<256x16xbf16>, vector<256x16xbf16> -> vector<256x32xbf16>
    %c2_82 = arith.constant 2 : index
    %c0_83 = arith.constant 0 : index
    %c0_84 = arith.constant 0 : index
    %162 = vector.load %arg5[%c2_82, %c0_83, %c0_84] : memref<4x32x16xbf16, #tpu.memory_space<vmem>>, vector<1x32x16xbf16>
    %163 = vector.shape_cast %162 : vector<1x32x16xbf16> to vector<32x16xbf16>
    %c2_85 = arith.constant 2 : index
    %c0_86 = arith.constant 0 : index
    %c0_87 = arith.constant 0 : index
    %164 = vector.load %arg7[%c2_85, %c0_86, %c0_87] : memref<4x32x16xbf16, #tpu.memory_space<vmem>>, vector<1x32x16xbf16>
    %165 = vector.shape_cast %164 : vector<1x32x16xbf16> to vector<32x16xbf16>
    %c8 = arith.constant 8 : index
    %c0_88 = arith.constant 0 : index
    %c0_89 = arith.constant 0 : index
    %166 = vector.load %arg9[%c8, %c0_88, %c0_89] : memref<13x1x16xf32, #tpu.memory_space<vmem>>, vector<1x1x16xf32>
    %167 = vector.shape_cast %166 : vector<1x1x16xf32> to vector<1x16xf32>
    %cst_90 = arith.constant dense<0.000000e+00> : vector<64x16xf32>
    %168 = tpu.matmul %157, %163, %cst_90 {dimension_numbers = #tpu.dot_dimension_numbers<[1], [0], [0], [1], [0, 0, 1, 1], [], []>} : vector<64x32xbf16>, vector<32x16xbf16>, vector<64x16xf32> -> vector<64x16xf32>
    %169 = vector.broadcast %167 : vector<1x16xf32> to vector<64x16xf32>
    %170 = arith.addf %169, %168 : vector<64x16xf32>
    %cst_91 = arith.constant dense<0.000000e+00> : vector<256x16xf32>
    %171 = tpu.matmul %161, %165, %cst_91 {dimension_numbers = #tpu.dot_dimension_numbers<[1], [0], [0], [1], [0, 0, 1, 1], [], []>} : vector<256x32xbf16>, vector<32x16xbf16>, vector<256x16xf32> -> vector<256x16xf32>
    %172 = vector.extract_strided_slice %171 {offsets = [0, 0], sizes = [64, 16], strides = [1, 1]} : vector<256x16xf32> to vector<64x16xf32>
    %173 = vector.extract_strided_slice %171 {offsets = [64, 0], sizes = [64, 16], strides = [1, 1]} : vector<256x16xf32> to vector<64x16xf32>
    %174 = vector.extract_strided_slice %171 {offsets = [128, 0], sizes = [64, 16], strides = [1, 1]} : vector<256x16xf32> to vector<64x16xf32>
    %175 = vector.extract_strided_slice %171 {offsets = [192, 0], sizes = [64, 16], strides = [1, 1]} : vector<256x16xf32> to vector<64x16xf32>
    %176 = arith.maximumf %172, %173 : vector<64x16xf32>
    %177 = arith.maximumf %174, %175 : vector<64x16xf32>
    %178 = arith.maximumf %176, %177 : vector<64x16xf32>
    %179 = arith.addf %170, %178 : vector<64x16xf32>
    %180 = arith.truncf %179 : vector<64x16xf32> to vector<64x16xbf16>
    %181 = tpu.concatenate %157, %180 in 1 : vector<64x32xbf16>, vector<64x16xbf16> -> vector<64x48xbf16>
    %c9 = arith.constant 9 : index
    %c0_92 = arith.constant 0 : index
    %c0_93 = arith.constant 0 : index
    %182 = vector.load %arg9[%c9, %c0_92, %c0_93] : memref<13x1x16xf32, #tpu.memory_space<vmem>>, vector<1x1x16xf32>
    %183 = vector.shape_cast %182 : vector<1x1x16xf32> to vector<1x16xf32>
    %c2_94 = arith.constant 2 : index
    %c0_95 = arith.constant 0 : index
    %c0_96 = arith.constant 0 : index
    %184 = vector.load %arg8[%c2_94, %c0_95, %c0_96] : memref<4x48x16xbf16, #tpu.memory_space<vmem>>, vector<1x48x16xbf16>
    %185 = vector.shape_cast %184 : vector<1x48x16xbf16> to vector<48x16xbf16>
    %cst_97 = arith.constant dense<0.000000e+00> : vector<64x16xf32>
    %186 = tpu.matmul %181, %185, %cst_97 {dimension_numbers = #tpu.dot_dimension_numbers<[1], [0], [0], [1], [0, 0, 1, 1], [], []>} : vector<64x48xbf16>, vector<48x16xbf16>, vector<64x16xf32> -> vector<64x16xf32>
    %187 = vector.broadcast %183 : vector<1x16xf32> to vector<64x16xf32>
    %188 = arith.addf %187, %186 : vector<64x16xf32>
    %189 = vector.extract_strided_slice %136 {offsets = [256, 0], sizes = [256, 16], strides = [1, 1]} : vector<512x16xbf16> to vector<256x16xbf16>
    %c3_98 = arith.constant 3 : index
    %c0_99 = arith.constant 0 : index
    %c0_100 = arith.constant 0 : index
    %190 = vector.load %arg4[%c3_98, %c0_99, %c0_100] : memref<4x16x16xbf16, #tpu.memory_space<vmem>>, vector<1x16x16xbf16>
    %191 = vector.shape_cast %190 : vector<1x16x16xbf16> to vector<16x16xbf16>
    %c3_101 = arith.constant 3 : index
    %c0_102 = arith.constant 0 : index
    %c0_103 = arith.constant 0 : index
    %192 = vector.load %arg6[%c3_101, %c0_102, %c0_103] : memref<4x16x16xbf16, #tpu.memory_space<vmem>>, vector<1x16x16xbf16>
    %193 = vector.shape_cast %192 : vector<1x16x16xbf16> to vector<16x16xbf16>
    %c10 = arith.constant 10 : index
    %c0_104 = arith.constant 0 : index
    %c0_105 = arith.constant 0 : index
    %194 = vector.load %arg9[%c10, %c0_104, %c0_105] : memref<13x1x16xf32, #tpu.memory_space<vmem>>, vector<1x1x16xf32>
    %195 = vector.shape_cast %194 : vector<1x1x16xf32> to vector<1x16xf32>
    %cst_106 = arith.constant dense<0.000000e+00> : vector<64x16xf32>
    %196 = tpu.matmul %134, %191, %cst_106 {dimension_numbers = #tpu.dot_dimension_numbers<[1], [0], [0], [1], [0, 0, 1, 1], [], []>} : vector<64x16xbf16>, vector<16x16xbf16>, vector<64x16xf32> -> vector<64x16xf32>
    %197 = vector.broadcast %195 : vector<1x16xf32> to vector<64x16xf32>
    %198 = arith.addf %197, %196 : vector<64x16xf32>
    %cst_107 = arith.constant dense<0.000000e+00> : vector<256x16xf32>
    %199 = tpu.matmul %189, %193, %cst_107 {dimension_numbers = #tpu.dot_dimension_numbers<[1], [0], [0], [1], [0, 0, 1, 1], [], []>} : vector<256x16xbf16>, vector<16x16xbf16>, vector<256x16xf32> -> vector<256x16xf32>
    %200 = vector.extract_strided_slice %199 {offsets = [0, 0], sizes = [64, 16], strides = [1, 1]} : vector<256x16xf32> to vector<64x16xf32>
    %201 = vector.extract_strided_slice %199 {offsets = [64, 0], sizes = [64, 16], strides = [1, 1]} : vector<256x16xf32> to vector<64x16xf32>
    %202 = vector.extract_strided_slice %199 {offsets = [128, 0], sizes = [64, 16], strides = [1, 1]} : vector<256x16xf32> to vector<64x16xf32>
    %203 = vector.extract_strided_slice %199 {offsets = [192, 0], sizes = [64, 16], strides = [1, 1]} : vector<256x16xf32> to vector<64x16xf32>
    %204 = arith.maximumf %200, %201 : vector<64x16xf32>
    %205 = arith.maximumf %202, %203 : vector<64x16xf32>
    %206 = arith.maximumf %204, %205 : vector<64x16xf32>
    %207 = arith.addf %198, %206 : vector<64x16xf32>
    %208 = arith.truncf %207 : vector<64x16xf32> to vector<64x16xbf16>
    %209 = tpu.concatenate %134, %208 in 1 : vector<64x16xbf16>, vector<64x16xbf16> -> vector<64x32xbf16>
    %210 = vector.extract_strided_slice %0 {offsets = [256, 0], sizes = [256, 64], strides = [1, 1]} : vector<512x64xbf16> to vector<256x64xbf16>
    %cst_108 = arith.constant dense<0.000000e+00> : vector<256x16xf32>
    %211 = tpu.matmul %210, %208, %cst_108 {dimension_numbers = #tpu.dot_dimension_numbers<[1], [0], [0], [1], [0, 0, 1, 1], [], []>} : vector<256x64xbf16>, vector<64x16xbf16>, vector<256x16xf32> -> vector<256x16xf32>
    %212 = arith.truncf %211 : vector<256x16xf32> to vector<256x16xbf16>
    %213 = tpu.concatenate %189, %212 in 1 : vector<256x16xbf16>, vector<256x16xbf16> -> vector<256x32xbf16>
    %c3_109 = arith.constant 3 : index
    %c0_110 = arith.constant 0 : index
    %c0_111 = arith.constant 0 : index
    %214 = vector.load %arg5[%c3_109, %c0_110, %c0_111] : memref<4x32x16xbf16, #tpu.memory_space<vmem>>, vector<1x32x16xbf16>
    %215 = vector.shape_cast %214 : vector<1x32x16xbf16> to vector<32x16xbf16>
    %c3_112 = arith.constant 3 : index
    %c0_113 = arith.constant 0 : index
    %c0_114 = arith.constant 0 : index
    %216 = vector.load %arg7[%c3_112, %c0_113, %c0_114] : memref<4x32x16xbf16, #tpu.memory_space<vmem>>, vector<1x32x16xbf16>
    %217 = vector.shape_cast %216 : vector<1x32x16xbf16> to vector<32x16xbf16>
    %c11 = arith.constant 11 : index
    %c0_115 = arith.constant 0 : index
    %c0_116 = arith.constant 0 : index
    %218 = vector.load %arg9[%c11, %c0_115, %c0_116] : memref<13x1x16xf32, #tpu.memory_space<vmem>>, vector<1x1x16xf32>
    %219 = vector.shape_cast %218 : vector<1x1x16xf32> to vector<1x16xf32>
    %cst_117 = arith.constant dense<0.000000e+00> : vector<64x16xf32>
    %220 = tpu.matmul %209, %215, %cst_117 {dimension_numbers = #tpu.dot_dimension_numbers<[1], [0], [0], [1], [0, 0, 1, 1], [], []>} : vector<64x32xbf16>, vector<32x16xbf16>, vector<64x16xf32> -> vector<64x16xf32>
    %221 = vector.broadcast %219 : vector<1x16xf32> to vector<64x16xf32>
    %222 = arith.addf %221, %220 : vector<64x16xf32>
    %cst_118 = arith.constant dense<0.000000e+00> : vector<256x16xf32>
    %223 = tpu.matmul %213, %217, %cst_118 {dimension_numbers = #tpu.dot_dimension_numbers<[1], [0], [0], [1], [0, 0, 1, 1], [], []>} : vector<256x32xbf16>, vector<32x16xbf16>, vector<256x16xf32> -> vector<256x16xf32>
    %224 = vector.extract_strided_slice %223 {offsets = [0, 0], sizes = [64, 16], strides = [1, 1]} : vector<256x16xf32> to vector<64x16xf32>
    %225 = vector.extract_strided_slice %223 {offsets = [64, 0], sizes = [64, 16], strides = [1, 1]} : vector<256x16xf32> to vector<64x16xf32>
    %226 = vector.extract_strided_slice %223 {offsets = [128, 0], sizes = [64, 16], strides = [1, 1]} : vector<256x16xf32> to vector<64x16xf32>
    %227 = vector.extract_strided_slice %223 {offsets = [192, 0], sizes = [64, 16], strides = [1, 1]} : vector<256x16xf32> to vector<64x16xf32>
    %228 = arith.maximumf %224, %225 : vector<64x16xf32>
    %229 = arith.maximumf %226, %227 : vector<64x16xf32>
    %230 = arith.maximumf %228, %229 : vector<64x16xf32>
    %231 = arith.addf %222, %230 : vector<64x16xf32>
    %232 = arith.truncf %231 : vector<64x16xf32> to vector<64x16xbf16>
    %233 = tpu.concatenate %209, %232 in 1 : vector<64x32xbf16>, vector<64x16xbf16> -> vector<64x48xbf16>
    %c12 = arith.constant 12 : index
    %c0_119 = arith.constant 0 : index
    %c0_120 = arith.constant 0 : index
    %234 = vector.load %arg9[%c12, %c0_119, %c0_120] : memref<13x1x16xf32, #tpu.memory_space<vmem>>, vector<1x1x16xf32>
    %235 = vector.shape_cast %234 : vector<1x1x16xf32> to vector<1x16xf32>
    %c3_121 = arith.constant 3 : index
    %c0_122 = arith.constant 0 : index
    %c0_123 = arith.constant 0 : index
    %236 = vector.load %arg8[%c3_121, %c0_122, %c0_123] : memref<4x48x16xbf16, #tpu.memory_space<vmem>>, vector<1x48x16xbf16>
    %237 = vector.shape_cast %236 : vector<1x48x16xbf16> to vector<48x16xbf16>
    %cst_124 = arith.constant dense<0.000000e+00> : vector<64x16xf32>
    %238 = tpu.matmul %233, %237, %cst_124 {dimension_numbers = #tpu.dot_dimension_numbers<[1], [0], [0], [1], [0, 0, 1, 1], [], []>} : vector<64x48xbf16>, vector<48x16xbf16>, vector<64x16xf32> -> vector<64x16xf32>
    %239 = vector.broadcast %235 : vector<1x16xf32> to vector<64x16xf32>
    %240 = arith.addf %239, %238 : vector<64x16xf32>
    %241 = arith.maximumf %188, %240 : vector<64x16xf32>
    %242 = arith.addf %133, %241 : vector<64x16xf32>
    %cst_125 = arith.constant 5.000000e-01 : f32
    %243 = vector.broadcast %cst_125 : f32 to vector<64x16xf32>
    %244 = arith.mulf %242, %243 : vector<64x16xf32>
    %c0_126 = arith.constant 0 : index
    %c0_127 = arith.constant 0 : index
    %245 = vector.load %arg10[%c0_126, %c0_127] : memref<64x16xf32, #tpu.memory_space<vmem>>, vector<64x16xf32>
    tpu.vector_store %arg10[%c0_126, %c0_127], %244 {strides = array<i32>} : memref<64x16xf32, #tpu.memory_space<vmem>>, vector<64x16xf32>,
    return
  }
  func.func @transform_0(%arg0: i32) -> (i32, i32) {
    %c0_i32 = arith.constant 0 : i32
    %c0_i32_0 = arith.constant 0 : i32
    %c0_i32_1 = arith.constant 0 : i32
    return %c0_i32, %c0_i32_0 : i32, i32
  }
  func.func @transform_1(%arg0: i32) -> (i32, i32) {
    %c0_i32 = arith.constant 0 : i32
    %c0_i32_0 = arith.constant 0 : i32
    %c0_i32_1 = arith.constant 0 : i32
    return %c0_i32, %c0_i32_0 : i32, i32
  }
  func.func @transform_2(%arg0: i32) -> (i32, i32, i32) {
    %c0_i32 = arith.constant 0 : i32
    %c0_i32_0 = arith.constant 0 : i32
    %c0_i32_1 = arith.constant 0 : i32
    %c0_i32_2 = arith.constant 0 : i32
    return %c0_i32, %c0_i32_0, %c0_i32_1 : i32, i32, i32
  }
  func.func @transform_3(%arg0: i32) -> (i32, i32, i32) {
    %c0_i32 = arith.constant 0 : i32
    %c0_i32_0 = arith.constant 0 : i32
    %c0_i32_1 = arith.constant 0 : i32
    %c0_i32_2 = arith.constant 0 : i32
    return %c0_i32, %c0_i32_0, %c0_i32_1 : i32, i32, i32
  }
  func.func @transform_4(%arg0: i32) -> (i32, i32, i32) {
    %c0_i32 = arith.constant 0 : i32
    %c0_i32_0 = arith.constant 0 : i32
    %c0_i32_1 = arith.constant 0 : i32
    %c0_i32_2 = arith.constant 0 : i32
    return %c0_i32, %c0_i32_0, %c0_i32_1 : i32, i32, i32
  }
  func.func @transform_5(%arg0: i32) -> (i32, i32, i32) {
    %c0_i32 = arith.constant 0 : i32
    %c0_i32_0 = arith.constant 0 : i32
    %c0_i32_1 = arith.constant 0 : i32
    %c0_i32_2 = arith.constant 0 : i32
    return %c0_i32, %c0_i32_0, %c0_i32_1 : i32, i32, i32
  }
  func.func @transform_6(%arg0: i32) -> (i32, i32, i32) {
    %c0_i32 = arith.constant 0 : i32
    %c0_i32_0 = arith.constant 0 : i32
    %c0_i32_1 = arith.constant 0 : i32
    %c0_i32_2 = arith.constant 0 : i32
    return %c0_i32, %c0_i32_0, %c0_i32_1 : i32, i32, i32
  }
  func.func @transform_7(%arg0: i32) -> (i32, i32, i32) {
    %c0_i32 = arith.constant 0 : i32
    %c0_i32_0 = arith.constant 0 : i32
    %c0_i32_1 = arith.constant 0 : i32
    %c0_i32_2 = arith.constant 0 : i32
    return %c0_i32, %c0_i32_0, %c0_i32_1 : i32, i32, i32
  }
  func.func @transform_8(%arg0: i32) -> (i32, i32, i32) {
    %c0_i32 = arith.constant 0 : i32
    %c0_i32_0 = arith.constant 0 : i32
    %c0_i32_1 = arith.constant 0 : i32
    %c0_i32_2 = arith.constant 0 : i32
    return %c0_i32, %c0_i32_0, %c0_i32_1 : i32, i32, i32
  }
  func.func @transform_9(%arg0: i32) -> (i32, i32) {
    %c0_i32 = arith.constant 0 : i32
    %c0_i32_0 = arith.constant 0 : i32
    %c0_i32_1 = arith.constant 0 : i32
    return %c0_i32, %c0_i32_0 : i32, i32
  }
}

</mosaic_0001>

<bundles_post_ra>
// kernel: eq.1
= control target key start
LH: loop header
LB: loop body
LE: loop exit
PB: predicated region body
PF: predicated region fallthrough
CT: control target
= control target key end

     0   :  { %s6_s8 = smov 3  ;;  %vm8_vm0 = vcmask 523264   ;;  %s24_s9 = smov 64   ;;  %vm15_vm1 = vcmask 1048064   ;;  %s41_s0 = inlined_call_operand.vmem [shape: s32[4,64], index: 0, kind: input, shape index: {}]   ;;  %s42_s1 = inlined_call_operand.vmem [shape: s32[256], index: 1, kind: output, shape index: {}]  }
   0x1   :  { %v4_v0 = vld [vmem:[%s41_s0] sm:$0xf]  ;;  %s11_s0 = smov 3 }
   0x2   :  { %5 = vst [vmem:[#allocation1] sm:$0xf] %v4_v0 }
   0x9   :  { %v12_v1 = vld [vmem:[#allocation1 + $0x1] ss:$2 sm:%s11_s0]   ;;  %v7_v2 = vld [vmem:[#allocation1] ss:$2 sm:%s6_s8]  }
   0xa   :  { %13 = vrot.lane.b32.xlu0 %v12_v1, %s24_s9  ;;  %9 = vst.msk [vmem:[#allocation0] sm:$0x3] %vm8_vm0, %v7_v2  }
  0x7c   :  { %v14_v3 = vpop.permute.xlu0 %13  }
  0x7d   :  { %16 = vst.msk [vmem:[#allocation0] sm:$0x3] %vm15_vm1, %v14_v3  }
  0x84   :  { %v20_v4 = vld [vmem:[#allocation0] sm:$0x3] }
  0x85   :  { %22 = vst [vmem:[%s42_s1] sm:$0x3] %v20_v4 }

// kernel: custom-call
= control target key start
LH: loop header
LB: loop body
LE: loop exit
PB: predicated region body
PF: predicated region fallthrough
CT: control target
= control target key end

     0   :  { %s6_s0 = inlined_call_operand.vmem [shape: f32[64], index: 0, kind: output, shape index: {}]  }

// kernel: inception_feature_extractor_forward.1
= control target key start
LH: loop header
LB: loop body
LE: loop exit
PB: predicated region body
PF: predicated region fallthrough
CT: control target
= control target key end

     0   :  { %vm124_vm0 = vcmask 1040384   ;;  %vm125_vm1 = vcmask 1041408   ;;  %v7671_v0 = vmov 65535   ;;  %vm111_vm2 = vcmask 23552   ;;  %s7672_s13 = smov 16   ;;  %s7673_s29 = smov 32   ;;  %s9595_s2 = inlined_call_operand.vmem [shape: bf16[2,3,16], index: 2, kind: input, shape index: {}]   ;;  %s9596_s0 = inlined_call_operand.vmem [shape: f32[64,3], index: 0, kind: input, shape index: {}]   ;;  %s9597_s1 = inlined_call_operand.vmem [shape: bf16[512,64], index: 1, kind: input, shape index: {}]   ;;  %s9598_s3 = inlined_call_operand.vmem [shape: bf16[4,16,16], index: 3, kind: input, shape index: {}]   ;;  %s9599_s8 = inlined_call_operand.vmem [shape: f32[13,1,16], index: 8, kind: input, shape index: {}]   ;;  %s9600_s5 = inlined_call_operand.vmem [shape: bf16[4,16,16], index: 5, kind: input, shape index: {}]   ;;  %s9601_s4 = inlined_call_operand.vmem [shape: bf16[4,32,16], index: 4, kind: input, shape index: {}]   ;;  %s9602_s6 = inlined_call_operand.vmem [shape: bf16[4,32,16], index: 6, kind: input, shape index: {}]   ;;  %s9603_s7 = inlined_call_operand.vmem [shape: bf16[4,48,16], index: 7, kind: input, shape index: {}]   ;;  %s9604_s9 = inlined_call_operand.vmem [shape: f32[64,16], index: 9, kind: output, shape index: {}]  }
   0x1   :  { %v126_v1 = vsel %vm124_vm0, 4294967295, %v7671_v0  ;;  %v5891_v2 = vld [vmem:[%s9595_s2 + $0x2] sm:$0x3]  ;;  %v98_v4 = vld [vmem:[%s9596_s0 + $0x8] sm:$0xff]  ;;  %v99_v7 = vld [vmem:[%s9596_s0 + $0x10] sm:$0xff]  ;;  %vm364_vm3 = vcmask 523264  }
   0x2   :  { %v97_v3 = vld [vmem:[%s9596_s0] sm:$0xff]  ;;  %v127_v5 = vsel %vm125_vm1, %v126_v1, 0  ;;  %v100_v8 = vld [vmem:[%s9596_s0 + $0x18] sm:$0xff]  ;;  %v102_v11 = vld [vmem:[%s9596_s0 + $0x28] sm:$0xff]  ;;  %vm1071_vm4 = vcmask 130048   ;;  %vm1713_vm5 = vcmask 261120  }
   0x3   :  { %v105_v6 = vpack.c.bf16 %v98_v4, %v97_v3  ;;  %v213_v9 = vand.u32 %v5891_v2, %v127_v5  ;;  %v101_v10 = vld [vmem:[%s9596_s0 + $0x20] sm:$0xff]  ;;  %v106_v13 = vpack.c.bf16 %v100_v8, %v99_v7  ;;  %v103_v16 = vld [vmem:[%s9596_s0 + $0x30] sm:$0xff]  ;;  %v104_v17 = vld [vmem:[%s9596_s0 + $0x38] sm:$0xff]  ;;  %vm2088_vm6 = vcmask 392192  }
   0x4   :  { %v110_v12 = vld [vmem:[%s9595_s2] sm:$0x3]  ;;  %v107_v15 = vpack.c.bf16 %v102_v11, %v101_v10  ;;  %v108_v18 = vpack.c.bf16 %v104_v17, %v103_v16  ;;  %v7795_v41 = vld [vmem:[%s9597_s1 + $0x8] sm:$0xff]   ;;  %v7800_v42 = vld [vmem:[%s9597_s1 + $0x10] sm:$0xff]  }
   0x5   :  { %6768 = vmatprep.mubr.msk.bf16.mxu1 %vm111_vm2, %v105_v6  ;;  %6758 = vmatprep.mubr.msk.bf16.mxu0 %vm111_vm2, %v105_v6  ;;  %v129_v14 = vand.u32 %v127_v5, %v110_v12  ;;  %v7765_v19 = vld [vmem:[%s9597_s1] sm:$0xff]   ;;  %v7809_v43 = vld [vmem:[%s9597_s1 + $0x18] sm:$0xff]   ;;  %v7818_v44 = vld [vmem:[%s9597_s1 + $0x28] sm:$0xff]  }
   0x6   :  { %6766 = vmatprep.subr.bf16.mxu1 %v213_v9  ;;  %v7772_v20 = vld [vmem:[%s9597_s1 + $0x20] sm:$0xff]   ;;  %v7823_v45 = vld [vmem:[%s9597_s1 + $0x30] sm:$0xff]   ;;  %v7832_v46 = vld [vmem:[%s9597_s1 + $0x38] sm:$0xff]  }
   0x7   :  { %6767 = vmatpush3.bf16.msra.mxu1 %v213_v9  ;;  %6756 = vmatprep.subr.bf16.mxu0 %v129_v14  ;;  %v7837_v47 = vld [vmem:[%s9597_s1 + $0x40] sm:$0xff]   ;;  %v7846_v48 = vld [vmem:[%s9597_s1 + $0x48] sm:$0xff]   ;;  %v7851_v49 = vld [vmem:[%s9597_s1 + $0x50] sm:$0xff]  }
   0x8   :  { %6757 = vmatpush3.bf16.msra.mxu0 %v129_v14  ;;  %v7860_v50 = vld [vmem:[%s9597_s1 + $0x58] sm:$0xff]   ;;  %v7865_v51 = vld [vmem:[%s9597_s1 + $0x60] sm:$0xff]   ;;  %v7874_v52 = vld [vmem:[%s9597_s1 + $0x68] sm:$0xff]  }
   0x9   :  { %v7879_v53 = vld [vmem:[%s9597_s1 + $0x70] sm:$0xff]   ;;  %v7888_v54 = vld [vmem:[%s9597_s1 + $0x78] sm:$0xff]  }
   0xa   :  { %6769 = vmatmul.mubr.msk.bf16.vlgmr.msra.gmra.mrb[0].mxu1 %vm111_vm2, %v106_v13 }
   0xb   :  { %6772 = vmatprep.mubr.msk.bf16.mxu1 %vm111_vm2, %v107_v15  ;;  %6759 = vmatmul.mubr.msk.bf16.vlgmr.msra.gmra.mrb[0].mxu0 %vm111_vm2, %v106_v13 }
   0xc   :  { %6762 = vmatprep.mubr.msk.bf16.mxu0 %vm111_vm2, %v107_v15 }
  0x12   :  { %6773 = vmatmul.mubr.msk.bf16.gmra.mrb[4].mxu1 %vm111_vm2, %v108_v18 }
  0x13   :  { %6763 = vmatmul.mubr.msk.bf16.gmra.mrb[4].mxu0 %vm111_vm2, %v108_v18  ;;  %6832 = vmatprep.mubr.msk.bf16.mxu1 %vm364_vm3, %v7772_v20 }
  0x14   :  { %6784 = vmatprep.mubr.msk.bf16.mxu0 %vm364_vm3, %v7765_v19 }
  0xdd   :  { %v6770_v21 = vpop.f32.mrb[0].mxu1 }
  0xde   :  { %v249_v22 = vpop.f32.mrb[1].mxu1  ;;  %v7776_v24 = vpop.f32.mrb[0].mxu0 }
  0xdf   :  { %v6771_v23 = vpop.f32.mrb[2].mxu1  ;;  %v7778_v27 = vpop.f32.mrb[1].mxu0 }
  0xe0   :  { %v281_v25 = vpack.c.bf16 %v6771_v23, %v6770_v21  ;;  %v252_v26 = vpop.f32.mrb[3].mxu1  ;;  %v7780_v29 = vpop.f32.mrb[2].mxu0 }
  0xe1   :  { %v280_v28 = vpack.c.bf16 %v252_v26, %v249_v22  ;;  %v7782_v30 = vpop.f32.mrb[3].mxu0  ;;  %v5890_v26 = vld [vmem:[%s9599_s8] ss:$0 sm:$0xff] }
  0xe3   :  { %6776 = vmatprep.subr.bf16.mxu0 %v280_v28 }
  0xe4   :  { %6777 = vmatpush3.bf16.msra.mxu0 %v280_v28 }
  0xe5   :  { %v6774_v31 = vpop.f32.mrb[4].mxu1  ;;  %6778 = vmatprep.subr.bf16.mxu0 %v281_v25 }
  0xe6   :  { %v265_v32 = vpop.f32.mrb[5].mxu1  ;;  %v7784_v34 = vpop.f32.mrb[4].mxu0 }
  0xe7   :  { %v6775_v33 = vpop.f32.mrb[6].mxu1  ;;  %v7786_v37 = vpop.f32.mrb[5].mxu0 }
  0xe8   :  { %v283_v35 = vpack.c.bf16 %v6775_v33, %v6774_v31  ;;  %v268_v36 = vpop.f32.mrb[7].mxu1  ;;  %6779 = vmatpush3.bf16.msra.mxu0 %v281_v25  ;;  %v7788_v39 = vpop.f32.mrb[6].mxu0 }
  0xe9   :  { %v282_v38 = vpack.c.bf16 %v268_v36, %v265_v32  ;;  %v7790_v40 = vpop.f32.mrb[7].mxu0  ;;  %v204_v36 = vadd.f32 %v7776_v24, %v5890_v26 }
  0xeb   :  { %6780 = vmatprep.subr.bf16.mxu0 %v282_v38 }
  0xec   :  { %6781 = vmatpush3.bf16.msra.mxu0 %v282_v38 }
  0xed   :  { %6782 = vmatprep.subr.bf16.mxu0 %v283_v35 }
  0xf0   :  { %6783 = vmatpush3.bf16.msra.mxu0 %v283_v35 }
  0xf3   :  { %6785 = vmatmul.mubr.msk.bf16.vlgmr.msra.gmra.mrb[8].mxu0 %vm364_vm3, %v7795_v41 }
  0xf4   :  { %6788 = vmatprep.mubr.msk.bf16.mxu0 %vm364_vm3, %v7800_v42 }
  0xfb   :  { %6789 = vmatmul.mubr.msk.bf16.gmra.mrb[12].mxu0 %vm364_vm3, %v7809_v43 }
  0xfc   :  { %6792 = vmatprep.mubr.msk.bf16.mxu0 %vm364_vm3, %v7772_v20 }
 0x103   :  { %6793 = vmatmul.mubr.msk.bf16.gmra.mrb[16].mxu0 %vm364_vm3, %v7818_v44 }
 0x104   :  { %6796 = vmatprep.mubr.msk.bf16.mxu0 %vm364_vm3, %v7823_v45 }
 0x10b   :  { %6797 = vmatmul.mubr.msk.bf16.gmra.mrb[20].mxu0 %vm364_vm3, %v7832_v46 }
 0x10c   :  { %6800 = vmatprep.mubr.msk.bf16.mxu0 %vm364_vm3, %v7837_v47 }
 0x113   :  { %6801 = vmatmul.mubr.msk.bf16.gmra.mrb[24].mxu0 %vm364_vm3, %v7846_v48 }
 0x114   :  { %6804 = vmatprep.mubr.msk.bf16.mxu0 %vm364_vm3, %v7851_v49 }
 0x11b   :  { %6805 = vmatmul.mubr.msk.bf16.gmra.mrb[28].mxu0 %vm364_vm3, %v7860_v50 }
 0x11c   :  { %6808 = vmatprep.mubr.msk.bf16.mxu0 %vm364_vm3, %v7865_v51 }
 0x123   :  { %6809 = vmatmul.mubr.msk.bf16.gmra.mrb[32].mxu0 %vm364_vm3, %v7874_v52 }
 0x124   :  { %6812 = vmatprep.mubr.msk.bf16.mxu0 %vm364_vm3, %v7879_v53 }
 0x12b   :  { %6813 = vmatmul.mubr.msk.bf16.gmra.mrb[36].mxu0 %vm364_vm3, %v7888_v54 }
 0x12c   :  { %6824 = vmatprep.mubr.msk.bf16.mxu0 %vm364_vm3, %v7765_v19 }
 0x1c6   :  { %v6786_v55 = vpop.f32.mrb[8].mxu0 }
 0x1c7   :  { %v447_v56 = vpop.f32.mrb[9].mxu0 }
 0x1c8   :  { %v6787_v57 = vpop.f32.mrb[10].mxu0 }
 0x1c9   :  { %v450_v58 = vpop.f32.mrb[11].mxu0 }
 0x1ce   :  { %v6790_v59 = vpop.f32.mrb[12].mxu0 }
 0x1cf   :  { %v463_v60 = vpop.f32.mrb[13].mxu0 }
 0x1d0   :  { %v7894_v61 = vpop.f32.mrb[14].mxu0 }
 0x1d1   :  { %v7896_v62 = vpop.f32.mrb[15].mxu0 }
 0x1d6   :  { %v6794_v63 = vpop.f32.mrb[16].mxu0 }
 0x1d7   :  { %v576_v0 = vmax.f32 %v6786_v55, %v6794_v63  ;;  %v479_v1 = vpop.f32.mrb[17].mxu0  ;;  %v203_v63 = vadd.f32 %v5890_v26, %v7782_v30  ;;  %v206_v30 = vadd.f32 %v5890_v26, %v7786_v37 }
 0x1d8   :  { %v574_v2 = vmax.f32 %v447_v56, %v479_v1  ;;  %v6795_v3 = vpop.f32.mrb[18].mxu0 }
 0x1d9   :  { %v577_v4 = vmax.f32 %v6787_v57, %v6795_v3  ;;  %v482_v5 = vpop.f32.mrb[19].mxu0  ;;  %v202_v57 = vadd.f32 %v5890_v26, %v7778_v27 }
 0x1da   :  { %v575_v6 = vmax.f32 %v450_v58, %v482_v5 }
 0x1de   :  { %v6798_v7 = vpop.f32.mrb[20].mxu0 }
 0x1df   :  { %v580_v8 = vmax.f32 %v6790_v59, %v6798_v7  ;;  %v495_v9 = vpop.f32.mrb[21].mxu0 }
 0x1e0   :  { %v578_v10 = vmax.f32 %v463_v60, %v495_v9  ;;  %v6799_v11 = vpop.f32.mrb[22].mxu0  ;;  %v205_v60 = vadd.f32 %v7780_v29, %v5890_v26 }
 0x1e1   :  { %v581_v12 = vmax.f32 %v7894_v61, %v6799_v11  ;;  %v498_v13 = vpop.f32.mrb[23].mxu0 }
 0x1e2   :  { %v579_v14 = vmax.f32 %v7896_v62, %v498_v13 }
 0x1e6   :  { %v6802_v15 = vpop.f32.mrb[24].mxu0 }
 0x1e7   :  { %v511_v16 = vpop.f32.mrb[25].mxu0 }
 0x1e8   :  { %v6803_v17 = vpop.f32.mrb[26].mxu0 }
 0x1e9   :  { %v514_v18 = vpop.f32.mrb[27].mxu0 }
 0x1ee   :  { %v6806_v21 = vpop.f32.mrb[28].mxu0 }
 0x1ef   :  { %v527_v22 = vpop.f32.mrb[29].mxu0 }
 0x1f0   :  { %v6807_v23 = vpop.f32.mrb[30].mxu0 }
 0x1f1   :  { %v530_v25 = vpop.f32.mrb[31].mxu0 }
 0x1f6   :  { %v6810_v28 = vpop.f32.mrb[32].mxu0 }
 0x1f7   :  { %v584_v31 = vmax.f32 %v6802_v15, %v6810_v28  ;;  %v543_v32 = vpop.f32.mrb[33].mxu0  ;;  %v208_v15 = vadd.f32 %v7784_v34, %v5890_v26  ;;  %v207_v34 = vadd.f32 %v5890_v26, %v7790_v40  ;;  %v7571_v40 = vld [vmem:[%s9598_s3] sm:$0xff]  }
 0x1f8   :  { %v582_v33 = vmax.f32 %v511_v16, %v543_v32  ;;  %v6811_v35 = vpop.f32.mrb[34].mxu0 }
 0x1f9   :  { %v592_v38 = vmax.f32 %v576_v0, %v584_v31  ;;  %v585_v55 = vmax.f32 %v6803_v17, %v6811_v35  ;;  %v546_v56 = vpop.f32.mrb[35].mxu0 }
 0x1fa   :  { %v590_v58 = vmax.f32 %v574_v2, %v582_v33  ;;  %v583_v59 = vmax.f32 %v514_v18, %v546_v56  ;;  %v209_v18 = vadd.f32 %v7788_v39, %v5890_v26 }
 0x1fb   :  { %v600_v61 = vadd.f32 %v592_v38, %v204_v36  ;;  %v593_v62 = vmax.f32 %v577_v4, %v585_v55 }
 0x1fc   :  { %v598_v1 = vadd.f32 %v590_v58, %v202_v57  ;;  %v591_v3 = vmax.f32 %v575_v6, %v583_v59 }
 0x1fd   :  { %v601_v5 = vadd.f32 %v593_v62, %v205_v60 }
 0x1fe   :  { %v599_v7 = vadd.f32 %v591_v3, %v203_v63  ;;  %v6814_v9 = vpop.f32.mrb[36].mxu0 }
 0x1ff   :  { %v7907_v11 = vpack.c.bf16 %v601_v5, %v600_v61  ;;  %v588_v24 = vmax.f32 %v6806_v21, %v6814_v9  ;;  %v559_v0 = vpop.f32.mrb[37].mxu0 }
 0x200   :  { %v7909_v13 = vpack.c.bf16 %v599_v7, %v598_v1  ;;  %v586_v27 = vmax.f32 %v527_v22, %v559_v0  ;;  %v6815_v2 = vpop.f32.mrb[38].mxu0 }
 0x201   :  { %v596_v29 = vmax.f32 %v580_v8, %v588_v24  ;;  %v589_v16 = vmax.f32 %v6807_v23, %v6815_v2  ;;  %v562_v4 = vpop.f32.mrb[39].mxu0 }
 0x202   :  { %v594_v17 = vmax.f32 %v578_v10, %v586_v27  ;;  %v587_v6 = vmax.f32 %v530_v25, %v562_v4  ;;  %6816 = vmatprep.subr.bf16.mxu0 %v7909_v13  ;;  %7544 = vmatprep.subr.bf16.mxu1 %v7909_v13 }
 0x203   :  { %v604_v21 = vadd.f32 %v596_v29, %v208_v15  ;;  %v597_v28 = vmax.f32 %v581_v12, %v589_v16  ;;  %6817 = vmatpush3.bf16.msra.mxu0 %v7909_v13  ;;  %7548 = vmatpush3.bf16.msra.mxu1 %v7909_v13  ;;  %v7572_v12 = vld [vmem:[%s9600_s5] sm:$0xff]  }
 0x204   :  { %v602_v8 = vadd.f32 %v594_v17, %v206_v30  ;;  %v595_v22 = vmax.f32 %v579_v14, %v587_v6  ;;  %6818 = vmatprep.subr.bf16.mxu0 %v7907_v11  ;;  %7545 = vmatprep.subr.bf16.mxu1 %v7907_v11 }
 0x205   :  { %v605_v37 = vadd.f32 %v597_v28, %v209_v18 }
 0x206   :  { %v603_v10 = vadd.f32 %v595_v22, %v207_v34 }
 0x207   :  { %v7921_v23 = vpack.c.bf16 %v605_v37, %v604_v21  ;;  %6819 = vmatpush3.bf16.msra.mxu0 %v7907_v11  ;;  %7549 = vmatpush3.bf16.msra.mxu1 %v7907_v11 }
 0x208   :  { %v7925_v39 = vpack.c.bf16 %v603_v10, %v602_v8 }
 0x20a   :  { %6820 = vmatprep.subr.bf16.mxu0 %v7925_v39  ;;  %7546 = vmatprep.subr.bf16.mxu1 %v7925_v39 }
 0x20b   :  { %6821 = vmatpush3.bf16.msra.mxu0 %v7925_v39  ;;  %7550 = vmatpush3.bf16.msra.mxu1 %v7925_v39 }
 0x20c   :  { %6822 = vmatprep.subr.bf16.mxu0 %v7921_v23  ;;  %7547 = vmatprep.subr.bf16.mxu1 %v7921_v23 }
 0x20f   :  { %6823 = vmatpush3.bf16.msra.mxu0 %v7921_v23  ;;  %7551 = vmatpush3.bf16.msra.mxu1 %v7921_v23 }
 0x210   :  { %6888 = vmatprep.subr.bf16.mxu0 %v7571_v40 }
 0x212   :  { %6825 = vmatmul.mubr.msk.bf16.vlgmr.msra.gmra.mrb[40].mxu0 %vm364_vm3, %v7795_v41  ;;  %6833 = vmatmul.mubr.msk.bf16.vlgmr.msra.gmra.mrb[8].mxu1 %vm364_vm3, %v7818_v44 }
 0x213   :  { %6828 = vmatprep.mubr.msk.bf16.mxu0 %vm364_vm3, %v7800_v42  ;;  %6889 = vmatpush3.bf16.msra.mxu0 %v7571_v40 }
 0x214   :  { %6836 = vmatprep.mubr.msk.bf16.mxu1 %vm364_vm3, %v7823_v45  ;;  %6898 = vmatprep.subr.bf16.mxu0 %v7572_v12 }
 0x21a   :  { %6829 = vmatmul.mubr.msk.bf16.gmra.mrb[44].mxu0 %vm364_vm3, %v7809_v43  ;;  %6837 = vmatmul.mubr.msk.bf16.gmra.mrb[12].mxu1 %vm364_vm3, %v7832_v46 }
 0x21b   :  { %6890 = vmatprep.mubr.msk.bf16.mxu0 %vm1071_vm4, %v7909_v13  ;;  %6840 = vmatprep.mubr.msk.bf16.mxu1 %vm364_vm3, %v7837_v47 }
 0x222   :  { %6891 = vmatmul.mubr.msk.bf16.vlgmr.msra.gmra.mrb[48].mxu0 %vm1071_vm4, %v7907_v11  ;;  %6841 = vmatmul.mubr.msk.bf16.gmra.mrb[16].mxu1 %vm364_vm3, %v7846_v48 }
 0x223   :  { %6894 = vmatprep.mubr.msk.bf16.mxu0 %vm1071_vm4, %v7925_v39  ;;  %6844 = vmatprep.mubr.msk.bf16.mxu1 %vm364_vm3, %v7851_v49 }
 0x224   :  { %6899 = vmatpush3.bf16.msra.mxu0 %v7572_v12 }
 0x22a   :  { %6895 = vmatmul.mubr.msk.bf16.gmra.mrb[52].mxu0 %vm1071_vm4, %v7921_v23  ;;  %6845 = vmatmul.mubr.msk.bf16.gmra.mrb[20].mxu1 %vm364_vm3, %v7860_v50 }
 0x22b   :  { %6848 = vmatprep.mubr.msk.bf16.mxu1 %vm364_vm3, %v7865_v51 }
 0x232   :  { %6849 = vmatmul.mubr.msk.bf16.gmra.mrb[24].mxu1 %vm364_vm3, %v7874_v52 }
 0x233   :  { %6852 = vmatprep.mubr.msk.bf16.mxu1 %vm364_vm3, %v7879_v53 }
 0x23a   :  { %6853 = vmatmul.mubr.msk.bf16.gmra.mrb[28].mxu1 %vm364_vm3, %v7888_v54 }
 0x2e5   :  { %v6826_v14 = vpop.f32.mrb[40].mxu0  ;;  %v6834_v25 = vpop.f32.mrb[8].mxu1 }
 0x2e6   :  { %v772_v26 = vpop.f32.mrb[41].mxu0  ;;  %v804_v31 = vpop.f32.mrb[9].mxu1 }
 0x2e7   :  { %v6827_v32 = vpop.f32.mrb[42].mxu0  ;;  %v6835_v33 = vpop.f32.mrb[10].mxu1 }
 0x2e8   :  { %v7977_v35 = vpack.c.bf16 %v6827_v32, %v6826_v14  ;;  %v775_v36 = vpop.f32.mrb[43].mxu0  ;;  %v7979_v38 = vpack.c.bf16 %v6835_v33, %v6834_v25  ;;  %v807_v55 = vpop.f32.mrb[11].mxu1 }
 0x2e9   :  { %v7981_v56 = vpack.c.bf16 %v775_v36, %v772_v26  ;;  %v7983_v57 = vpack.c.bf16 %v807_v55, %v804_v31 }
 0x2ea   :  { %9649 = vst [vmem:[#allocation2_spill] sm:$0xff] %v7979_v38 }
 0x2eb   :  { %9650 = vst [vmem:[#allocation3_spill] sm:$0xff] %v7983_v57  ;;  %6900 = vmatprep.mubr.msk.bf16.mxu0 %vm1071_vm4, %v7981_v56 }
 0x2ec   :  { %6901 = vmatmul.mubr.msk.bf16.vlgmr.msra.gmra.mrb[56].mxu0 %vm1071_vm4, %v7977_v35 }
 0x2ed   :  { %v6830_v58 = vpop.f32.mrb[44].mxu0  ;;  %v6838_v59 = vpop.f32.mrb[12].mxu1 }
 0x2ee   :  { %v788_v60 = vpop.f32.mrb[45].mxu0  ;;  %v820_v61 = vpop.f32.mrb[13].mxu1 }
 0x2ef   :  { %v6831_v62 = vpop.f32.mrb[46].mxu0  ;;  %v6839_v63 = vpop.f32.mrb[14].mxu1 }
 0x2f0   :  { %v7989_v1 = vpack.c.bf16 %v6831_v62, %v6830_v58  ;;  %v791_v3 = vpop.f32.mrb[47].mxu0  ;;  %v7991_v5 = vpack.c.bf16 %v6839_v63, %v6838_v59  ;;  %v823_v7 = vpop.f32.mrb[15].mxu1  ;;  %v7573_v62 = vld [vmem:[%s9597_s1 + $0x80] sm:$0xff]   ;;  %v7574_v63 = vld [vmem:[%s9597_s1 + $0x88] sm:$0xff]  }
 0x2f1   :  { %v7993_v9 = vpack.c.bf16 %v791_v3, %v788_v60  ;;  %v7995_v24 = vpack.c.bf16 %v823_v7, %v820_v61  ;;  %6856 = vmatprep.mubr.msk.bf16.mxu1 %vm364_vm3, %v7573_v62  ;;  %v7575_v3 = vld [vmem:[%s9597_s1 + $0x90] sm:$0xff]   ;;  %v7576_v7 = vld [vmem:[%s9597_s1 + $0x98] sm:$0xff]   ;;  %v7589_v62 = vld [vmem:[%s9601_s4] sm:$0xff]  }
 0x2f2   :  { %9651 = vst [vmem:[#allocation4_spill] sm:$0xff] %v7989_v1  ;;  %9652 = vst [vmem:[#allocation5_spill] sm:$0xff] %v7991_v5  ;;  %6857 = vmatmul.mubr.msk.bf16.gmra.mrb[32].mxu1 %vm364_vm3, %v7574_v63  ;;  %6972 = vmatprep.subr.bf16.mxu0 %v7589_v62 }
 0x2f3   :  { %9653 = vst [vmem:[#allocation6_spill] sm:$0xff] %v7993_v9  ;;  %9654 = vst [vmem:[#allocation7_spill] sm:$0xff] %v7995_v24  ;;  %6904 = vmatprep.mubr.msk.bf16.mxu0 %vm1071_vm4, %v7993_v9  ;;  %6860 = vmatprep.mubr.msk.bf16.mxu1 %vm364_vm3, %v7575_v3 }
 0x2f4   :  { %6905 = vmatmul.mubr.msk.bf16.gmra.mrb[60].mxu0 %vm1071_vm4, %v7989_v1 }
 0x2f5   :  { %v8001_v0 = vpop.f32.mrb[48].mxu0  ;;  %6908 = vmatprep.mubr.msk.bf16.mxu0 %vm1071_vm4, %v7983_v57  ;;  %v6842_v27 = vpop.f32.mrb[16].mxu1  ;;  %6973 = vmatpush3.bf16.msra.mxu0 %v7589_v62 }
 0x2f6   :  { %v8005_v2 = vpop.f32.mrb[49].mxu0  ;;  %v836_v15 = vpop.f32.mrb[17].mxu1 }
 0x2f7   :  { %v8007_v29 = vpop.f32.mrb[50].mxu0  ;;  %v6843_v16 = vpop.f32.mrb[18].mxu1 }
 0x2f8   :  { %v8009_v4 = vpop.f32.mrb[51].mxu0  ;;  %v8011_v30 = vpack.c.bf16 %v6843_v16, %v6842_v27  ;;  %v839_v17 = vpop.f32.mrb[19].mxu1  ;;  %v7577_v27 = vld [vmem:[%s9597_s1 + $0xa0] sm:$0xff]   ;;  %v7579_v16 = vld [vmem:[%s9597_s1 + $0xb0] sm:$0xff]  }
 0x2f9   :  { %v8013_v6 = vpack.c.bf16 %v839_v17, %v836_v15  ;;  %v7578_v15 = vld [vmem:[%s9597_s1 + $0xa8] sm:$0xff]   ;;  %v7580_v17 = vld [vmem:[%s9597_s1 + $0xb8] sm:$0xff]  }
 0x2fa   :  { %9655 = vst [vmem:[#allocation8_spill] sm:$0xff] %v8011_v30  ;;  %6861 = vmatmul.mubr.msk.bf16.gmra.mrb[36].mxu1 %vm364_vm3, %v7576_v7 }
 0x2fb   :  { %9656 = vst [vmem:[#allocation9_spill] sm:$0xff] %v8013_v6  ;;  %6864 = vmatprep.mubr.msk.bf16.mxu1 %vm364_vm3, %v7577_v27 }
 0x2fc   :  { %6909 = vmatmul.mubr.msk.bf16.gmra.mrb[64].mxu0 %vm1071_vm4, %v7979_v38 }
 0x2fd   :  { %v8017_v18 = vpop.f32.mrb[52].mxu0  ;;  %6912 = vmatprep.mubr.msk.bf16.mxu0 %vm1071_vm4, %v7995_v24  ;;  %v6846_v21 = vpop.f32.mrb[20].mxu1 }
 0x2fe   :  { %v8021_v28 = vpop.f32.mrb[53].mxu0  ;;  %v852_v34 = vpop.f32.mrb[21].mxu1 }
 0x2ff   :  { %v8023_v8 = vpop.f32.mrb[54].mxu0  ;;  %v6847_v22 = vpop.f32.mrb[22].mxu1 }
 0x300   :  { %v8025_v37 = vpop.f32.mrb[55].mxu0  ;;  %v8027_v10 = vpack.c.bf16 %v6847_v22, %v6846_v21  ;;  %v855_v40 = vpop.f32.mrb[23].mxu1  ;;  %v7581_v21 = vld [vmem:[%s9597_s1 + $0xc0] sm:$0xff]   ;;  %v7583_v22 = vld [vmem:[%s9597_s1 + $0xd0] sm:$0xff]  }
 0x301   :  { %v8029_v12 = vpack.c.bf16 %v855_v40, %v852_v34  ;;  %v7582_v34 = vld [vmem:[%s9597_s1 + $0xc8] sm:$0xff]   ;;  %v7584_v40 = vld [vmem:[%s9597_s1 + $0xd8] sm:$0xff]  }
 0x302   :  { %9657 = vst [vmem:[#allocation10_spill] sm:$0xff] %v8027_v10  ;;  %6865 = vmatmul.mubr.msk.bf16.gmra.mrb[40].mxu1 %vm364_vm3, %v7578_v15 }
 0x303   :  { %9658 = vst [vmem:[#allocation11_spill] sm:$0xff] %v8029_v12  ;;  %6868 = vmatprep.mubr.msk.bf16.mxu1 %vm364_vm3, %v7579_v16 }
 0x304   :  { %6913 = vmatmul.mubr.msk.bf16.gmra.mrb[68].mxu0 %vm1071_vm4, %v7991_v5 }
 0x305   :  { %6916 = vmatprep.mubr.msk.bf16.mxu0 %vm1071_vm4, %v8013_v6  ;;  %v6850_v14 = vpop.f32.mrb[24].mxu1 }
 0x306   :  { %v868_v25 = vpop.f32.mrb[25].mxu1 }
 0x307   :  { %v6851_v26 = vpop.f32.mrb[26].mxu1 }
 0x308   :  { %v8035_v31 = vpack.c.bf16 %v6851_v26, %v6850_v14  ;;  %v871_v32 = vpop.f32.mrb[27].mxu1  ;;  %v7585_v14 = vld [vmem:[%s9597_s1 + $0xe0] sm:$0xff]   ;;  %v7587_v26 = vld [vmem:[%s9597_s1 + $0xf0] sm:$0xff]  }
 0x309   :  { %v8037_v33 = vpack.c.bf16 %v871_v32, %v868_v25  ;;  %v7586_v25 = vld [vmem:[%s9597_s1 + $0xe8] sm:$0xff]   ;;  %v7588_v32 = vld [vmem:[%s9597_s1 + $0xf8] sm:$0xff]  }
 0x30a   :  { %9659 = vst [vmem:[#allocation12_spill] sm:$0xff] %v8035_v31  ;;  %6869 = vmatmul.mubr.msk.bf16.gmra.mrb[44].mxu1 %vm364_vm3, %v7580_v17 }
 0x30b   :  { %9660 = vst [vmem:[#allocation13_spill] sm:$0xff] %v8037_v33  ;;  %6872 = vmatprep.mubr.msk.bf16.mxu1 %vm364_vm3, %v7581_v21 }
 0x30c   :  { %6917 = vmatmul.mubr.msk.bf16.gmra.mrb[72].mxu0 %vm1071_vm4, %v8011_v30 }
 0x30d   :  { %6920 = vmatprep.mubr.msk.bf16.mxu0 %vm1071_vm4, %v8029_v12  ;;  %v6854_v36 = vpop.f32.mrb[28].mxu1 }
 0x30e   :  { %v884_v55 = vpop.f32.mrb[29].mxu1 }
 0x30f   :  { %v6855_v58 = vpop.f32.mrb[30].mxu1 }
 0x310   :  { %v8043_v59 = vpack.c.bf16 %v6855_v58, %v6854_v36  ;;  %v887_v60 = vpop.f32.mrb[31].mxu1 }
 0x311   :  { %v8045_v61 = vpack.c.bf16 %v887_v60, %v884_v55 }
 0x312   :  { %9661 = vst [vmem:[#allocation14_spill] sm:$0xff] %v8043_v59  ;;  %6873 = vmatmul.mubr.msk.bf16.gmra.mrb[48].mxu1 %vm364_vm3, %v7582_v34 }
 0x313   :  { %9662 = vst [vmem:[#allocation15_spill] sm:$0xff] %v8045_v61  ;;  %6876 = vmatprep.mubr.msk.bf16.mxu1 %vm364_vm3, %v7583_v22 }
 0x314   :  { %6921 = vmatmul.mubr.msk.bf16.gmra.mrb[76].mxu0 %vm1071_vm4, %v8027_v10 }
 0x315   :  { %6924 = vmatprep.mubr.msk.bf16.mxu0 %vm1071_vm4, %v8037_v33 }
 0x31a   :  { %6877 = vmatmul.mubr.msk.bf16.gmra.mrb[52].mxu1 %vm364_vm3, %v7584_v40 }
 0x31b   :  { %6880 = vmatprep.mubr.msk.bf16.mxu1 %vm364_vm3, %v7585_v14 }
 0x31c   :  { %6925 = vmatmul.mubr.msk.bf16.gmra.mrb[80].mxu0 %vm1071_vm4, %v8035_v31 }
 0x31d   :  { %6928 = vmatprep.mubr.msk.bf16.mxu0 %vm1071_vm4, %v8045_v61 }
 0x322   :  { %6881 = vmatmul.mubr.msk.bf16.gmra.mrb[56].mxu1 %vm364_vm3, %v7586_v25 }
 0x323   :  { %6884 = vmatprep.mubr.msk.bf16.mxu1 %vm364_vm3, %v7587_v26 }
 0x324   :  { %6929 = vmatmul.mubr.msk.bf16.gmra.mrb[84].mxu0 %vm1071_vm4, %v8043_v59 }
 0x32a   :  { %6885 = vmatmul.mubr.msk.bf16.gmra.mrb[60].mxu1 %vm364_vm3, %v7588_v32 }
 0x32b   :  { %6940 = vmatprep.mubr.msk.bf16.mxu1 %vm364_vm3, %v7765_v19 }
 0x3bf   :  { %v6902_v36 = vpop.f32.mrb[56].mxu0 }
 0x3c0   :  { %v1251_v55 = vpop.f32.mrb[57].mxu0 }
 0x3c1   :  { %v6903_v58 = vpop.f32.mrb[58].mxu0 }
 0x3c2   :  { %v1254_v60 = vpop.f32.mrb[59].mxu0 }
 0x3c7   :  { %v6906_v63 = vpop.f32.mrb[60].mxu0 }
 0x3c8   :  { %v8126_v3 = vpop.f32.mrb[61].mxu0 }
 0x3c9   :  { %v8128_v7 = vpop.f32.mrb[62].mxu0 }
 0x3ca   :  { %v8130_v27 = vpop.f32.mrb[63].mxu0 }
 0x3cf   :  { %v6910_v15 = vpop.f32.mrb[64].mxu0 }
 0x3d0   :  { %v1380_v16 = vmax.f32 %v6902_v36, %v6910_v15  ;;  %v1283_v19 = vpop.f32.mrb[65].mxu0 }
 0x3d1   :  { %v1378_v17 = vmax.f32 %v1251_v55, %v1283_v19  ;;  %v6911_v21 = vpop.f32.mrb[66].mxu0 }
 0x3d2   :  { %v1381_v34 = vmax.f32 %v6903_v58, %v6911_v21  ;;  %v1286_v22 = vpop.f32.mrb[67].mxu0 }
 0x3d3   :  { %v1379_v40 = vmax.f32 %v1254_v60, %v1286_v22  ;;  %v7590_v60 = vld [vmem:[%s9601_s4 + $0x8] sm:$0xff]  }
 0x3d4   :  { %6974 = vmatprep.subr.bf16.mxu0 %v7590_v60 }
 0x3d5   :  { %6975 = vmatpush3.bf16.msra.mxu0 %v7590_v60 }
 0x3d7   :  { %v6914_v14 = vpop.f32.mrb[68].mxu0 }
 0x3d8   :  { %v1384_v25 = vmax.f32 %v6906_v63, %v6914_v14  ;;  %v1299_v26 = vpop.f32.mrb[69].mxu0  ;;  %v5982_v63 = vld [vmem:[%s9599_s8 + $0x1] ss:$0 sm:$0xff] }
 0x3d9   :  { %v1382_v32 = vmax.f32 %v8126_v3, %v1299_v26  ;;  %v6915_v62 = vpop.f32.mrb[70].mxu0  ;;  %v1157_v14 = vadd.f32 %v8001_v0, %v5982_v63  ;;  %v1155_v30 = vadd.f32 %v5982_v63, %v8005_v2  ;;  %v1158_v24 = vadd.f32 %v8007_v29, %v5982_v63 }
 0x3da   :  { %v1385_v59 = vmax.f32 %v8128_v7, %v6915_v62  ;;  %v1302_v61 = vpop.f32.mrb[71].mxu0  ;;  %v1156_v1 = vadd.f32 %v5982_v63, %v8009_v4  ;;  %v1161_v2 = vadd.f32 %v8017_v18, %v5982_v63 }
 0x3db   :  { %v1383_v31 = vmax.f32 %v8130_v27, %v1302_v61 }
 0x3df   :  { %v6918_v33 = vpop.f32.mrb[72].mxu0 }
 0x3e0   :  { %v1315_v10 = vpop.f32.mrb[73].mxu0 }
 0x3e1   :  { %v6919_v36 = vpop.f32.mrb[74].mxu0 }
 0x3e2   :  { %v1318_v15 = vpop.f32.mrb[75].mxu0 }
 0x3e7   :  { %v6922_v55 = vpop.f32.mrb[76].mxu0 }
 0x3e8   :  { %v1331_v19 = vpop.f32.mrb[77].mxu0 }
 0x3e9   :  { %v6923_v58 = vpop.f32.mrb[78].mxu0 }
 0x3ea   :  { %v1334_v21 = vpop.f32.mrb[79].mxu0 }
 0x3ef   :  { %v6926_v3 = vpop.f32.mrb[80].mxu0 }
 0x3f0   :  { %v1388_v7 = vmax.f32 %v6918_v33, %v6926_v3  ;;  %v1347_v61 = vpop.f32.mrb[81].mxu0 }
 0x3f1   :  { %v1386_v27 = vmax.f32 %v1315_v10, %v1347_v61  ;;  %v6927_v22 = vpop.f32.mrb[82].mxu0 }
 0x3f2   :  { %v1396_v26 = vmax.f32 %v1380_v16, %v1388_v7  ;;  %v1389_v62 = vmax.f32 %v6919_v36, %v6927_v22  ;;  %v1350_v12 = vpop.f32.mrb[83].mxu0 }
 0x3f3   :  { %v1394_v6 = vmax.f32 %v1378_v17, %v1386_v27  ;;  %v1387_v5 = vmax.f32 %v1318_v15, %v1350_v12 }
 0x3f4   :  { %v1404_v38 = vadd.f32 %v1396_v26, %v1157_v14  ;;  %v1397_v57 = vmax.f32 %v1381_v34, %v1389_v62  ;;  %v1159_v34 = vadd.f32 %v5982_v63, %v8021_v28 }
 0x3f5   :  { %v1402_v33 = vadd.f32 %v1394_v6, %v1155_v30  ;;  %v1395_v3 = vmax.f32 %v1379_v40, %v1387_v5  ;;  %v1160_v5 = vadd.f32 %v5982_v63, %v8025_v37 }
 0x3f6   :  { %v1405_v60 = vadd.f32 %v1397_v57, %v1158_v24  ;;  %v1162_v57 = vadd.f32 %v8023_v8, %v5982_v63  ;;  %v6858_v8 = vpop.f32.mrb[32].mxu1 }
 0x3f7   :  { %v1403_v10 = vadd.f32 %v1395_v3, %v1156_v1  ;;  %v6930_v61 = vpop.f32.mrb[84].mxu0  ;;  %v900_v37 = vpop.f32.mrb[33].mxu1 }
 0x3f8   :  { %v1392_v9 = vmax.f32 %v6922_v55, %v6930_v61  ;;  %v1363_v0 = vpop.f32.mrb[85].mxu0  ;;  %v1411_v16 = vpack.c.bf16 %v1405_v60, %v1404_v38 }
 0x3f9   :  { %v1390_v36 = vmax.f32 %v1331_v19, %v1363_v0  ;;  %v6931_v7 = vpop.f32.mrb[86].mxu0  ;;  %v1410_v22 = vpack.c.bf16 %v1403_v10, %v1402_v33 }
 0x3fa   :  { %v1400_v12 = vmax.f32 %v1384_v25, %v1392_v9  ;;  %v1393_v17 = vmax.f32 %v6923_v58, %v6931_v7  ;;  %v1366_v29 = vpop.f32.mrb[87].mxu0 }
 0x3fb   :  { %v1398_v15 = vmax.f32 %v1382_v32, %v1390_v36  ;;  %v1391_v4 = vmax.f32 %v1334_v21, %v1366_v29  ;;  %1418 = vrot.lane.b32.xlu0 %v1410_v22, %s7672_s13  ;;  %6932 = vmatprep.subr.bf16.mxu1 %v1410_v22 }
 0x3fc   :  { %v1408_v1 = vadd.f32 %v1400_v12, %v1161_v2  ;;  %v1401_v38 = vmax.f32 %v1385_v59, %v1393_v17  ;;  %6933 = vmatpush3.bf16.msra.mxu1 %v1410_v22 }
 0x3fd   :  { %v1406_v24 = vadd.f32 %v1398_v15, %v1159_v34  ;;  %v1399_v30 = vmax.f32 %v1383_v31, %v1391_v4  ;;  %6934 = vmatprep.subr.bf16.mxu1 %v1411_v16  ;;  %v6859_v31 = vpop.f32.mrb[34].mxu1 }
 0x3fe   :  { %v1409_v9 = vadd.f32 %v1401_v38, %v1162_v57  ;;  %v8165_v59 = vpack.c.bf16 %v6859_v31, %v6858_v8 }
 0x3ff   :  { %v1407_v6 = vadd.f32 %v1399_v30, %v1160_v5  ;;  %1420 = vrot.lane.b32.xlu0 %v1411_v16, %s7672_s13 }
 0x400   :  { %6935 = vmatpush3.bf16.msra.mxu1 %v1411_v16  ;;  %v1413_v18 = vpack.c.bf16 %v1409_v9, %v1408_v1 }
 0x401   :  { %v1412_v28 = vpack.c.bf16 %v1407_v6, %v1406_v24 }
 0x403   :  { %1422 = vrot.lane.b32.xlu1 %v1412_v28, %s7672_s13  ;;  %6936 = vmatprep.subr.bf16.mxu1 %v1412_v28 }
 0x404   :  { %6937 = vmatpush3.bf16.msra.mxu1 %v1412_v28  ;;  %v7592_v28 = vld [vmem:[%s9602_s6 + $0x8] sm:$0xff]  }
 0x405   :  { %6938 = vmatprep.subr.bf16.mxu1 %v1413_v18 }
 0x407   :  { %1424 = vrot.lane.b32.xlu1 %v1413_v18, %s7672_s13 }
 0x408   :  { %6939 = vmatpush3.bf16.msra.mxu1 %v1413_v18  ;;  %v7591_v18 = vld [vmem:[%s9602_s6] sm:$0xff]  }
 0x409   :  { %6984 = vmatprep.subr.bf16.mxu0 %v7591_v18 }
 0x40b   :  { %6941 = vmatmul.mubr.msk.bf16.vlgmr.msra.gmra.mrb[64].mxu1 %vm364_vm3, %v7795_v41  ;;  %v903_v41 = vpop.f32.mrb[35].mxu1 }
 0x40c   :  { %6944 = vmatprep.mubr.msk.bf16.mxu1 %vm364_vm3, %v7800_v42  ;;  %v8167_v40 = vpack.c.bf16 %v903_v41, %v900_v37  ;;  %v6862_v42 = vpop.f32.mrb[36].mxu1 }
 0x413   :  { %6945 = vmatmul.mubr.msk.bf16.gmra.mrb[68].mxu1 %vm364_vm3, %v7809_v43 }
 0x414   :  { %6948 = vmatprep.mubr.msk.bf16.mxu1 %vm364_vm3, %v7772_v20  ;;  %v916_v20 = vpop.f32.mrb[37].mxu1 }
 0x415   :  { %v6863_v43 = vpop.f32.mrb[38].mxu1 }
 0x416   :  { %v919_v25 = vpop.f32.mrb[39].mxu1 }
 0x417   :  { %v6866_v32 = vpop.f32.mrb[40].mxu1 }
 0x418   :  { %v932_v55 = vpop.f32.mrb[41].mxu1 }
 0x41b   :  { %6949 = vmatmul.mubr.msk.bf16.gmra.mrb[72].mxu1 %vm364_vm3, %v7818_v44  ;;  %v8173_v44 = vpack.c.bf16 %v6863_v43, %v6862_v42 }
 0x41c   :  { %6952 = vmatprep.mubr.msk.bf16.mxu1 %vm364_vm3, %v7823_v45  ;;  %v8175_v45 = vpack.c.bf16 %v919_v25, %v916_v20 }
 0x423   :  { %6953 = vmatmul.mubr.msk.bf16.gmra.mrb[76].mxu1 %vm364_vm3, %v7832_v46  ;;  %v6867_v46 = vpop.f32.mrb[42].mxu1 }
 0x424   :  { %6956 = vmatprep.mubr.msk.bf16.mxu1 %vm364_vm3, %v7837_v47  ;;  %v8181_v19 = vpack.c.bf16 %v6867_v46, %v6866_v32  ;;  %v935_v58 = vpop.f32.mrb[43].mxu1 }
 0x425   :  { %v8183_v47 = vpack.c.bf16 %v935_v58, %v932_v55  ;;  %v6870_v21 = vpop.f32.mrb[44].mxu1 }
 0x426   :  { %v948_v63 = vpop.f32.mrb[45].mxu1 }
 0x42b   :  { %6957 = vmatmul.mubr.msk.bf16.gmra.mrb[80].mxu1 %vm364_vm3, %v7846_v48  ;;  %v6871_v48 = vpop.f32.mrb[46].mxu1 }
 0x42c   :  { %6960 = vmatprep.mubr.msk.bf16.mxu1 %vm364_vm3, %v7851_v49  ;;  %v8189_v27 = vpack.c.bf16 %v6871_v48, %v6870_v21  ;;  %v951_v14 = vpop.f32.mrb[47].mxu1 }
 0x42d   :  { %v8191_v49 = vpack.c.bf16 %v951_v14, %v948_v63  ;;  %v6874_v26 = vpop.f32.mrb[48].mxu1 }
 0x42e   :  { %v964_v62 = vpop.f32.mrb[49].mxu1 }
 0x433   :  { %6961 = vmatmul.mubr.msk.bf16.gmra.mrb[84].mxu1 %vm364_vm3, %v7860_v50  ;;  %v6875_v50 = vpop.f32.mrb[50].mxu1 }
 0x434   :  { %6964 = vmatprep.mubr.msk.bf16.mxu1 %vm364_vm3, %v7865_v51  ;;  %v8197_v33 = vpack.c.bf16 %v6875_v50, %v6874_v26  ;;  %v967_v3 = vpop.f32.mrb[51].mxu1 }
 0x435   :  { %v8199_v51 = vpack.c.bf16 %v967_v3, %v964_v62  ;;  %v6878_v60 = vpop.f32.mrb[52].mxu1 }
 0x436   :  { %v980_v10 = vpop.f32.mrb[53].mxu1 }
 0x437   :  { %v6879_v61 = vpop.f32.mrb[54].mxu1 }
 0x438   :  { %v8203_v0 = vpack.c.bf16 %v6879_v61, %v6878_v60 }
 0x43b   :  { %6965 = vmatmul.mubr.msk.bf16.gmra.mrb[88].mxu1 %vm364_vm3, %v7874_v52  ;;  %v983_v52 = vpop.f32.mrb[55].mxu1 }
 0x43c   :  { %6968 = vmatprep.mubr.msk.bf16.mxu1 %vm364_vm3, %v7879_v53  ;;  %v8205_v16 = vpack.c.bf16 %v983_v52, %v980_v10  ;;  %v6882_v36 = vpop.f32.mrb[56].mxu1 }
 0x43d   :  { %v996_v53 = vpop.f32.mrb[57].mxu1 }
 0x43e   :  { %v6883_v7 = vpop.f32.mrb[58].mxu1 }
 0x43f   :  { %v8207_v22 = vpack.c.bf16 %v6883_v7, %v6882_v36  ;;  %v999_v2 = vpop.f32.mrb[59].mxu1 }
 0x440   :  { %v8209_v12 = vpack.c.bf16 %v999_v2, %v996_v53  ;;  %v6886_v17 = vpop.f32.mrb[60].mxu1 }
 0x441   :  { %9663 = vst [vmem:[#allocation16_spill] sm:$0xff] %v8207_v22  ;;  %v1012_v29 = vpop.f32.mrb[61].mxu1 }
 0x442   :  { %v6887_v34 = vpop.f32.mrb[62].mxu1 }
 0x443   :  { %6969 = vmatmul.mubr.msk.bf16.gmra.mrb[92].mxu1 %vm364_vm3, %v7888_v54  ;;  %v8211_v54 = vpack.c.bf16 %v6887_v34, %v6886_v17  ;;  %v1015_v15 = vpop.f32.mrb[63].mxu1 }
 0x444   :  { %v8213_v4 = vpack.c.bf16 %v1015_v15, %v1012_v29 }
 0x445   :  { %9664 = vst [vmem:[#allocation17_spill] sm:$0xff] %v8211_v54 }
 0x446   :  { %9665 = vst [vmem:[#allocation18_spill] sm:$0xff] %v8213_v4 }
 0x46d   :  { %v1419_v57 = vpop.permute.xlu0 %1418 }
 0x46e   :  { %v8217_v1 = vsel %vm1071_vm4, %v7909_v13, %v1419_v57 }
 0x46f   :  { %6976 = vmatprep.mubr.msk.bf16.mxu0 %vm1713_vm5, %v8217_v1 }
 0x471   :  { %v1421_v38 = vpop.permute.xlu0 %1420 }
 0x472   :  { %v8223_v5 = vsel %vm1071_vm4, %v7907_v11, %v1421_v38 }
 0x473   :  { %6977 = vmatmul.mubr.msk.bf16.vlgmr.msra.gmra.mrb[88].mxu0 %vm1713_vm5, %v8223_v5 }
 0x474   :  { %6985 = vmatpush3.bf16.msra.mxu0 %v7591_v18 }
 0x475   :  { %v1423_v24 = vpop.permute.xlu1 %1422  ;;  %6986 = vmatprep.subr.bf16.mxu0 %v7592_v28 }
 0x476   :  { %v8229_v30 = vsel %vm1071_vm4, %v7925_v39, %v1423_v24 }
 0x477   :  { %6980 = vmatprep.mubr.msk.bf16.mxu0 %vm1713_vm5, %v8229_v30 }
 0x478   :  { %6987 = vmatpush3.bf16.msra.mxu0 %v7592_v28 }
 0x479   :  { %v1425_v9 = vpop.permute.xlu1 %1424 }
 0x47a   :  { %v8235_v6 = vsel %vm1071_vm4, %v7921_v23, %v1425_v9 }
 0x47b   :  { %6981 = vmatmul.mubr.msk.bf16.gmra.mrb[92].mxu0 %vm1713_vm5, %v8235_v6 }
 0x4de   :  { %v6942_v8 = vpop.f32.mrb[64].mxu1 }
 0x4df   :  { %v1468_v37 = vpop.f32.mrb[65].mxu1 }
 0x4e0   :  { %v6943_v31 = vpop.f32.mrb[66].mxu1 }
 0x4e1   :  { %v1596_v41 = vpack.c.bf16 %v6943_v31, %v6942_v8  ;;  %v1471_v42 = vpop.f32.mrb[67].mxu1 }
 0x4e2   :  { %v1595_v20 = vpack.c.bf16 %v1471_v42, %v1468_v37  ;;  %v7593_v42 = vld [vmem:[%s9600_s5 + $0x8] sm:$0xff]  }
 0x4e3   :  { %1629 = vrot.lane.b32.xlu1 %v1596_v41, %s7672_s13  ;;  %7044 = vmatprep.subr.bf16.mxu0 %v7593_v42 }
 0x4e4   :  { %1627 = vrot.lane.b32.xlu0 %v1595_v20, %s7672_s13 }
 0x4e6   :  { %v6946_v43 = vpop.f32.mrb[68].mxu1 }
 0x4e7   :  { %v1484_v25 = vpop.f32.mrb[69].mxu1 }
 0x4e8   :  { %v6947_v32 = vpop.f32.mrb[70].mxu1 }
 0x4e9   :  { %v1598_v55 = vpack.c.bf16 %v6947_v32, %v6946_v43  ;;  %v1487_v46 = vpop.f32.mrb[71].mxu1 }
 0x4ea   :  { %v1597_v58 = vpack.c.bf16 %v1487_v46, %v1484_v25 }
 0x4eb   :  { %1633 = vrot.lane.b32.xlu1 %v1598_v55, %s7672_s13 }
 0x4ec   :  { %1631 = vrot.lane.b32.xlu0 %v1597_v58, %s7672_s13 }
 0x4ee   :  { %v6950_v21 = vpop.f32.mrb[72].mxu1 }
 0x4ef   :  { %v1500_v63 = vpop.f32.mrb[73].mxu1 }
 0x4f0   :  { %v6951_v48 = vpop.f32.mrb[74].mxu1 }
 0x4f1   :  { %v1600_v14 = vpack.c.bf16 %v6951_v48, %v6950_v21  ;;  %v1503_v26 = vpop.f32.mrb[75].mxu1 }
 0x4f2   :  { %v1599_v62 = vpack.c.bf16 %v1503_v26, %v1500_v63 }
 0x4f3   :  { %1637 = vrot.lane.b32.xlu1 %v1600_v14, %s7672_s13 }
 0x4f4   :  { %1635 = vrot.lane.b32.xlu0 %v1599_v62, %s7672_s13 }
 0x4f6   :  { %v6954_v50 = vpop.f32.mrb[76].mxu1 }
 0x4f7   :  { %v1516_v3 = vpop.f32.mrb[77].mxu1 }
 0x4f8   :  { %v6955_v60 = vpop.f32.mrb[78].mxu1 }
 0x4f9   :  { %v1602_v10 = vpack.c.bf16 %v6955_v60, %v6954_v50  ;;  %v1519_v61 = vpop.f32.mrb[79].mxu1 }
 0x4fa   :  { %v1601_v52 = vpack.c.bf16 %v1519_v61, %v1516_v3 }
 0x4fb   :  { %1641 = vrot.lane.b32.xlu1 %v1602_v10, %s7672_s13 }
 0x4fc   :  { %1639 = vrot.lane.b32.xlu0 %v1601_v52, %s7672_s13 }
 0x4fe   :  { %v6958_v36 = vpop.f32.mrb[80].mxu1 }
 0x4ff   :  { %v1532_v53 = vpop.f32.mrb[81].mxu1 }
 0x500   :  { %v6959_v7 = vpop.f32.mrb[82].mxu1 }
 0x501   :  { %v1604_v2 = vpack.c.bf16 %v6959_v7, %v6958_v36  ;;  %v1535_v17 = vpop.f32.mrb[83].mxu1 }
 0x502   :  { %v1603_v29 = vpack.c.bf16 %v1535_v17, %v1532_v53  ;;  %v9666_v53 = vld [vmem:[#allocation6_spill] sm:$0xff] }
 0x503   :  { %1645 = vrot.lane.b32.xlu1 %v1604_v2, %s7672_s13  ;;  %v9667_v2 = vld [vmem:[#allocation4_spill] sm:$0xff] }
 0x504   :  { %1643 = vrot.lane.b32.xlu0 %v1603_v29, %s7672_s13 }
 0x506   :  { %v6962_v34 = vpop.f32.mrb[84].mxu1 }
 0x507   :  { %v1548_v15 = vpop.f32.mrb[85].mxu1 }
 0x508   :  { %v6963_v57 = vpop.f32.mrb[86].mxu1 }
 0x509   :  { %v1606_v38 = vpack.c.bf16 %v6963_v57, %v6962_v34  ;;  %v1551_v24 = vpop.f32.mrb[87].mxu1 }
 0x50a   :  { %v1605_v9 = vpack.c.bf16 %v1551_v24, %v1548_v15  ;;  %v9669_v15 = vld [vmem:[#allocation2_spill] sm:$0xff] }
 0x50b   :  { %1649 = vrot.lane.b32.xlu1 %v1606_v38, %s7672_s13 }
 0x50c   :  { %1647 = vrot.lane.b32.xlu0 %v1605_v9, %s7672_s13  ;;  %v9670_v9 = vld [vmem:[#allocation7_spill] sm:$0xff] }
 0x50e   :  { %v6966_v18 = vpop.f32.mrb[88].mxu1 }
 0x50f   :  { %v1564_v28 = vpop.f32.mrb[89].mxu1 }
 0x510   :  { %v6967_v8 = vpop.f32.mrb[90].mxu1 }
 0x511   :  { %v1608_v37 = vpack.c.bf16 %v6967_v8, %v6966_v18  ;;  %v1567_v31 = vpop.f32.mrb[91].mxu1 }
 0x512   :  { %v1607_v41 = vpack.c.bf16 %v1567_v31, %v1564_v28  ;;  %v9671_v28 = vld [vmem:[#allocation5_spill] sm:$0xff] }
 0x513   :  { %1653 = vrot.lane.b32.xlu1 %v1608_v37, %s7672_s13 }
 0x514   :  { %1651 = vrot.lane.b32.xlu0 %v1607_v41, %s7672_s13  ;;  %v9672_v41 = vld [vmem:[#allocation9_spill] sm:$0xff] }
 0x516   :  { %v6970_v20 = vpop.f32.mrb[92].mxu1 }
 0x517   :  { %v1580_v43 = vpop.f32.mrb[93].mxu1 }
 0x518   :  { %v6971_v25 = vpop.f32.mrb[94].mxu1 }
 0x519   :  { %v1610_v32 = vpack.c.bf16 %v6971_v25, %v6970_v20  ;;  %v1583_v55 = vpop.f32.mrb[95].mxu1  ;;  %v9673_v20 = vld [vmem:[#allocation8_spill] sm:$0xff] }
 0x51a   :  { %v1609_v46 = vpack.c.bf16 %v1583_v55, %v1580_v43  ;;  %v9674_v55 = vld [vmem:[#allocation11_spill] sm:$0xff] }
 0x51b   :  { %1657 = vrot.lane.b32.xlu1 %v1610_v32, %s7672_s13 }
 0x51c   :  { %1655 = vrot.lane.b32.xlu0 %v1609_v46, %s7672_s13 }
 0x546   :  { %v8264_v58 = vpop.f32.mrb[88].mxu0 }
 0x547   :  { %v8266_v21 = vpop.f32.mrb[89].mxu0 }
 0x548   :  { %v8268_v63 = vpop.f32.mrb[90].mxu0 }
 0x549   :  { %v8270_v48 = vpop.f32.mrb[91].mxu0 }
 0x54e   :  { %v8272_v14 = vpop.f32.mrb[92].mxu0 }
 0x54f   :  { %v8274_v26 = vpop.f32.mrb[93].mxu0 }
 0x550   :  { %v8276_v62 = vpop.f32.mrb[94].mxu0 }
 0x551   :  { %v8278_v50 = vpop.f32.mrb[95].mxu0 }
 0x555   :  { %v1630_v3 = vpop.permute.xlu1 %1629 }
 0x556   :  { %v1628_v60 = vpop.permute.xlu0 %1627  ;;  %v1662_v61 = vsel %vm1071_vm4, %v7977_v35, %v1630_v3  ;;  %v9668_v35 = vld [vmem:[#allocation3_spill] sm:$0xff]  ;;  %v9675_v3 = vld [vmem:[#allocation10_spill] sm:$0xff] }
 0x557   :  { %v1660_v10 = vsel %vm1071_vm4, %v7981_v56, %v1628_v60 }
 0x558   :  { %6988 = vmatprep.mubr.msk.bf16.mxu0 %vm1713_vm5, %v1660_v10 }
 0x559   :  { %6989 = vmatmul.mubr.msk.bf16.vlgmr.msra.gmra.mrb[96].mxu0 %vm1713_vm5, %v1662_v61 }
 0x55a   :  { %7045 = vmatpush3.bf16.msra.mxu0 %v7593_v42 }
 0x55d   :  { %v1634_v52 = vpop.permute.xlu1 %1633 }
 0x55e   :  { %v1632_v36 = vpop.permute.xlu0 %1631  ;;  %v1666_v17 = vsel %vm1071_vm4, %v9667_v2, %v1634_v52  ;;  %v9676_v52 = vld [vmem:[#allocation13_spill] sm:$0xff] }
 0x55f   :  { %v1664_v7 = vsel %vm1071_vm4, %v9666_v53, %v1632_v36  ;;  %v9677_v53 = vld [vmem:[#allocation12_spill] sm:$0xff] }
 0x560   :  { %6992 = vmatprep.mubr.msk.bf16.mxu0 %vm1713_vm5, %v1664_v7 }
 0x561   :  { %6993 = vmatmul.mubr.msk.bf16.gmra.mrb[100].mxu0 %vm1713_vm5, %v1666_v17 }
 0x565   :  { %v1638_v56 = vpop.permute.xlu1 %1637 }
 0x566   :  { %v1636_v29 = vpop.permute.xlu0 %1635  ;;  %v1670_v57 = vsel %vm1071_vm4, %v9669_v15, %v1638_v56  ;;  %v9678_v56 = vld [vmem:[#allocation15_spill] sm:$0xff]  ;;  %v7594_v15 = vld [vmem:[%s9603_s7] sm:$0xff]  }
 0x567   :  { %v1668_v34 = vsel %vm1071_vm4, %v9668_v35, %v1636_v29  ;;  %v9679_v35 = vld [vmem:[#allocation14_spill] sm:$0xff]  ;;  %7020 = vmatprep.subr.bf16.mxu1 %v7594_v15 }
 0x568   :  { %6996 = vmatprep.mubr.msk.bf16.mxu0 %vm1713_vm5, %v1668_v34  ;;  %7021 = vmatpush3.bf16.msra.mxu1 %v7594_v15 }
 0x569   :  { %6997 = vmatmul.mubr.msk.bf16.gmra.mrb[104].mxu0 %vm1713_vm5, %v1670_v57 }
 0x56d   :  { %v1642_v38 = vpop.permute.xlu1 %1641 }
 0x56e   :  { %v1640_v24 = vpop.permute.xlu0 %1639  ;;  %v1674_v8 = vsel %vm1071_vm4, %v9671_v28, %v1642_v38  ;;  %v7595_v38 = vld [vmem:[%s9603_s7 + $0x8] sm:$0xff]   ;;  %v7596_v28 = vld [vmem:[%s9603_s7 + $0x10] sm:$0xff]  }
 0x56f   :  { %v1672_v18 = vsel %vm1071_vm4, %v9670_v9, %v1640_v24  ;;  %7022 = vmatprep.subr.bf16.mxu1 %v7595_v38 }
 0x570   :  { %7000 = vmatprep.mubr.msk.bf16.mxu0 %vm1713_vm5, %v1672_v18  ;;  %7023 = vmatpush3.bf16.msra.mxu1 %v7595_v38 }
 0x571   :  { %7001 = vmatmul.mubr.msk.bf16.gmra.mrb[108].mxu0 %vm1713_vm5, %v1674_v8  ;;  %7024 = vmatprep.subr.bf16.mxu1 %v7596_v28 }
 0x574   :  { %7025 = vmatpush3.bf16.msra.mxu1 %v7596_v28 }
 0x575   :  { %v1646_v37 = vpop.permute.xlu1 %1645 }
 0x576   :  { %v1644_v31 = vpop.permute.xlu0 %1643  ;;  %v1678_v43 = vsel %vm1071_vm4, %v9673_v20, %v1646_v37 }
 0x577   :  { %v1676_v42 = vsel %vm1071_vm4, %v9672_v41, %v1644_v31 }
 0x578   :  { %7004 = vmatprep.mubr.msk.bf16.mxu0 %vm1713_vm5, %v1676_v42 }
 0x579   :  { %7005 = vmatmul.mubr.msk.bf16.gmra.mrb[112].mxu0 %vm1713_vm5, %v1678_v43 }
 0x57d   :  { %v1650_v25 = vpop.permute.xlu1 %1649 }
 0x57e   :  { %v1648_v32 = vpop.permute.xlu0 %1647  ;;  %v1682_v60 = vsel %vm1071_vm4, %v9675_v3, %v1650_v25 }
 0x57f   :  { %v1680_v46 = vsel %vm1071_vm4, %v9674_v55, %v1648_v32 }
 0x580   :  { %7008 = vmatprep.mubr.msk.bf16.mxu0 %vm1713_vm5, %v1680_v46 }
 0x581   :  { %7009 = vmatmul.mubr.msk.bf16.gmra.mrb[116].mxu0 %vm1713_vm5, %v1682_v60 }
 0x585   :  { %v1654_v10 = vpop.permute.xlu1 %1653 }
 0x586   :  { %v1652_v61 = vpop.permute.xlu0 %1651  ;;  %v1686_v7 = vsel %vm1071_vm4, %v9677_v53, %v1654_v10 }
 0x587   :  { %v1684_v36 = vsel %vm1071_vm4, %v9676_v52, %v1652_v61 }
 0x588   :  { %7012 = vmatprep.mubr.msk.bf16.mxu0 %vm1713_vm5, %v1684_v36 }
 0x589   :  { %7013 = vmatmul.mubr.msk.bf16.gmra.mrb[120].mxu0 %vm1713_vm5, %v1686_v7 }
 0x58d   :  { %v1658_v2 = vpop.permute.xlu1 %1657 }
 0x58e   :  { %v1656_v17 = vpop.permute.xlu0 %1655  ;;  %v1690_v34 = vsel %vm1071_vm4, %v9679_v35, %v1658_v2 }
 0x58f   :  { %v1688_v29 = vsel %vm1071_vm4, %v9678_v56, %v1656_v17 }
 0x590   :  { %7016 = vmatprep.mubr.msk.bf16.mxu0 %vm1713_vm5, %v1688_v29 }
 0x591   :  { %7017 = vmatmul.mubr.msk.bf16.gmra.mrb[124].mxu0 %vm1713_vm5, %v1690_v34 }
 0x592   :  { %7046 = vmatprep.mubr.msk.bf16.mxu0 %vm1071_vm4, %v8167_v40 }
 0x599   :  { %7047 = vmatmul.mubr.msk.bf16.vlgmr.msra.gmra.mrb[128].mxu0 %vm1071_vm4, %v8165_v59 }
 0x59a   :  { %7050 = vmatprep.mubr.msk.bf16.mxu0 %vm1071_vm4, %v8175_v45 }
 0x5a1   :  { %7051 = vmatmul.mubr.msk.bf16.gmra.mrb[132].mxu0 %vm1071_vm4, %v8173_v44 }
 0x5a2   :  { %7054 = vmatprep.mubr.msk.bf16.mxu0 %vm1071_vm4, %v8183_v47 }
 0x5a9   :  { %7055 = vmatmul.mubr.msk.bf16.gmra.mrb[136].mxu0 %vm1071_vm4, %v8181_v19 }
 0x5aa   :  { %7058 = vmatprep.mubr.msk.bf16.mxu0 %vm1071_vm4, %v8191_v49 }
 0x5b1   :  { %7059 = vmatmul.mubr.msk.bf16.gmra.mrb[140].mxu0 %vm1071_vm4, %v8189_v27 }
 0x5b2   :  { %7062 = vmatprep.mubr.msk.bf16.mxu0 %vm1071_vm4, %v8199_v51 }
 0x5b9   :  { %7063 = vmatmul.mubr.msk.bf16.gmra.mrb[144].mxu0 %vm1071_vm4, %v8197_v33 }
 0x5ba   :  { %7066 = vmatprep.mubr.msk.bf16.mxu0 %vm1071_vm4, %v8205_v16 }
 0x5c1   :  { %7067 = vmatmul.mubr.msk.bf16.gmra.mrb[148].mxu0 %vm1071_vm4, %v8203_v0 }
 0x5c2   :  { %7070 = vmatprep.mubr.msk.bf16.mxu0 %vm1071_vm4, %v8209_v12 }
 0x5c9   :  { %7071 = vmatmul.mubr.msk.bf16.gmra.mrb[152].mxu0 %vm1071_vm4, %v8207_v22 }
 0x5ca   :  { %7074 = vmatprep.mubr.msk.bf16.mxu0 %vm1071_vm4, %v8213_v4 }
 0x5d1   :  { %7075 = vmatmul.mubr.msk.bf16.gmra.mrb[156].mxu0 %vm1071_vm4, %v8211_v54 }
 0x62c   :  { %v6990_v57 = vpop.f32.mrb[96].mxu0 }
 0x62d   :  { %v1879_v24 = vpop.f32.mrb[97].mxu0 }
 0x62e   :  { %v6991_v9 = vpop.f32.mrb[98].mxu0 }
 0x62f   :  { %v1882_v18 = vpop.f32.mrb[99].mxu0 }
 0x634   :  { %v6994_v8 = vpop.f32.mrb[100].mxu0 }
 0x635   :  { %v8369_v37 = vpop.f32.mrb[101].mxu0 }
 0x636   :  { %v8371_v31 = vpop.f32.mrb[102].mxu0 }
 0x637   :  { %v8373_v41 = vpop.f32.mrb[103].mxu0 }
 0x63c   :  { %v6998_v42 = vpop.f32.mrb[104].mxu0 }
 0x63d   :  { %v2008_v20 = vmax.f32 %v6990_v57, %v6998_v42  ;;  %v1911_v43 = vpop.f32.mrb[105].mxu0 }
 0x63e   :  { %v2006_v25 = vmax.f32 %v1879_v24, %v1911_v43  ;;  %v6999_v32 = vpop.f32.mrb[106].mxu0  ;;  %v6023_v24 = vld [vmem:[%s9599_s8 + $0x2] ss:$0 sm:$0xff] }
 0x63f   :  { %v2009_v55 = vmax.f32 %v6991_v9, %v6999_v32  ;;  %v1914_v46 = vpop.f32.mrb[107].mxu0  ;;  %v1793_v32 = vadd.f32 %v6023_v24, %v8266_v21  ;;  %v1794_v54 = vadd.f32 %v6023_v24, %v8270_v48  ;;  %v8388_v21 = vld [vmem:[%s9598_s3 + $0x8] sm:$0xff]  }
 0x640   :  { %v2007_v3 = vmax.f32 %v1882_v18, %v1914_v46  ;;  %7034 = vmatprep.subr.bf16.mxu1 %v8388_v21 }
 0x644   :  { %v7002_v60 = vpop.f32.mrb[108].mxu0 }
 0x645   :  { %v2012_v10 = vmax.f32 %v6994_v8, %v7002_v60  ;;  %v1927_v61 = vpop.f32.mrb[109].mxu0 }
 0x646   :  { %v2010_v52 = vmax.f32 %v8369_v37, %v1927_v61  ;;  %v7003_v36 = vpop.f32.mrb[110].mxu0  ;;  %v1796_v61 = vadd.f32 %v8268_v63, %v6023_v24  ;;  %v1799_v63 = vadd.f32 %v8272_v14, %v6023_v24  ;;  %v1798_v14 = vadd.f32 %v6023_v24, %v8278_v50 }
 0x647   :  { %v2013_v53 = vmax.f32 %v8371_v31, %v7003_v36  ;;  %v1930_v7 = vpop.f32.mrb[111].mxu0  ;;  %v1795_v31 = vadd.f32 %v8264_v58, %v6023_v24 }
 0x648   :  { %v2011_v2 = vmax.f32 %v8373_v41, %v1930_v7 }
 0x64c   :  { %v7006_v17 = vpop.f32.mrb[112].mxu0 }
 0x64d   :  { %v1943_v56 = vpop.f32.mrb[113].mxu0 }
 0x64e   :  { %v7007_v29 = vpop.f32.mrb[114].mxu0 }
 0x64f   :  { %v1946_v35 = vpop.f32.mrb[115].mxu0 }
 0x654   :  { %v7010_v34 = vpop.f32.mrb[116].mxu0 }
 0x655   :  { %v1959_v15 = vpop.f32.mrb[117].mxu0 }
 0x656   :  { %v7011_v57 = vpop.f32.mrb[118].mxu0 }
 0x657   :  { %v1962_v38 = vpop.f32.mrb[119].mxu0 }
 0x65c   :  { %v7014_v9 = vpop.f32.mrb[120].mxu0 }
 0x65d   :  { %v2016_v18 = vmax.f32 %v7006_v17, %v7014_v9  ;;  %v1975_v28 = vpop.f32.mrb[121].mxu0 }
 0x65e   :  { %v2014_v8 = vmax.f32 %v1943_v56, %v1975_v28  ;;  %v7015_v37 = vpop.f32.mrb[122].mxu0 }
 0x65f   :  { %v2024_v41 = vmax.f32 %v2008_v20, %v2016_v18  ;;  %v2017_v42 = vmax.f32 %v7007_v29, %v7015_v37  ;;  %v1978_v43 = vpop.f32.mrb[123].mxu0 }
 0x660   :  { %v2022_v46 = vmax.f32 %v2006_v25, %v2014_v8  ;;  %v2015_v60 = vmax.f32 %v1946_v35, %v1978_v43 }
 0x661   :  { %v2032_v36 = vadd.f32 %v2024_v41, %v1795_v31  ;;  %v2025_v7 = vmax.f32 %v2009_v55, %v2017_v42  ;;  %v1797_v55 = vadd.f32 %v6023_v24, %v8274_v26 }
 0x662   :  { %v2030_v4 = vadd.f32 %v2022_v46, %v1793_v32  ;;  %v2023_v17 = vmax.f32 %v2007_v3, %v2015_v60 }
 0x663   :  { %v2033_v9 = vadd.f32 %v2025_v7, %v1796_v61 }
 0x664   :  { %v2031_v56 = vadd.f32 %v2023_v17, %v1794_v54  ;;  %v7018_v28 = vpop.f32.mrb[124].mxu0 }
 0x665   :  { %v2020_v22 = vmax.f32 %v7010_v34, %v7018_v28  ;;  %v1991_v58 = vpop.f32.mrb[125].mxu0  ;;  %v2039_v20 = vpack.c.bf16 %v2033_v9, %v2032_v36 }
 0x666   :  { %v2018_v29 = vmax.f32 %v1959_v15, %v1991_v58  ;;  %v7019_v18 = vpop.f32.mrb[126].mxu0  ;;  %v2038_v37 = vpack.c.bf16 %v2031_v56, %v2030_v4  ;;  %v1800_v4 = vadd.f32 %v8276_v62, %v6023_v24 }
 0x667   :  { %v2028_v25 = vmax.f32 %v2012_v10, %v2020_v22  ;;  %v2021_v48 = vmax.f32 %v7011_v57, %v7019_v18  ;;  %2048 = vrot.lane.b32.xlu1 %v2039_v20, %s7673_s29  ;;  %v1994_v54 = vpop.f32.mrb[127].mxu0 }
 0x668   :  { %v2026_v3 = vmax.f32 %v2010_v52, %v2018_v29  ;;  %v2019_v35 = vmax.f32 %v1962_v38, %v1994_v54  ;;  %2046 = vrot.lane.b32.xlu0 %v2038_v37, %s7673_s29 }
 0x669   :  { %v2036_v34 = vadd.f32 %v2028_v25, %v1799_v63  ;;  %v2029_v15 = vmax.f32 %v2013_v53, %v2021_v48 }
 0x66a   :  { %v2034_v22 = vadd.f32 %v2026_v3, %v1797_v55  ;;  %v2027_v10 = vmax.f32 %v2011_v2, %v2019_v35 }
 0x66b   :  { %v2037_v57 = vadd.f32 %v2029_v15, %v1800_v4 }
 0x66c   :  { %v2035_v8 = vadd.f32 %v2027_v10, %v1798_v14  ;;  %v7048_v31 = vpop.f32.mrb[128].mxu0 }
 0x66d   :  { %v2357_v41 = vpop.f32.mrb[129].mxu0  ;;  %v2041_v42 = vpack.c.bf16 %v2037_v57, %v2036_v34 }
 0x66e   :  { %v7049_v26 = vpop.f32.mrb[130].mxu0  ;;  %v2040_v52 = vpack.c.bf16 %v2035_v8, %v2034_v22 }
 0x66f   :  { %2052 = vrot.lane.b32.xlu1 %v2041_v42, %s7673_s29  ;;  %v2360_v38 = vpop.f32.mrb[131].mxu0 }
 0x670   :  { %2050 = vrot.lane.b32.xlu0 %v2040_v52, %s7673_s29 }
 0x674   :  { %v7052_v43 = vpop.f32.mrb[132].mxu0 }
 0x675   :  { %v2373_v62 = vpop.f32.mrb[133].mxu0 }
 0x676   :  { %v7053_v32 = vpop.f32.mrb[134].mxu0 }
 0x677   :  { %v2376_v53 = vpop.f32.mrb[135].mxu0 }
 0x67c   :  { %v7056_v46 = vpop.f32.mrb[136].mxu0 }
 0x67d   :  { %v2486_v50 = vmax.f32 %v7048_v31, %v7056_v46  ;;  %v2389_v24 = vpop.f32.mrb[137].mxu0 }
 0x67e   :  { %v2484_v2 = vmax.f32 %v2357_v41, %v2389_v24  ;;  %v7057_v60 = vpop.f32.mrb[138].mxu0 }
 0x67f   :  { %v2487_v61 = vmax.f32 %v7049_v26, %v7057_v60  ;;  %v2392_v36 = vpop.f32.mrb[139].mxu0 }
 0x680   :  { %v2485_v7 = vmax.f32 %v2360_v38, %v2392_v36 }
 0x684   :  { %v7060_v17 = vpop.f32.mrb[140].mxu0 }
 0x685   :  { %v2490_v9 = vmax.f32 %v7052_v43, %v7060_v17  ;;  %v2405_v56 = vpop.f32.mrb[141].mxu0 }
 0x686   :  { %v2488_v28 = vmax.f32 %v2373_v62, %v2405_v56  ;;  %v7061_v58 = vpop.f32.mrb[142].mxu0 }
 0x687   :  { %v2491_v20 = vmax.f32 %v7053_v32, %v7061_v58  ;;  %v2408_v29 = vpop.f32.mrb[143].mxu0 }
 0x688   :  { %v2489_v18 = vmax.f32 %v2376_v53, %v2408_v29 }
 0x68c   :  { %v7064_v37 = vpop.f32.mrb[144].mxu0 }
 0x68d   :  { %v2421_v63 = vpop.f32.mrb[145].mxu0 }
 0x68e   :  { %v7065_v25 = vpop.f32.mrb[146].mxu0 }
 0x68f   :  { %v2424_v48 = vpop.f32.mrb[147].mxu0 }
 0x694   :  { %v7068_v54 = vpop.f32.mrb[148].mxu0 }
 0x695   :  { %v2437_v55 = vpop.f32.mrb[149].mxu0 }
 0x696   :  { %v7069_v3 = vpop.f32.mrb[150].mxu0 }
 0x697   :  { %v2440_v35 = vpop.f32.mrb[151].mxu0 }
 0x69c   :  { %v7072_v4 = vpop.f32.mrb[152].mxu0 }
 0x69d   :  { %v2494_v34 = vmax.f32 %v7064_v37, %v7072_v4  ;;  %v2453_v15 = vpop.f32.mrb[153].mxu0 }
 0x69e   :  { %v2492_v14 = vmax.f32 %v2421_v63, %v2453_v15  ;;  %v7073_v22 = vpop.f32.mrb[154].mxu0 }
 0x69f   :  { %v2502_v10 = vmax.f32 %v2486_v50, %v2494_v34  ;;  %v2495_v57 = vmax.f32 %v7065_v25, %v7073_v22  ;;  %v2456_v8 = vpop.f32.mrb[155].mxu0  ;;  %v6061_v25 = vld [vmem:[%s9599_s8 + $0x4] ss:$0 sm:$0xff] }
 0x6a0   :  { %v2500_v31 = vmax.f32 %v2484_v2, %v2492_v14  ;;  %v2493_v41 = vmax.f32 %v2424_v48, %v2456_v8 }
 0x6a1   :  { %v2503_v42 = vmax.f32 %v2487_v61, %v2495_v57 }
 0x6a2   :  { %v2501_v26 = vmax.f32 %v2485_v7, %v2493_v41 }
 0x6a4   :  { %v7076_v52 = vpop.f32.mrb[156].mxu0 }
 0x6a5   :  { %v2498_v38 = vmax.f32 %v7068_v54, %v7076_v52  ;;  %v2469_v43 = vpop.f32.mrb[157].mxu0 }
 0x6a6   :  { %v2496_v62 = vmax.f32 %v2437_v55, %v2469_v43  ;;  %v7077_v32 = vpop.f32.mrb[158].mxu0 }
 0x6a7   :  { %v2506_v53 = vmax.f32 %v2490_v9, %v2498_v38  ;;  %v2499_v46 = vmax.f32 %v7069_v3, %v7077_v32  ;;  %v2472_v24 = vpop.f32.mrb[159].mxu0 }
 0x6a8   :  { %v2504_v60 = vmax.f32 %v2488_v28, %v2496_v62  ;;  %v2497_v36 = vmax.f32 %v2440_v35, %v2472_v24 }
 0x6a9   :  { %v2507_v17 = vmax.f32 %v2491_v20, %v2499_v46 }
 0x6aa   :  { %v2505_v56 = vmax.f32 %v2489_v18, %v2497_v36 }
 0x6d9   :  { %v2049_v58 = vpop.permute.xlu1 %2048 }
 0x6da   :  { %v2047_v50 = vpop.permute.xlu0 %2046  ;;  %v2057_v61 = vsel %vm1713_vm5, %v8223_v5, %v2049_v58 }
 0x6db   :  { %v2055_v2 = vsel %vm1713_vm5, %v8217_v1, %v2047_v50  ;;  %v8423_v1 = vld [vmem:[%s9597_s1 + $0x80] sm:$0xff]  }
 0x6dc   :  { %7026 = vmatprep.mubr.msk.bf16.mxu1 %vm2088_vm6, %v2055_v2 }
 0x6dd   :  { %7027 = vmatmul.mubr.msk.bf16.vlgmr.msra.gmra.mrb[96].mxu1 %vm2088_vm6, %v2057_v61  ;;  %v8493_v61 = vld [vmem:[%s9597_s1 + $0xa8] sm:$0xff]  }
 0x6de   :  { %7035 = vmatpush3.bf16.msra.mxu1 %v8388_v21 }
 0x6e1   :  { %v2053_v7 = vpop.permute.xlu1 %2052 }
 0x6e2   :  { %v2051_v9 = vpop.permute.xlu0 %2050  ;;  %v2061_v20 = vsel %vm1713_vm5, %v8235_v6, %v2053_v7  ;;  %v8500_v7 = vld [vmem:[%s9597_s1 + $0xb0] sm:$0xff]  }
 0x6e3   :  { %v2059_v28 = vsel %vm1713_vm5, %v8229_v30, %v2051_v9  ;;  %v8507_v9 = vld [vmem:[%s9597_s1 + $0xb8] sm:$0xff]  }
 0x6e4   :  { %7030 = vmatprep.mubr.msk.bf16.mxu1 %vm2088_vm6, %v2059_v28  ;;  %v8514_v28 = vld [vmem:[%s9597_s1 + $0xc0] sm:$0xff]  }
 0x6e5   :  { %7031 = vmatmul.mubr.msk.bf16.gmra.mrb[100].mxu1 %vm2088_vm6, %v2061_v20  ;;  %v8521_v20 = vld [vmem:[%s9597_s1 + $0xc8] sm:$0xff]  }
 0x6e6   :  { %7036 = vmatprep.mubr.msk.bf16.mxu1 %vm1071_vm4, %v7909_v13 }
 0x6ed   :  { %7037 = vmatmul.mubr.msk.bf16.vlgmr.msra.gmra.mrb[104].mxu1 %vm1071_vm4, %v7907_v11 }
 0x6ee   :  { %7040 = vmatprep.mubr.msk.bf16.mxu1 %vm1071_vm4, %v7925_v39 }
 0x6f5   :  { %7041 = vmatmul.mubr.msk.bf16.gmra.mrb[108].mxu1 %vm1071_vm4, %v7921_v23 }
 0x6f6   :  { %7086 = vmatprep.mubr.msk.bf16.mxu1 %vm364_vm3, %v8423_v1 }
 0x7b0   :  { %v8427_v5 = vpop.f32.mrb[96].mxu1 }
 0x7b1   :  { %v8429_v30 = vpop.f32.mrb[97].mxu1 }
 0x7b2   :  { %v8431_v6 = vpop.f32.mrb[98].mxu1 }
 0x7b3   :  { %v8433_v21 = vpop.f32.mrb[99].mxu1 }
 0x7b8   :  { %v8435_v29 = vpop.f32.mrb[100].mxu1 }
 0x7b9   :  { %v8437_v18 = vpop.f32.mrb[101].mxu1 }
 0x7ba   :  { %v8439_v37 = vpop.f32.mrb[102].mxu1 }
 0x7bb   :  { %v8441_v63 = vpop.f32.mrb[103].mxu1 }
 0x7c0   :  { %v7038_v48 = vpop.f32.mrb[104].mxu1 }
 0x7c1   :  { %v2263_v54 = vadd.f32 %v7038_v48, %v6061_v25  ;;  %v2224_v55 = vpop.f32.mrb[105].mxu1  ;;  %v8535_v48 = vld [vmem:[%s9597_s1 + $0xd8] sm:$0xff]  }
 0x7c2   :  { %v2261_v3 = vadd.f32 %v6061_v25, %v2224_v55  ;;  %v7039_v35 = vpop.f32.mrb[106].mxu1  ;;  %v8549_v55 = vld [vmem:[%s9597_s1 + $0xe8] sm:$0xff]  }
 0x7c3   :  { %v2510_v4 = vadd.f32 %v2502_v10, %v2263_v54  ;;  %v2264_v34 = vadd.f32 %v7039_v35, %v6061_v25  ;;  %v2227_v15 = vpop.f32.mrb[107].mxu1  ;;  %v8542_v54 = vld [vmem:[%s9597_s1 + $0xe0] sm:$0xff]   ;;  %v8563_v35 = vld [vmem:[%s9597_s1 + $0xf8] sm:$0xff]  }
 0x7c4   :  { %v2508_v14 = vadd.f32 %v2500_v31, %v2261_v3  ;;  %v2262_v22 = vadd.f32 %v6061_v25, %v2227_v15  ;;  %v8556_v3 = vld [vmem:[%s9597_s1 + $0xf0] sm:$0xff]   ;;  %9681 = vst [vmem:[#allocation4_spill] sm:$0xff] %v8563_v35 }
 0x7c5   :  { %v2511_v57 = vadd.f32 %v2503_v42, %v2264_v34  ;;  %9680 = vst [vmem:[#allocation6_spill] sm:$0xff] %v8556_v3  ;;  %v7599_v34 = vld [vmem:[%s9602_s6 + $0x18] sm:$0xff]  }
 0x7c6   :  { %v2509_v8 = vadd.f32 %v2501_v26, %v2262_v22 }
 0x7c7   :  { %v8446_v41 = vpack.c.bf16 %v2511_v57, %v2510_v4  ;;  %v7598_v4 = vld [vmem:[%s9602_s6 + $0x10] sm:$0xff]  }
 0x7c8   :  { %v7042_v52 = vpop.f32.mrb[108].mxu1  ;;  %v8448_v38 = vpack.c.bf16 %v2509_v8, %v2508_v14 }
 0x7c9   :  { %v2267_v43 = vadd.f32 %v7042_v52, %v6061_v25  ;;  %v2240_v62 = vpop.f32.mrb[109].mxu1 }
 0x7ca   :  { %v2265_v32 = vadd.f32 %v6061_v25, %v2240_v62  ;;  %v7043_v46 = vpop.f32.mrb[110].mxu1  ;;  %7078 = vmatprep.subr.bf16.mxu1 %v8448_v38 }
 0x7cb   :  { %v2514_v24 = vadd.f32 %v2506_v53, %v2267_v43  ;;  %v2268_v36 = vadd.f32 %v7043_v46, %v6061_v25  ;;  %v2243_v10 = vpop.f32.mrb[111].mxu1  ;;  %7079 = vmatpush3.bf16.msra.mxu1 %v8448_v38  ;;  %v8465_v53 = vld [vmem:[%s9597_s1 + $0x88] sm:$0xff]  }
 0x7cc   :  { %v2512_v31 = vadd.f32 %v2504_v60, %v2265_v32  ;;  %v2266_v58 = vadd.f32 %v6061_v25, %v2243_v10  ;;  %7080 = vmatprep.subr.bf16.mxu1 %v8446_v41  ;;  %v8472_v60 = vld [vmem:[%s9597_s1 + $0x90] sm:$0xff]  }
 0x7cd   :  { %v2515_v42 = vadd.f32 %v2507_v17, %v2268_v36  ;;  %v8479_v17 = vld [vmem:[%s9597_s1 + $0x98] sm:$0xff]   ;;  %v8528_v25 = vld [vmem:[%s9597_s1 + $0xd0] sm:$0xff]  }
 0x7ce   :  { %v2513_v26 = vadd.f32 %v2505_v56, %v2266_v58  ;;  %v8486_v56 = vld [vmem:[%s9597_s1 + $0xa0] sm:$0xff]  }
 0x7cf   :  { %7081 = vmatpush3.bf16.msra.mxu1 %v8446_v41  ;;  %v8454_v50 = vpack.c.bf16 %v2515_v42, %v2514_v24 }
 0x7d0   :  { %v8456_v2 = vpack.c.bf16 %v2513_v26, %v2512_v31 }
 0x7d2   :  { %7082 = vmatprep.subr.bf16.mxu1 %v8456_v2 }
 0x7d3   :  { %7083 = vmatpush3.bf16.msra.mxu1 %v8456_v2 }
 0x7d4   :  { %7084 = vmatprep.subr.bf16.mxu1 %v8454_v50 }
 0x7d7   :  { %7085 = vmatpush3.bf16.msra.mxu1 %v8454_v50 }
 0x7d8   :  { %7130 = vmatprep.subr.bf16.mxu1 %v7598_v4 }
 0x7da   :  { %7087 = vmatmul.mubr.msk.bf16.vlgmr.msra.gmra.mrb[112].mxu1 %vm364_vm3, %v8465_v53 }
 0x7db   :  { %7090 = vmatprep.mubr.msk.bf16.mxu1 %vm364_vm3, %v8472_v60  ;;  %7131 = vmatpush3.bf16.msra.mxu1 %v7598_v4 }
 0x7dc   :  { %7132 = vmatprep.subr.bf16.mxu1 %v7599_v34 }
 0x7df   :  { %7133 = vmatpush3.bf16.msra.mxu1 %v7599_v34 }
 0x7e2   :  { %7091 = vmatmul.mubr.msk.bf16.gmra.mrb[116].mxu1 %vm364_vm3, %v8479_v17 }
 0x7e3   :  { %7094 = vmatprep.mubr.msk.bf16.mxu1 %vm364_vm3, %v8486_v56 }
 0x7ea   :  { %7095 = vmatmul.mubr.msk.bf16.gmra.mrb[120].mxu1 %vm364_vm3, %v8493_v61 }
 0x7eb   :  { %7098 = vmatprep.mubr.msk.bf16.mxu1 %vm364_vm3, %v8500_v7 }
 0x7f2   :  { %7099 = vmatmul.mubr.msk.bf16.gmra.mrb[124].mxu1 %vm364_vm3, %v8507_v9 }
 0x7f3   :  { %7102 = vmatprep.mubr.msk.bf16.mxu1 %vm364_vm3, %v8514_v28 }
 0x7fa   :  { %7103 = vmatmul.mubr.msk.bf16.gmra.mrb[128].mxu1 %vm364_vm3, %v8521_v20 }
 0x7fb   :  { %7106 = vmatprep.mubr.msk.bf16.mxu1 %vm364_vm3, %v8528_v25 }
 0x802   :  { %7107 = vmatmul.mubr.msk.bf16.gmra.mrb[132].mxu1 %vm364_vm3, %v8535_v48 }
 0x803   :  { %7110 = vmatprep.mubr.msk.bf16.mxu1 %vm364_vm3, %v8542_v54 }
 0x80a   :  { %7111 = vmatmul.mubr.msk.bf16.gmra.mrb[136].mxu1 %vm364_vm3, %v8549_v55 }
 0x80b   :  { %7114 = vmatprep.mubr.msk.bf16.mxu1 %vm364_vm3, %v8556_v3 }
 0x812   :  { %7115 = vmatmul.mubr.msk.bf16.gmra.mrb[140].mxu1 %vm364_vm3, %v8563_v35 }
 0x8ad   :  { %v7088_v15 = vpop.f32.mrb[112].mxu1 }
 0x8ae   :  { %v2574_v14 = vpop.f32.mrb[113].mxu1 }
 0x8af   :  { %v7089_v22 = vpop.f32.mrb[114].mxu1 }
 0x8b0   :  { %v2702_v57 = vpack.c.bf16 %v7089_v22, %v7088_v15  ;;  %v2577_v8 = vpop.f32.mrb[115].mxu1 }
 0x8b1   :  { %v2701_v52 = vpack.c.bf16 %v2577_v8, %v2574_v14 }
 0x8b2   :  { %2735 = vrot.lane.b32.xlu1 %v2702_v57, %s7672_s13 }
 0x8b3   :  { %2733 = vrot.lane.b32.xlu0 %v2701_v52, %s7672_s13 }
 0x8b5   :  { %v7092_v43 = vpop.f32.mrb[116].mxu1 }
 0x8b6   :  { %v2590_v62 = vpop.f32.mrb[117].mxu1 }
 0x8b7   :  { %v7093_v32 = vpop.f32.mrb[118].mxu1 }
 0x8b8   :  { %v2704_v46 = vpack.c.bf16 %v7093_v32, %v7092_v43  ;;  %v2593_v24 = vpop.f32.mrb[119].mxu1 }
 0x8b9   :  { %v2703_v36 = vpack.c.bf16 %v2593_v24, %v2590_v62  ;;  %v7600_v24 = vld [vmem:[%s9601_s4 + $0x10] sm:$0xff]  }
 0x8ba   :  { %2739 = vrot.lane.b32.xlu1 %v2704_v46, %s7672_s13  ;;  %7118 = vmatprep.subr.bf16.mxu0 %v7600_v24 }
 0x8bb   :  { %2737 = vrot.lane.b32.xlu0 %v2703_v36, %s7672_s13  ;;  %7119 = vmatpush3.bf16.msra.mxu0 %v7600_v24 }
 0x8bd   :  { %v7096_v10 = vpop.f32.mrb[120].mxu1 }
 0x8be   :  { %v2606_v31 = vpop.f32.mrb[121].mxu1 }
 0x8bf   :  { %v7097_v58 = vpop.f32.mrb[122].mxu1 }
 0x8c0   :  { %v2706_v42 = vpack.c.bf16 %v7097_v58, %v7096_v10  ;;  %v2609_v26 = vpop.f32.mrb[123].mxu1  ;;  %v7601_v58 = vld [vmem:[%s9601_s4 + $0x18] sm:$0xff]  }
 0x8c1   :  { %v2705_v4 = vpack.c.bf16 %v2609_v26, %v2606_v31  ;;  %7120 = vmatprep.subr.bf16.mxu0 %v7601_v58 }
 0x8c2   :  { %2743 = vrot.lane.b32.xlu1 %v2706_v42, %s7672_s13  ;;  %7121 = vmatpush3.bf16.msra.mxu0 %v7601_v58 }
 0x8c3   :  { %2741 = vrot.lane.b32.xlu0 %v2705_v4, %s7672_s13 }
 0x8c5   :  { %v7100_v34 = vpop.f32.mrb[124].mxu1 }
 0x8c6   :  { %v2622_v15 = vpop.f32.mrb[125].mxu1 }
 0x8c7   :  { %v7101_v14 = vpop.f32.mrb[126].mxu1 }
 0x8c8   :  { %v2708_v22 = vpack.c.bf16 %v7101_v14, %v7100_v34  ;;  %v2625_v57 = vpop.f32.mrb[127].mxu1 }
 0x8c9   :  { %v2707_v8 = vpack.c.bf16 %v2625_v57, %v2622_v15 }
 0x8ca   :  { %2747 = vrot.lane.b32.xlu1 %v2708_v22, %s7672_s13 }
 0x8cb   :  { %2745 = vrot.lane.b32.xlu0 %v2707_v8, %s7672_s13 }
 0x8cd   :  { %v7104_v52 = vpop.f32.mrb[128].mxu1 }
 0x8ce   :  { %v2638_v43 = vpop.f32.mrb[129].mxu1 }
 0x8cf   :  { %v7105_v62 = vpop.f32.mrb[130].mxu1 }
 0x8d0   :  { %v2710_v32 = vpack.c.bf16 %v7105_v62, %v7104_v52  ;;  %v2641_v46 = vpop.f32.mrb[131].mxu1 }
 0x8d1   :  { %v2709_v36 = vpack.c.bf16 %v2641_v46, %v2638_v43 }
 0x8d2   :  { %2751 = vrot.lane.b32.xlu1 %v2710_v32, %s7672_s13 }
 0x8d3   :  { %2749 = vrot.lane.b32.xlu0 %v2709_v36, %s7672_s13 }
 0x8d5   :  { %v7108_v10 = vpop.f32.mrb[132].mxu1 }
 0x8d6   :  { %v2654_v31 = vpop.f32.mrb[133].mxu1 }
 0x8d7   :  { %v7109_v42 = vpop.f32.mrb[134].mxu1 }
 0x8d8   :  { %v2712_v26 = vpack.c.bf16 %v7109_v42, %v7108_v10  ;;  %v2657_v4 = vpop.f32.mrb[135].mxu1 }
 0x8d9   :  { %v2711_v34 = vpack.c.bf16 %v2657_v4, %v2654_v31 }
 0x8da   :  { %2755 = vrot.lane.b32.xlu1 %v2712_v26, %s7672_s13 }
 0x8db   :  { %2753 = vrot.lane.b32.xlu0 %v2711_v34, %s7672_s13 }
 0x8dd   :  { %v7112_v15 = vpop.f32.mrb[136].mxu1 }
 0x8de   :  { %v2670_v14 = vpop.f32.mrb[137].mxu1 }
 0x8df   :  { %v7113_v22 = vpop.f32.mrb[138].mxu1 }
 0x8e0   :  { %v2714_v57 = vpack.c.bf16 %v7113_v22, %v7112_v15  ;;  %v2673_v8 = vpop.f32.mrb[139].mxu1 }
 0x8e1   :  { %v2713_v52 = vpack.c.bf16 %v2673_v8, %v2670_v14 }
 0x8e2   :  { %2759 = vrot.lane.b32.xlu1 %v2714_v57, %s7672_s13 }
 0x8e3   :  { %2757 = vrot.lane.b32.xlu0 %v2713_v52, %s7672_s13 }
 0x8e5   :  { %v7116_v43 = vpop.f32.mrb[140].mxu1 }
 0x8e6   :  { %2526 = vrot.lane.b32.xlu1 %v8446_v41, %s7672_s13  ;;  %v2686_v62 = vpop.f32.mrb[141].mxu1 }
 0x8e7   :  { %2524 = vrot.lane.b32.xlu0 %v8448_v38, %s7672_s13  ;;  %v7117_v32 = vpop.f32.mrb[142].mxu1 }
 0x8e8   :  { %v2716_v46 = vpack.c.bf16 %v7117_v32, %v7116_v43  ;;  %v2689_v24 = vpop.f32.mrb[143].mxu1  ;;  %v9682_v43 = vld [vmem:[#allocation16_spill] sm:$0xff] }
 0x8e9   :  { %v2715_v36 = vpack.c.bf16 %v2689_v24, %v2686_v62 }
 0x8ea   :  { %2763 = vrot.lane.b32.xlu1 %v2716_v46, %s7672_s13 }
 0x8eb   :  { %2761 = vrot.lane.b32.xlu0 %v2715_v36, %s7672_s13  ;;  %v9683_v36 = vld [vmem:[#allocation18_spill] sm:$0xff] }
 0x8ee   :  { %2530 = vrot.lane.b32.xlu1 %v8454_v50, %s7672_s13 }
 0x8ef   :  { %2528 = vrot.lane.b32.xlu0 %v8456_v2, %s7672_s13 }
 0x924   :  { %v2736_v10 = vpop.permute.xlu1 %2735 }
 0x925   :  { %v2734_v41 = vpop.permute.xlu0 %2733  ;;  %v2768_v38 = vsel %vm1071_vm4, %v8165_v59, %v2736_v10 }
 0x926   :  { %v2766_v31 = vsel %vm1071_vm4, %v8167_v40, %v2734_v41  ;;  %v9684_v41 = vld [vmem:[#allocation17_spill] sm:$0xff] }
 0x927   :  { %7134 = vmatprep.mubr.msk.bf16.mxu1 %vm1713_vm5, %v2766_v31 }
 0x928   :  { %7135 = vmatmul.mubr.msk.bf16.vlgmr.msra.gmra.mrb[144].mxu1 %vm1713_vm5, %v2768_v38 }
 0x92c   :  { %v2740_v58 = vpop.permute.xlu1 %2739 }
 0x92d   :  { %v2738_v42 = vpop.permute.xlu0 %2737  ;;  %v2772_v2 = vsel %vm1071_vm4, %v8173_v44, %v2740_v58 }
 0x92e   :  { %v2770_v50 = vsel %vm1071_vm4, %v8175_v45, %v2738_v42  ;;  %v7602_v42 = vld [vmem:[%s9603_s7 + $0x18] sm:$0xff]  }
 0x92f   :  { %7138 = vmatprep.mubr.msk.bf16.mxu1 %vm1713_vm5, %v2770_v50  ;;  %v7603_v50 = vld [vmem:[%s9603_s7 + $0x20] sm:$0xff]   ;;  %7166 = vmatprep.subr.bf16.mxu0 %v7602_v42 }
 0x930   :  { %7139 = vmatmul.mubr.msk.bf16.gmra.mrb[148].mxu1 %vm1713_vm5, %v2772_v2 }
 0x934   :  { %v2744_v40 = vpop.permute.xlu1 %2743 }
 0x935   :  { %v2742_v26 = vpop.permute.xlu0 %2741  ;;  %v2776_v4 = vsel %vm1071_vm4, %v8181_v19, %v2744_v40 }
 0x936   :  { %v2774_v59 = vsel %vm1071_vm4, %v8183_v47, %v2742_v26 }
 0x937   :  { %7142 = vmatprep.mubr.msk.bf16.mxu1 %vm1713_vm5, %v2774_v59 }
 0x938   :  { %7143 = vmatmul.mubr.msk.bf16.gmra.mrb[152].mxu1 %vm1713_vm5, %v2776_v4 }
 0x93c   :  { %v2748_v45 = vpop.permute.xlu1 %2747 }
 0x93d   :  { %v2746_v34 = vpop.permute.xlu0 %2745  ;;  %v2780_v15 = vsel %vm1071_vm4, %v8189_v27, %v2748_v45 }
 0x93e   :  { %v2778_v44 = vsel %vm1071_vm4, %v8191_v49, %v2746_v34 }
 0x93f   :  { %7146 = vmatprep.mubr.msk.bf16.mxu1 %vm1713_vm5, %v2778_v44 }
 0x940   :  { %7147 = vmatmul.mubr.msk.bf16.gmra.mrb[156].mxu1 %vm1713_vm5, %v2780_v15 }
 0x944   :  { %v2752_v47 = vpop.permute.xlu1 %2751 }
 0x945   :  { %v2750_v14 = vpop.permute.xlu0 %2749  ;;  %v2784_v22 = vsel %vm1071_vm4, %v8197_v33, %v2752_v47 }
 0x946   :  { %v2782_v19 = vsel %vm1071_vm4, %v8199_v51, %v2750_v14 }
 0x947   :  { %7150 = vmatprep.mubr.msk.bf16.mxu1 %vm1713_vm5, %v2782_v19 }
 0x948   :  { %7151 = vmatmul.mubr.msk.bf16.gmra.mrb[160].mxu1 %vm1713_vm5, %v2784_v22 }
 0x94c   :  { %v2756_v49 = vpop.permute.xlu1 %2755 }
 0x94d   :  { %v2754_v57 = vpop.permute.xlu0 %2753  ;;  %v2788_v8 = vsel %vm1071_vm4, %v8203_v0, %v2756_v49 }
 0x94e   :  { %v2786_v27 = vsel %vm1071_vm4, %v8205_v16, %v2754_v57 }
 0x94f   :  { %7154 = vmatprep.mubr.msk.bf16.mxu1 %vm1713_vm5, %v2786_v27 }
 0x950   :  { %7155 = vmatmul.mubr.msk.bf16.gmra.mrb[164].mxu1 %vm1713_vm5, %v2788_v8 }
 0x954   :  { %v2760_v51 = vpop.permute.xlu1 %2759 }
 0x955   :  { %v2758_v52 = vpop.permute.xlu0 %2757  ;;  %v2792_v62 = vsel %vm1071_vm4, %v9682_v43, %v2760_v51 }
 0x956   :  { %v2790_v33 = vsel %vm1071_vm4, %v8209_v12, %v2758_v52 }
 0x957   :  { %7158 = vmatprep.mubr.msk.bf16.mxu1 %vm1713_vm5, %v2790_v33 }
 0x958   :  { %v2527_v32 = vpop.permute.xlu1 %2526  ;;  %7159 = vmatmul.mubr.msk.bf16.gmra.mrb[168].mxu1 %vm1713_vm5, %v2792_v62 }
 0x959   :  { %v2525_v16 = vpop.permute.xlu0 %2524  ;;  %v8651_v46 = vsel %vm1071_vm4, %v7907_v11, %v2527_v32 }
 0x95a   :  { %v8647_v0 = vsel %vm1071_vm4, %v7909_v13, %v2525_v16 }
 0x95b   :  { %7122 = vmatprep.mubr.msk.bf16.mxu0 %vm1713_vm5, %v8647_v0 }
 0x95c   :  { %7123 = vmatmul.mubr.msk.bf16.vlgmr.msra.gmra.mrb[160].mxu0 %vm1713_vm5, %v8651_v46  ;;  %v2764_v12 = vpop.permute.xlu1 %2763 }
 0x95d   :  { %v2762_v24 = vpop.permute.xlu0 %2761  ;;  %v2796_v31 = vsel %vm1071_vm4, %v9684_v41, %v2764_v12  ;;  %7167 = vmatpush3.bf16.msra.mxu0 %v7602_v42 }
 0x95e   :  { %v2794_v10 = vsel %vm1071_vm4, %v9683_v36, %v2762_v24  ;;  %7168 = vmatprep.subr.bf16.mxu0 %v7603_v50 }
 0x95f   :  { %7162 = vmatprep.mubr.msk.bf16.mxu1 %vm1713_vm5, %v2794_v10 }
 0x960   :  { %v2531_v13 = vpop.permute.xlu1 %2530  ;;  %7163 = vmatmul.mubr.msk.bf16.gmra.mrb[172].mxu1 %vm1713_vm5, %v2796_v31 }
 0x961   :  { %v2529_v11 = vpop.permute.xlu0 %2528  ;;  %v8669_v58 = vsel %vm1071_vm4, %v7921_v23, %v2531_v13  ;;  %v7604_v23 = vld [vmem:[%s9603_s7 + $0x28] sm:$0xff]   ;;  %7169 = vmatpush3.bf16.msra.mxu0 %v7603_v50 }
 0x962   :  { %v8665_v38 = vsel %vm1071_vm4, %v7925_v39, %v2529_v11  ;;  %7170 = vmatprep.subr.bf16.mxu0 %v7604_v23 }
 0x963   :  { %7126 = vmatprep.mubr.msk.bf16.mxu0 %vm1713_vm5, %v8665_v38 }
 0x964   :  { %7127 = vmatmul.mubr.msk.bf16.gmra.mrb[164].mxu0 %vm1713_vm5, %v8669_v58 }
 0x965   :  { %7171 = vmatpush3.bf16.msra.mxu0 %v7604_v23 }
 0x9fb   :  { %v7136_v39 = vpop.f32.mrb[144].mxu1 }
 0x9fc   :  { %v2986_v2 = vpop.f32.mrb[145].mxu1 }
 0x9fd   :  { %v7137_v40 = vpop.f32.mrb[146].mxu1 }
 0x9fe   :  { %v2989_v26 = vpop.f32.mrb[147].mxu1 }
 0xa03   :  { %v7140_v59 = vpop.f32.mrb[148].mxu1 }
 0xa04   :  { %v3002_v4 = vpop.f32.mrb[149].mxu1 }
 0xa05   :  { %v8684_v45 = vpop.f32.mrb[150].mxu1 }
 0xa06   :  { %v8686_v34 = vpop.f32.mrb[151].mxu1 }
 0xa0b   :  { %v7144_v44 = vpop.f32.mrb[152].mxu1 }
 0xa0c   :  { %v3115_v15 = vmax.f32 %v7136_v39, %v7144_v44  ;;  %v3018_v47 = vpop.f32.mrb[153].mxu1 }
 0xa0d   :  { %v3113_v14 = vmax.f32 %v2986_v2, %v3018_v47  ;;  %v7145_v19 = vpop.f32.mrb[154].mxu1  ;;  %v6110_v2 = vld [vmem:[%s9599_s8 + $0x5] ss:$0 sm:$0xff] }
 0xa0e   :  { %v3116_v22 = vmax.f32 %v7137_v40, %v7145_v19  ;;  %v3021_v49 = vpop.f32.mrb[155].mxu1 }
 0xa0f   :  { %v3114_v57 = vmax.f32 %v2989_v26, %v3021_v49 }
 0xa13   :  { %v7148_v27 = vpop.f32.mrb[156].mxu1 }
 0xa14   :  { %v3119_v8 = vmax.f32 %v7140_v59, %v7148_v27  ;;  %v3034_v51 = vpop.f32.mrb[157].mxu1 }
 0xa15   :  { %v3117_v52 = vmax.f32 %v3002_v4, %v3034_v51  ;;  %v7149_v33 = vpop.f32.mrb[158].mxu1 }
 0xa16   :  { %v3120_v43 = vmax.f32 %v8684_v45, %v7149_v33  ;;  %v3037_v62 = vpop.f32.mrb[159].mxu1 }
 0xa17   :  { %v3118_v32 = vmax.f32 %v8686_v34, %v3037_v62 }
 0xa1b   :  { %v7152_v16 = vpop.f32.mrb[160].mxu1 }
 0xa1c   :  { %v3050_v12 = vpop.f32.mrb[161].mxu1 }
 0xa1d   :  { %v7153_v24 = vpop.f32.mrb[162].mxu1 }
 0xa1e   :  { %v3053_v36 = vpop.f32.mrb[163].mxu1 }
 0xa23   :  { %v7156_v10 = vpop.f32.mrb[164].mxu1 }
 0xa24   :  { %v3066_v41 = vpop.f32.mrb[165].mxu1 }
 0xa25   :  { %v7157_v31 = vpop.f32.mrb[166].mxu1 }
 0xa26   :  { %v3069_v13 = vpop.f32.mrb[167].mxu1 }
 0xa2b   :  { %v7160_v11 = vpop.f32.mrb[168].mxu1 }
 0xa2c   :  { %v3123_v42 = vmax.f32 %v7152_v16, %v7160_v11  ;;  %v3082_v50 = vpop.f32.mrb[169].mxu1 }
 0xa2d   :  { %v3121_v23 = vmax.f32 %v3050_v12, %v3082_v50  ;;  %v7161_v39 = vpop.f32.mrb[170].mxu1 }
 0xa2e   :  { %v3131_v40 = vmax.f32 %v3115_v15, %v3123_v42  ;;  %v3124_v26 = vmax.f32 %v7153_v24, %v7161_v39  ;;  %v3085_v59 = vpop.f32.mrb[171].mxu1 }
 0xa2f   :  { %v3129_v4 = vmax.f32 %v3113_v14, %v3121_v23  ;;  %v3122_v45 = vmax.f32 %v3053_v36, %v3085_v59  ;;  %v7124_v34 = vpop.f32.mrb[160].mxu0 }
 0xa30   :  { %v3132_v44 = vmax.f32 %v3116_v22, %v3124_v26  ;;  %v2902_v47 = vadd.f32 %v7124_v34, %v6110_v2  ;;  %v2863_v19 = vpop.f32.mrb[161].mxu0 }
 0xa31   :  { %v3130_v49 = vmax.f32 %v3114_v57, %v3122_v45  ;;  %v2900_v27 = vadd.f32 %v6110_v2, %v2863_v19  ;;  %v7125_v51 = vpop.f32.mrb[162].mxu0 }
 0xa32   :  { %v3139_v33 = vadd.f32 %v3131_v40, %v2902_v47  ;;  %v2903_v62 = vadd.f32 %v7125_v51, %v6110_v2  ;;  %v2866_v16 = vpop.f32.mrb[163].mxu0 }
 0xa33   :  { %v3137_v12 = vadd.f32 %v3129_v4, %v2900_v27  ;;  %v2901_v11 = vadd.f32 %v6110_v2, %v2866_v16  ;;  %v7164_v50 = vpop.f32.mrb[172].mxu1 }
 0xa34   :  { %v3140_v35 = vadd.f32 %v3132_v44, %v2903_v62  ;;  %v3127_v3 = vmax.f32 %v7156_v10, %v7164_v50  ;;  %v3098_v15 = vpop.f32.mrb[173].mxu1 }
 0xa35   :  { %v3138_v24 = vadd.f32 %v3130_v49, %v2901_v11  ;;  %v3125_v42 = vmax.f32 %v3066_v41, %v3098_v15  ;;  %v7165_v14 = vpop.f32.mrb[174].mxu1 }
 0xa36   :  { %v3135_v36 = vmax.f32 %v3119_v8, %v3127_v3  ;;  %v3128_v23 = vmax.f32 %v7157_v31, %v7165_v14  ;;  %v3101_v22 = vpop.f32.mrb[175].mxu1  ;;  %v3146_v39 = vpack.c.bf16 %v3140_v35, %v3139_v33 }
 0xa37   :  { %v3133_v26 = vmax.f32 %v3117_v52, %v3125_v42  ;;  %v3126_v57 = vmax.f32 %v3069_v13, %v3101_v22  ;;  %v7128_v59 = vpop.f32.mrb[164].mxu0  ;;  %v3145_v45 = vpack.c.bf16 %v3138_v24, %v3137_v12 }
 0xa38   :  { %v3136_v40 = vmax.f32 %v3120_v43, %v3128_v23  ;;  %v2906_v34 = vadd.f32 %v7128_v59, %v6110_v2  ;;  %3155 = vrot.lane.b32.xlu1 %v3146_v39, %s7673_s29  ;;  %v2879_v4 = vpop.f32.mrb[165].mxu0 }
 0xa39   :  { %v3134_v47 = vmax.f32 %v3118_v32, %v3126_v57  ;;  %v2904_v44 = vadd.f32 %v6110_v2, %v2879_v4  ;;  %3153 = vrot.lane.b32.xlu0 %v3145_v45, %s7673_s29  ;;  %v7129_v10 = vpop.f32.mrb[166].mxu0 }
 0xa3a   :  { %v3143_v41 = vadd.f32 %v3135_v36, %v2906_v34  ;;  %v2907_v19 = vadd.f32 %v7129_v10, %v6110_v2  ;;  %v2882_v3 = vpop.f32.mrb[167].mxu0 }
 0xa3b   :  { %v3141_v8 = vadd.f32 %v3133_v26, %v2904_v44  ;;  %v2905_v31 = vadd.f32 %v6110_v2, %v2882_v3 }
 0xa3c   :  { %v3144_v35 = vadd.f32 %v3136_v40, %v2907_v19 }
 0xa3d   :  { %v3142_v52 = vadd.f32 %v3134_v47, %v2905_v31 }
 0xa3e   :  { %v3148_v13 = vpack.c.bf16 %v3144_v35, %v3143_v41 }
 0xa3f   :  { %v3147_v49 = vpack.c.bf16 %v3142_v52, %v3141_v8 }
 0xa40   :  { %3159 = vrot.lane.b32.xlu1 %v3148_v13, %s7673_s29 }
 0xa41   :  { %3157 = vrot.lane.b32.xlu0 %v3147_v49, %s7673_s29  ;;  %v8791_v49 = vld [vmem:[%s9597_s1 + $0x10] sm:$0xff]  }
 0xaaa   :  { %v3156_v43 = vpop.permute.xlu1 %3155 }
 0xaab   :  { %v3154_v27 = vpop.permute.xlu0 %3153  ;;  %v3164_v51 = vsel %vm1713_vm5, %v8651_v46, %v3156_v43  ;;  %v7605_v46 = vld [vmem:[%s9598_s3 + $0x10] sm:$0xff]   ;;  %v8798_v43 = vld [vmem:[%s9597_s1 + $0x18] sm:$0xff]  }
 0xaac   :  { %v3162_v32 = vsel %vm1713_vm5, %v8647_v0, %v3154_v27  ;;  %v8712_v0 = vld [vmem:[%s9597_s1] sm:$0xff]   ;;  %7252 = vmatprep.subr.bf16.mxu1 %v7605_v46 }
 0xaad   :  { %7172 = vmatprep.mubr.msk.bf16.mxu0 %vm2088_vm6, %v3162_v32  ;;  %7253 = vmatpush3.bf16.msra.mxu1 %v7605_v46  ;;  %v8805_v27 = vld [vmem:[%s9597_s1 + $0x20] sm:$0xff]   ;;  %v8812_v32 = vld [vmem:[%s9597_s1 + $0x28] sm:$0xff]   ;;  %v8854_v46 = vld [vmem:[%s9597_s1 + $0x58] sm:$0xff]  }
 0xaae   :  { %7173 = vmatmul.mubr.msk.bf16.vlgmr.msra.gmra.mrb[168].mxu0 %vm2088_vm6, %v3164_v51  ;;  %v8819_v51 = vld [vmem:[%s9597_s1 + $0x30] sm:$0xff]  }
 0xab2   :  { %v3160_v2 = vpop.permute.xlu1 %3159 }
 0xab3   :  { %v3158_v33 = vpop.permute.xlu0 %3157  ;;  %v3168_v16 = vsel %vm1713_vm5, %v8669_v58, %v3160_v2  ;;  %v6143_v58 = vld [vmem:[%s9599_s8 + $0x6] ss:$0 sm:$0xff]  ;;  %v8826_v2 = vld [vmem:[%s9597_s1 + $0x38] sm:$0xff]  }
 0xab4   :  { %v3166_v62 = vsel %vm1713_vm5, %v8665_v38, %v3158_v33  ;;  %v6050_v38 = vld [vmem:[%s9599_s8 + $0x3] ss:$0 sm:$0xff] }
 0xab5   :  { %7176 = vmatprep.mubr.msk.bf16.mxu0 %vm2088_vm6, %v3166_v62  ;;  %v2170_v11 = vadd.f32 %v8427_v5, %v6050_v38  ;;  %v2168_v24 = vadd.f32 %v6050_v38, %v8429_v30  ;;  %v2171_v36 = vadd.f32 %v8431_v6, %v6050_v38  ;;  %v2169_v26 = vadd.f32 %v6050_v38, %v8433_v21  ;;  %v8833_v33 = vld [vmem:[%s9597_s1 + $0x40] sm:$0xff]   ;;  %v8840_v62 = vld [vmem:[%s9597_s1 + $0x48] sm:$0xff]  }
 0xab6   :  { %7177 = vmatmul.mubr.msk.bf16.gmra.mrb[172].mxu0 %vm2088_vm6, %v3168_v16  ;;  %v2174_v6 = vadd.f32 %v8435_v29, %v6050_v38  ;;  %v2172_v47 = vadd.f32 %v6050_v38, %v8437_v18  ;;  %v2175_v41 = vadd.f32 %v8439_v37, %v6050_v38  ;;  %v2173_v18 = vadd.f32 %v6050_v38, %v8441_v63  ;;  %v8784_v63 = vld [vmem:[%s9597_s1 + $0x8] sm:$0xff]   ;;  %v8847_v16 = vld [vmem:[%s9597_s1 + $0x50] sm:$0xff]   ;;  %v8861_v38 = vld [vmem:[%s9597_s1 + $0x60] sm:$0xff]  }
 0xab7   :  { %7188 = vmatprep.mubr.msk.bf16.mxu0 %vm364_vm3, %v8712_v0 }
 0xb81   :  { %v7174_v12 = vpop.f32.mrb[168].mxu0 }
 0xb82   :  { %v3277_v50 = vadd.f32 %v7174_v12, %v6143_v58  ;;  %v3238_v15 = vpop.f32.mrb[169].mxu0  ;;  %v8875_v12 = vld [vmem:[%s9597_s1 + $0x70] sm:$0xff]  }
 0xb83   :  { %v3275_v42 = vadd.f32 %v6143_v58, %v3238_v15  ;;  %v7175_v14 = vpop.f32.mrb[170].mxu0 }
 0xb84   :  { %v8728_v23 = vmax.f32 %v2170_v11, %v3277_v50  ;;  %v3278_v22 = vadd.f32 %v7175_v14, %v6143_v58  ;;  %v3241_v39 = vpop.f32.mrb[171].mxu0  ;;  %v8882_v11 = vld [vmem:[%s9597_s1 + $0x78] sm:$0xff]  }
 0xb85   :  { %v8731_v57 = vmax.f32 %v2168_v24, %v3275_v42  ;;  %v3276_v59 = vadd.f32 %v6143_v58, %v3241_v39 }
 0xb86   :  { %9685 = vst [vmem:[#allocation3_spill] sm:$0xff] %v8728_v23  ;;  %v8733_v45 = vmax.f32 %v2171_v36, %v3278_v22 }
 0xb87   :  { %9686 = vst [vmem:[#allocation2_spill] sm:$0xff] %v8731_v57  ;;  %v8735_v5 = vmax.f32 %v2169_v26, %v3276_v59 }
 0xb88   :  { %9687 = vst [vmem:[#allocation7_spill] sm:$0xff] %v8733_v45  ;;  %v8744_v34 = vpack.c.bf16 %v8733_v45, %v8728_v23 }
 0xb89   :  { %9688 = vst [vmem:[#allocation5_spill] sm:$0xff] %v8735_v5  ;;  %v8739_v30 = vpack.c.bf16 %v8735_v5, %v8731_v57  ;;  %v7178_v40 = vpop.f32.mrb[172].mxu0 }
 0xb8a   :  { %v3281_v4 = vadd.f32 %v7178_v40, %v6143_v58  ;;  %v3254_v21 = vpop.f32.mrb[173].mxu0 }
 0xb8b   :  { %v3279_v44 = vadd.f32 %v6143_v58, %v3254_v21  ;;  %v7179_v10 = vpop.f32.mrb[174].mxu0  ;;  %7180 = vmatprep.subr.bf16.mxu0 %v8739_v30  ;;  %7254 = vmatprep.mubr.msk.bf16.mxu1 %vm1071_vm4, %v8739_v30 }
 0xb8c   :  { %v8751_v19 = vmax.f32 %v2174_v6, %v3281_v4  ;;  %v3282_v29 = vadd.f32 %v7179_v10, %v6143_v58  ;;  %v3257_v3 = vpop.f32.mrb[175].mxu0  ;;  %7181 = vmatpush3.bf16.msra.mxu0 %v8739_v30  ;;  %7255 = vmatmul.mubr.msk.bf16.vlgmr.msra.gmra.mrb[176].mxu1 %vm1071_vm4, %v8744_v34 }
 0xb8d   :  { %v8757_v8 = vmax.f32 %v2172_v47, %v3279_v44  ;;  %v3280_v31 = vadd.f32 %v6143_v58, %v3257_v3  ;;  %7182 = vmatprep.subr.bf16.mxu0 %v8744_v34  ;;  %v8868_v58 = vld [vmem:[%s9597_s1 + $0x68] sm:$0xff]  }
 0xb8e   :  { %9689 = vst [vmem:[#allocation9_spill] sm:$0xff] %v8751_v19  ;;  %v8760_v35 = vmax.f32 %v2175_v41, %v3282_v29 }
 0xb8f   :  { %9690 = vst [vmem:[#allocation8_spill] sm:$0xff] %v8757_v8  ;;  %v8762_v52 = vmax.f32 %v2173_v18, %v3280_v31 }
 0xb90   :  { %9691 = vst [vmem:[#allocation11_spill] sm:$0xff] %v8760_v35  ;;  %7183 = vmatpush3.bf16.msra.mxu0 %v8744_v34  ;;  %v8771_v13 = vpack.c.bf16 %v8760_v35, %v8751_v19 }
 0xb91   :  { %9692 = vst [vmem:[#allocation10_spill] sm:$0xff] %v8762_v52  ;;  %v8767_v37 = vpack.c.bf16 %v8762_v52, %v8757_v8 }
 0xb93   :  { %7184 = vmatprep.subr.bf16.mxu0 %v8767_v37  ;;  %7258 = vmatprep.mubr.msk.bf16.mxu1 %vm1071_vm4, %v8767_v37 }
 0xb94   :  { %7185 = vmatpush3.bf16.msra.mxu0 %v8767_v37  ;;  %7259 = vmatmul.mubr.msk.bf16.gmra.mrb[180].mxu1 %vm1071_vm4, %v8771_v13 }
 0xb95   :  { %7186 = vmatprep.subr.bf16.mxu0 %v8771_v13 }
 0xb98   :  { %7187 = vmatpush3.bf16.msra.mxu0 %v8771_v13 }
 0xb9b   :  { %7189 = vmatmul.mubr.msk.bf16.vlgmr.msra.gmra.mrb[176].mxu0 %vm364_vm3, %v8784_v63 }
 0xb9c   :  { %7192 = vmatprep.mubr.msk.bf16.mxu0 %vm364_vm3, %v8791_v49 }
 0xba3   :  { %7193 = vmatmul.mubr.msk.bf16.gmra.mrb[180].mxu0 %vm364_vm3, %v8798_v43 }
 0xba4   :  { %7196 = vmatprep.mubr.msk.bf16.mxu0 %vm364_vm3, %v8805_v27 }
 0xbab   :  { %7197 = vmatmul.mubr.msk.bf16.gmra.mrb[184].mxu0 %vm364_vm3, %v8812_v32 }
 0xbac   :  { %7200 = vmatprep.mubr.msk.bf16.mxu0 %vm364_vm3, %v8819_v51 }
 0xbb3   :  { %7201 = vmatmul.mubr.msk.bf16.gmra.mrb[188].mxu0 %vm364_vm3, %v8826_v2 }
 0xbb4   :  { %7204 = vmatprep.mubr.msk.bf16.mxu0 %vm364_vm3, %v8833_v33 }
 0xbbb   :  { %7205 = vmatmul.mubr.msk.bf16.gmra.mrb[192].mxu0 %vm364_vm3, %v8840_v62 }
 0xbbc   :  { %7208 = vmatprep.mubr.msk.bf16.mxu0 %vm364_vm3, %v8847_v16 }
 0xbc3   :  { %7209 = vmatmul.mubr.msk.bf16.gmra.mrb[196].mxu0 %vm364_vm3, %v8854_v46 }
 0xbc4   :  { %7212 = vmatprep.mubr.msk.bf16.mxu0 %vm364_vm3, %v8861_v38 }
 0xbcb   :  { %7213 = vmatmul.mubr.msk.bf16.gmra.mrb[200].mxu0 %vm364_vm3, %v8868_v58 }
 0xbcc   :  { %7216 = vmatprep.mubr.msk.bf16.mxu0 %vm364_vm3, %v8875_v12 }
 0xbd3   :  { %7217 = vmatmul.mubr.msk.bf16.gmra.mrb[204].mxu0 %vm364_vm3, %v8882_v11 }
 0xbd4   :  { %7220 = vmatprep.mubr.msk.bf16.mxu0 %vm364_vm3, %v8423_v1  ;;  %v7606_v1 = vld [vmem:[%s9600_s5 + $0x10] sm:$0xff]  }
 0xbd5   :  { %7262 = vmatprep.subr.bf16.mxu1 %v7606_v1 }
 0xbd6   :  { %7263 = vmatpush3.bf16.msra.mxu1 %v7606_v1 }
 0xbdb   :  { %7221 = vmatmul.mubr.msk.bf16.gmra.mrb[208].mxu0 %vm364_vm3, %v8465_v53  ;;  %v9693_v53 = vld [vmem:[#allocation6_spill] sm:$0xff] }
 0xbdc   :  { %7224 = vmatprep.mubr.msk.bf16.mxu0 %vm364_vm3, %v8472_v60  ;;  %v9694_v60 = vld [vmem:[#allocation4_spill] sm:$0xff] }
 0xbe3   :  { %7225 = vmatmul.mubr.msk.bf16.gmra.mrb[212].mxu0 %vm364_vm3, %v8479_v17 }
 0xbe4   :  { %7228 = vmatprep.mubr.msk.bf16.mxu0 %vm364_vm3, %v8486_v56 }
 0xbeb   :  { %7229 = vmatmul.mubr.msk.bf16.gmra.mrb[216].mxu0 %vm364_vm3, %v8493_v61 }
 0xbec   :  { %7232 = vmatprep.mubr.msk.bf16.mxu0 %vm364_vm3, %v8500_v7 }
 0xbf3   :  { %7233 = vmatmul.mubr.msk.bf16.gmra.mrb[220].mxu0 %vm364_vm3, %v8507_v9 }
 0xbf4   :  { %7236 = vmatprep.mubr.msk.bf16.mxu0 %vm364_vm3, %v8514_v28 }
 0xbfb   :  { %7237 = vmatmul.mubr.msk.bf16.gmra.mrb[224].mxu0 %vm364_vm3, %v8521_v20 }
 0xbfc   :  { %7240 = vmatprep.mubr.msk.bf16.mxu0 %vm364_vm3, %v8528_v25 }
 0xc03   :  { %7241 = vmatmul.mubr.msk.bf16.gmra.mrb[228].mxu0 %vm364_vm3, %v8535_v48 }
 0xc04   :  { %7244 = vmatprep.mubr.msk.bf16.mxu0 %vm364_vm3, %v8542_v54 }
 0xc0b   :  { %7245 = vmatmul.mubr.msk.bf16.gmra.mrb[232].mxu0 %vm364_vm3, %v8549_v55 }
 0xc0c   :  { %7248 = vmatprep.mubr.msk.bf16.mxu0 %vm364_vm3, %v9693_v53 }
 0xc13   :  { %7249 = vmatmul.mubr.msk.bf16.gmra.mrb[236].mxu0 %vm364_vm3, %v9694_v60 }
 0xc5f   :  { %v8921_v17 = vpop.f32.mrb[176].mxu1 }
 0xc60   :  { %v8923_v56 = vpop.f32.mrb[177].mxu1 }
 0xc61   :  { %v8925_v61 = vpop.f32.mrb[178].mxu1 }
 0xc62   :  { %v8927_v7 = vpop.f32.mrb[179].mxu1 }
 0xc67   :  { %v8929_v9 = vpop.f32.mrb[180].mxu1 }
 0xc68   :  { %v8931_v28 = vpop.f32.mrb[181].mxu1 }
 0xc69   :  { %v8933_v20 = vpop.f32.mrb[182].mxu1 }
 0xc6a   :  { %v8935_v25 = vpop.f32.mrb[183].mxu1 }
 0xc6e   :  { %v7190_v48 = vpop.f32.mrb[176].mxu0 }
 0xc6f   :  { %v3337_v54 = vpop.f32.mrb[177].mxu0 }
 0xc70   :  { %v7191_v55 = vpop.f32.mrb[178].mxu0 }
 0xc71   :  { %v8937_v50 = vpack.c.bf16 %v7191_v55, %v7190_v48  ;;  %v3340_v15 = vpop.f32.mrb[179].mxu0 }
 0xc72   :  { %v8939_v24 = vpack.c.bf16 %v3340_v15, %v3337_v54 }
 0xc74   :  { %7264 = vmatprep.mubr.msk.bf16.mxu1 %vm1071_vm4, %v8939_v24 }
 0xc75   :  { %7265 = vmatmul.mubr.msk.bf16.vlgmr.msra.gmra.mrb[184].mxu1 %vm1071_vm4, %v8937_v50 }
 0xc76   :  { %v7194_v42 = vpop.f32.mrb[180].mxu0 }
 0xc77   :  { %v3353_v14 = vpop.f32.mrb[181].mxu0 }
 0xc78   :  { %v7195_v36 = vpop.f32.mrb[182].mxu0 }
 0xc79   :  { %v8945_v22 = vpack.c.bf16 %v7195_v36, %v7194_v42  ;;  %v3356_v39 = vpop.f32.mrb[183].mxu0 }
 0xc7a   :  { %v8947_v26 = vpack.c.bf16 %v3356_v39, %v3353_v14 }
 0xc7b   :  { %9695 = vst [vmem:[#allocation13_spill] sm:$0xff] %v8945_v22 }
 0xc7c   :  { %9696 = vst [vmem:[#allocation12_spill] sm:$0xff] %v8947_v26  ;;  %7268 = vmatprep.mubr.msk.bf16.mxu1 %vm1071_vm4, %v8947_v26 }
 0xc7d   :  { %7269 = vmatmul.mubr.msk.bf16.gmra.mrb[188].mxu1 %vm1071_vm4, %v8945_v22 }
 0xc7e   :  { %v7198_v59 = vpop.f32.mrb[184].mxu0 }
 0xc7f   :  { %v3369_v40 = vpop.f32.mrb[185].mxu0 }
 0xc80   :  { %v7199_v6 = vpop.f32.mrb[186].mxu0 }
 0xc81   :  { %v8953_v4 = vpack.c.bf16 %v7199_v6, %v7198_v59  ;;  %v3372_v21 = vpop.f32.mrb[187].mxu0 }
 0xc82   :  { %v8955_v47 = vpack.c.bf16 %v3372_v21, %v3369_v40 }
 0xc83   :  { %9697 = vst [vmem:[#allocation15_spill] sm:$0xff] %v8953_v4 }
 0xc84   :  { %9698 = vst [vmem:[#allocation14_spill] sm:$0xff] %v8955_v47  ;;  %7272 = vmatprep.mubr.msk.bf16.mxu1 %vm1071_vm4, %v8955_v47 }
 0xc85   :  { %7273 = vmatmul.mubr.msk.bf16.gmra.mrb[192].mxu1 %vm1071_vm4, %v8953_v4 }
 0xc86   :  { %v7202_v44 = vpop.f32.mrb[188].mxu0 }
 0xc87   :  { %v3385_v10 = vpop.f32.mrb[189].mxu0 }
 0xc88   :  { %v7203_v41 = vpop.f32.mrb[190].mxu0 }
 0xc89   :  { %v8961_v29 = vpack.c.bf16 %v7203_v41, %v7202_v44  ;;  %v3388_v3 = vpop.f32.mrb[191].mxu0 }
 0xc8a   :  { %v8963_v18 = vpack.c.bf16 %v3388_v3, %v3385_v10 }
 0xc8b   :  { %9699 = vst [vmem:[#allocation16_spill] sm:$0xff] %v8961_v29 }
 0xc8c   :  { %9700 = vst [vmem:[#allocation18_spill] sm:$0xff] %v8963_v18  ;;  %7276 = vmatprep.mubr.msk.bf16.mxu1 %vm1071_vm4, %v8963_v18 }
 0xc8d   :  { %7277 = vmatmul.mubr.msk.bf16.gmra.mrb[196].mxu1 %vm1071_vm4, %v8961_v29 }
 0xc8e   :  { %v7206_v31 = vpop.f32.mrb[192].mxu0 }
 0xc8f   :  { %v3401_v1 = vpop.f32.mrb[193].mxu0 }
 0xc90   :  { %v7207_v53 = vpop.f32.mrb[194].mxu0 }
 0xc91   :  { %v8969_v60 = vpack.c.bf16 %v7207_v53, %v7206_v31  ;;  %v3404_v48 = vpop.f32.mrb[195].mxu0 }
 0xc92   :  { %v8971_v54 = vpack.c.bf16 %v3404_v48, %v3401_v1 }
 0xc93   :  { %9701 = vst [vmem:[#allocation17_spill] sm:$0xff] %v8969_v60 }
 0xc94   :  { %9702 = vst [vmem:[#allocation6_spill] sm:$0xff] %v8971_v54  ;;  %7280 = vmatprep.mubr.msk.bf16.mxu1 %vm1071_vm4, %v8971_v54 }
 0xc95   :  { %7281 = vmatmul.mubr.msk.bf16.gmra.mrb[200].mxu1 %vm1071_vm4, %v8969_v60 }
 0xc96   :  { %v7210_v55 = vpop.f32.mrb[196].mxu0 }
 0xc97   :  { %v3417_v15 = vpop.f32.mrb[197].mxu0 }
 0xc98   :  { %v7211_v42 = vpop.f32.mrb[198].mxu0 }
 0xc99   :  { %v8977_v14 = vpack.c.bf16 %v7211_v42, %v7210_v55  ;;  %v3420_v36 = vpop.f32.mrb[199].mxu0 }
 0xc9a   :  { %v8979_v39 = vpack.c.bf16 %v3420_v36, %v3417_v15 }
 0xc9b   :  { %9703 = vst [vmem:[#allocation4_spill] sm:$0xff] %v8977_v14 }
 0xc9c   :  { %9704 = vst [vmem:[#allocation19_spill] sm:$0xff] %v8979_v39  ;;  %7284 = vmatprep.mubr.msk.bf16.mxu1 %vm1071_vm4, %v8979_v39 }
 0xc9d   :  { %7285 = vmatmul.mubr.msk.bf16.gmra.mrb[204].mxu1 %vm1071_vm4, %v8977_v14 }
 0xc9e   :  { %v7214_v59 = vpop.f32.mrb[200].mxu0 }
 0xc9f   :  { %v3433_v40 = vpop.f32.mrb[201].mxu0 }
 0xca0   :  { %v7215_v6 = vpop.f32.mrb[202].mxu0 }
 0xca1   :  { %v8985_v21 = vpack.c.bf16 %v7215_v6, %v7214_v59  ;;  %v3436_v44 = vpop.f32.mrb[203].mxu0  ;;  %v7607_v59 = vld [vmem:[%s9601_s4 + $0x20] sm:$0xff]  }
 0xca2   :  { %v8987_v10 = vpack.c.bf16 %v3436_v44, %v3433_v40  ;;  %v7608_v40 = vld [vmem:[%s9601_s4 + $0x28] sm:$0xff]   ;;  %7336 = vmatprep.subr.bf16.mxu0 %v7607_v59 }
 0xca3   :  { %9705 = vst [vmem:[#allocation20_spill] sm:$0xff] %v8985_v21  ;;  %7337 = vmatpush3.bf16.msra.mxu0 %v7607_v59 }
 0xca4   :  { %9706 = vst [vmem:[#allocation21_spill] sm:$0xff] %v8987_v10  ;;  %7288 = vmatprep.mubr.msk.bf16.mxu1 %vm1071_vm4, %v8987_v10  ;;  %7338 = vmatprep.subr.bf16.mxu0 %v7608_v40 }
 0xca5   :  { %7289 = vmatmul.mubr.msk.bf16.gmra.mrb[208].mxu1 %vm1071_vm4, %v8985_v21 }
 0xca6   :  { %v7218_v41 = vpop.f32.mrb[204].mxu0 }
 0xca7   :  { %v3449_v3 = vpop.f32.mrb[205].mxu0  ;;  %7339 = vmatpush3.bf16.msra.mxu0 %v7608_v40 }
 0xca8   :  { %v7219_v31 = vpop.f32.mrb[206].mxu0 }
 0xca9   :  { %v8993_v1 = vpack.c.bf16 %v7219_v31, %v7218_v41  ;;  %v3452_v53 = vpop.f32.mrb[207].mxu0 }
 0xcaa   :  { %v8995_v48 = vpack.c.bf16 %v3452_v53, %v3449_v3 }
 0xcab   :  { %9707 = vst [vmem:[#allocation22_spill] sm:$0xff] %v8993_v1 }
 0xcac   :  { %9708 = vst [vmem:[#allocation23_spill] sm:$0xff] %v8995_v48  ;;  %7292 = vmatprep.mubr.msk.bf16.mxu1 %vm1071_vm4, %v8995_v48 }
 0xcad   :  { %7293 = vmatmul.mubr.msk.bf16.gmra.mrb[212].mxu1 %vm1071_vm4, %v8993_v1 }
 0xcae   :  { %7304 = vmatprep.mubr.msk.bf16.mxu1 %vm364_vm3, %v8712_v0 }
 0xd48   :  { %v7266_v55 = vpop.f32.mrb[184].mxu1 }
 0xd49   :  { %v3817_v15 = vpop.f32.mrb[185].mxu1 }
 0xd4a   :  { %v7267_v42 = vpop.f32.mrb[186].mxu1 }
 0xd4b   :  { %v3820_v36 = vpop.f32.mrb[187].mxu1 }
 0xd50   :  { %v7270_v6 = vpop.f32.mrb[188].mxu1 }
 0xd51   :  { %v9009_v44 = vpop.f32.mrb[189].mxu1 }
 0xd52   :  { %v9011_v41 = vpop.f32.mrb[190].mxu1 }
 0xd53   :  { %v9013_v0 = vpop.f32.mrb[191].mxu1 }
 0xd58   :  { %v7274_v3 = vpop.f32.mrb[192].mxu1 }
 0xd59   :  { %v3946_v31 = vmax.f32 %v7266_v55, %v7274_v3  ;;  %v3849_v53 = vpop.f32.mrb[193].mxu1 }
 0xd5a   :  { %v3944_v52 = vmax.f32 %v3817_v15, %v3849_v53  ;;  %v7275_v35 = vpop.f32.mrb[194].mxu1 }
 0xd5b   :  { %v3947_v8 = vmax.f32 %v7267_v42, %v7275_v35  ;;  %v3852_v19 = vpop.f32.mrb[195].mxu1 }
 0xd5c   :  { %v3945_v5 = vmax.f32 %v3820_v36, %v3852_v19 }
 0xd60   :  { %v7278_v45 = vpop.f32.mrb[196].mxu1 }
 0xd61   :  { %v3950_v57 = vmax.f32 %v7270_v6, %v7278_v45  ;;  %v3865_v59 = vpop.f32.mrb[197].mxu1  ;;  %v6186_v45 = vld [vmem:[%s9599_s8 + $0x7] ss:$0 sm:$0xff] }
 0xd62   :  { %v3948_v23 = vmax.f32 %v9009_v44, %v3865_v59  ;;  %v7279_v1 = vpop.f32.mrb[198].mxu1  ;;  %v3721_v39 = vadd.f32 %v6186_v45, %v8923_v56  ;;  %v3724_v29 = vadd.f32 %v8925_v61, %v6186_v45  ;;  %v3722_v47 = vadd.f32 %v6186_v45, %v8927_v7 }
 0xd63   :  { %v3951_v48 = vmax.f32 %v9011_v41, %v7279_v1  ;;  %v3868_v21 = vpop.f32.mrb[199].mxu1  ;;  %v3723_v41 = vadd.f32 %v8921_v17, %v6186_v45  ;;  %v3725_v61 = vadd.f32 %v6186_v45, %v8931_v28 }
 0xd64   :  { %v3949_v10 = vmax.f32 %v9013_v0, %v3868_v21 }
 0xd68   :  { %v7282_v40 = vpop.f32.mrb[200].mxu1 }
 0xd69   :  { %v3881_v14 = vpop.f32.mrb[201].mxu1 }
 0xd6a   :  { %v7283_v55 = vpop.f32.mrb[202].mxu1 }
 0xd6b   :  { %v3884_v3 = vpop.f32.mrb[203].mxu1 }
 0xd70   :  { %v7286_v15 = vpop.f32.mrb[204].mxu1 }
 0xd71   :  { %v3897_v53 = vpop.f32.mrb[205].mxu1 }
 0xd72   :  { %v7287_v35 = vpop.f32.mrb[206].mxu1 }
 0xd73   :  { %v3900_v42 = vpop.f32.mrb[207].mxu1 }
 0xd78   :  { %v7290_v19 = vpop.f32.mrb[208].mxu1 }
 0xd79   :  { %v3954_v36 = vmax.f32 %v7282_v40, %v7290_v19  ;;  %v3913_v6 = vpop.f32.mrb[209].mxu1 }
 0xd7a   :  { %v3952_v44 = vmax.f32 %v3881_v14, %v3913_v6  ;;  %v7291_v1 = vpop.f32.mrb[210].mxu1 }
 0xd7b   :  { %v3962_v21 = vmax.f32 %v3946_v31, %v3954_v36  ;;  %v3955_v0 = vmax.f32 %v7283_v55, %v7291_v1  ;;  %v3916_v59 = vpop.f32.mrb[211].mxu1 }
 0xd7c   :  { %v3960_v60 = vmax.f32 %v3944_v52, %v3952_v44  ;;  %v3953_v54 = vmax.f32 %v3884_v3, %v3916_v59  ;;  %v3727_v52 = vadd.f32 %v8929_v9, %v6186_v45 }
 0xd7d   :  { %v3970_v18 = vadd.f32 %v3962_v21, %v3723_v41  ;;  %v3963_v4 = vmax.f32 %v3947_v8, %v3955_v0 }
 0xd7e   :  { %v3968_v22 = vadd.f32 %v3960_v60, %v3721_v39  ;;  %v3961_v40 = vmax.f32 %v3945_v5, %v3953_v54 }
 0xd7f   :  { %v3971_v19 = vadd.f32 %v3963_v4, %v3724_v29  ;;  %v3728_v4 = vadd.f32 %v8933_v20, %v6186_v45 }
 0xd80   :  { %v3969_v14 = vadd.f32 %v3961_v40, %v3722_v47  ;;  %v7294_v6 = vpop.f32.mrb[212].mxu1 }
 0xd81   :  { %v3958_v26 = vmax.f32 %v7286_v15, %v7294_v6  ;;  %v3929_v17 = vpop.f32.mrb[213].mxu1  ;;  %v3977_v31 = vpack.c.bf16 %v3971_v19, %v3970_v18 }
 0xd82   :  { %v3956_v55 = vmax.f32 %v3897_v53, %v3929_v17  ;;  %v7295_v36 = vpop.f32.mrb[214].mxu1  ;;  %v3976_v1 = vpack.c.bf16 %v3969_v14, %v3968_v22  ;;  %v3726_v22 = vadd.f32 %v6186_v45, %v8935_v25 }
 0xd83   :  { %v3966_v56 = vmax.f32 %v3950_v57, %v3958_v26  ;;  %v3959_v3 = vmax.f32 %v7287_v35, %v7295_v36  ;;  %3986 = vrot.lane.b32.xlu1 %v3977_v31, %s7672_s13  ;;  %v3932_v8 = vpop.f32.mrb[215].mxu1 }
 0xd84   :  { %v3964_v7 = vmax.f32 %v3948_v23, %v3956_v55  ;;  %v3957_v5 = vmax.f32 %v3900_v42, %v3932_v8  ;;  %3984 = vrot.lane.b32.xlu0 %v3976_v1, %s7672_s13  ;;  %7296 = vmatprep.subr.bf16.mxu1 %v3976_v1 }
 0xd85   :  { %v3974_v47 = vadd.f32 %v3966_v56, %v3727_v52  ;;  %v3967_v29 = vmax.f32 %v3951_v48, %v3959_v3  ;;  %7297 = vmatpush3.bf16.msra.mxu1 %v3976_v1 }
 0xd86   :  { %v3972_v9 = vadd.f32 %v3964_v7, %v3725_v61  ;;  %v3965_v57 = vmax.f32 %v3949_v10, %v3957_v5  ;;  %7298 = vmatprep.subr.bf16.mxu1 %v3977_v31 }
 0xd87   :  { %v3975_v26 = vadd.f32 %v3967_v29, %v3728_v4 }
 0xd88   :  { %v3973_v18 = vadd.f32 %v3965_v57, %v3726_v22 }
 0xd89   :  { %7299 = vmatpush3.bf16.msra.mxu1 %v3977_v31  ;;  %v3979_v60 = vpack.c.bf16 %v3975_v26, %v3974_v47 }
 0xd8a   :  { %v3978_v28 = vpack.c.bf16 %v3973_v18, %v3972_v9 }
 0xd8b   :  { %3990 = vrot.lane.b32.xlu1 %v3979_v60, %s7672_s13 }
 0xd8c   :  { %3988 = vrot.lane.b32.xlu0 %v3978_v28, %s7672_s13  ;;  %7300 = vmatprep.subr.bf16.mxu1 %v3978_v28 }
 0xd8d   :  { %7301 = vmatpush3.bf16.msra.mxu1 %v3978_v28  ;;  %v7610_v28 = vld [vmem:[%s9602_s6 + $0x28] sm:$0xff]  }
 0xd8e   :  { %7302 = vmatprep.subr.bf16.mxu1 %v3979_v60 }
 0xd91   :  { %7303 = vmatpush3.bf16.msra.mxu1 %v3979_v60  ;;  %v7609_v60 = vld [vmem:[%s9602_s6 + $0x20] sm:$0xff]  }
 0xd92   :  { %7348 = vmatprep.subr.bf16.mxu0 %v7609_v60 }
 0xd94   :  { %7305 = vmatmul.mubr.msk.bf16.vlgmr.msra.gmra.mrb[216].mxu1 %vm364_vm3, %v8784_v63 }
 0xd95   :  { %7308 = vmatprep.mubr.msk.bf16.mxu1 %vm364_vm3, %v8791_v49 }
 0xd9c   :  { %7309 = vmatmul.mubr.msk.bf16.gmra.mrb[220].mxu1 %vm364_vm3, %v8798_v43 }
 0xd9d   :  { %7312 = vmatprep.mubr.msk.bf16.mxu1 %vm364_vm3, %v8805_v27 }
 0xda4   :  { %7313 = vmatmul.mubr.msk.bf16.gmra.mrb[224].mxu1 %vm364_vm3, %v8812_v32 }
 0xda5   :  { %7316 = vmatprep.mubr.msk.bf16.mxu1 %vm364_vm3, %v8819_v51 }
 0xdac   :  { %7317 = vmatmul.mubr.msk.bf16.gmra.mrb[228].mxu1 %vm364_vm3, %v8826_v2 }
 0xdad   :  { %7320 = vmatprep.mubr.msk.bf16.mxu1 %vm364_vm3, %v8833_v33  ;;  %v7222_v33 = vpop.f32.mrb[208].mxu0 }
 0xdb4   :  { %7321 = vmatmul.mubr.msk.bf16.gmra.mrb[232].mxu1 %vm364_vm3, %v8840_v62  ;;  %v3465_v62 = vpop.f32.mrb[209].mxu0 }
 0xdb5   :  { %7324 = vmatprep.mubr.msk.bf16.mxu1 %vm364_vm3, %v8847_v16  ;;  %v7223_v16 = vpop.f32.mrb[210].mxu0 }
 0xdbc   :  { %7325 = vmatmul.mubr.msk.bf16.gmra.mrb[236].mxu1 %vm364_vm3, %v8854_v46  ;;  %v9087_v46 = vpack.c.bf16 %v7223_v16, %v7222_v33 }
 0xdbd   :  { %7328 = vmatprep.mubr.msk.bf16.mxu1 %vm364_vm3, %v8861_v38  ;;  %v3468_v38 = vpop.f32.mrb[211].mxu0 }
 0xdc4   :  { %7329 = vmatmul.mubr.msk.bf16.gmra.mrb[240].mxu1 %vm364_vm3, %v8868_v58  ;;  %v9089_v58 = vpack.c.bf16 %v3468_v38, %v3465_v62 }
 0xdc5   :  { %7332 = vmatprep.mubr.msk.bf16.mxu1 %vm364_vm3, %v8875_v12  ;;  %v7226_v12 = vpop.f32.mrb[212].mxu0 }
 0xdcc   :  { %7333 = vmatmul.mubr.msk.bf16.gmra.mrb[244].mxu1 %vm364_vm3, %v8882_v11  ;;  %v3481_v11 = vpop.f32.mrb[213].mxu0 }
 0xdcd   :  { %v7227_v20 = vpop.f32.mrb[214].mxu0 }
 0xdce   :  { %v9091_v25 = vpack.c.bf16 %v7227_v20, %v7226_v12  ;;  %v3484_v54 = vpop.f32.mrb[215].mxu0 }
 0xdcf   :  { %v9093_v39 = vpack.c.bf16 %v3484_v54, %v3481_v11  ;;  %v7230_v10 = vpop.f32.mrb[216].mxu0 }
 0xdd0   :  { %v3497_v48 = vpop.f32.mrb[217].mxu0 }
 0xdd1   :  { %v7231_v15 = vpop.f32.mrb[218].mxu0 }
 0xdd2   :  { %v9095_v53 = vpack.c.bf16 %v7231_v15, %v7230_v10  ;;  %v3500_v35 = vpop.f32.mrb[219].mxu0 }
 0xdd3   :  { %v9097_v42 = vpack.c.bf16 %v3500_v35, %v3497_v48  ;;  %v7234_v45 = vpop.f32.mrb[220].mxu0 }
 0xdd4   :  { %v3513_v44 = vpop.f32.mrb[221].mxu0 }
 0xdd5   :  { %v7235_v41 = vpop.f32.mrb[222].mxu0 }
 0xdd6   :  { %v9099_v21 = vpack.c.bf16 %v7235_v41, %v7234_v45  ;;  %v3516_v0 = vpop.f32.mrb[223].mxu0 }
 0xdd7   :  { %v9101_v59 = vpack.c.bf16 %v3516_v0, %v3513_v44  ;;  %v7238_v40 = vpop.f32.mrb[224].mxu0 }
 0xdd8   :  { %v3529_v19 = vpop.f32.mrb[225].mxu0 }
 0xdd9   :  { %v7239_v14 = vpop.f32.mrb[226].mxu0 }
 0xdda   :  { %v9103_v6 = vpack.c.bf16 %v7239_v14, %v7238_v40  ;;  %v3532_v17 = vpop.f32.mrb[227].mxu0 }
 0xddb   :  { %v9105_v31 = vpack.c.bf16 %v3532_v17, %v3529_v19  ;;  %v7242_v55 = vpop.f32.mrb[228].mxu0 }
 0xddc   :  { %v3545_v36 = vpop.f32.mrb[229].mxu0 }
 0xddd   :  { %v7243_v1 = vpop.f32.mrb[230].mxu0 }
 0xdde   :  { %v9107_v52 = vpack.c.bf16 %v7243_v1, %v7242_v55  ;;  %v3548_v56 = vpop.f32.mrb[231].mxu0 }
 0xddf   :  { %v9109_v3 = vpack.c.bf16 %v3548_v56, %v3545_v36  ;;  %v7246_v8 = vpop.f32.mrb[232].mxu0 }
 0xde0   :  { %v3561_v61 = vpop.f32.mrb[233].mxu0 }
 0xde1   :  { %v7247_v7 = vpop.f32.mrb[234].mxu0 }
 0xde2   :  { %v9111_v5 = vpack.c.bf16 %v7247_v7, %v7246_v8  ;;  %v3564_v4 = vpop.f32.mrb[235].mxu0 }
 0xde3   :  { %v9113_v47 = vpack.c.bf16 %v3564_v4, %v3561_v61  ;;  %v7250_v29 = vpop.f32.mrb[236].mxu0 }
 0xde4   :  { %9709 = vst [vmem:[#allocation24_spill] sm:$0xff] %v9111_v5  ;;  %v3577_v22 = vpop.f32.mrb[237].mxu0 }
 0xde5   :  { %v7251_v9 = vpop.f32.mrb[238].mxu0 }
 0xde6   :  { %v9115_v57 = vpack.c.bf16 %v7251_v9, %v7250_v29  ;;  %v3580_v26 = vpop.f32.mrb[239].mxu0 }
 0xde7   :  { %v9117_v18 = vpack.c.bf16 %v3580_v26, %v3577_v22 }
 0xde8   :  { %9710 = vst [vmem:[#allocation25_spill] sm:$0xff] %v9115_v57 }
 0xde9   :  { %9711 = vst [vmem:[#allocation26_spill] sm:$0xff] %v9117_v18 }
 0xdf5   :  { %v3987_v23 = vpop.permute.xlu1 %3986 }
 0xdf6   :  { %v3985_v63 = vpop.permute.xlu0 %3984  ;;  %v9069_v43 = vsel %vm1071_vm4, %v8744_v34, %v3987_v23 }
 0xdf7   :  { %v9065_v49 = vsel %vm1071_vm4, %v8739_v30, %v3985_v63 }
 0xdf8   :  { %7340 = vmatprep.mubr.msk.bf16.mxu0 %vm1713_vm5, %v9065_v49 }
 0xdf9   :  { %7341 = vmatmul.mubr.msk.bf16.vlgmr.msra.gmra.mrb[240].mxu0 %vm1713_vm5, %v9069_v43 }
 0xdfa   :  { %7349 = vmatpush3.bf16.msra.mxu0 %v7609_v60 }
 0xdfb   :  { %7350 = vmatprep.subr.bf16.mxu0 %v7610_v28 }
 0xdfd   :  { %v3991_v27 = vpop.permute.xlu1 %3990 }
 0xdfe   :  { %v3989_v32 = vpop.permute.xlu0 %3988  ;;  %v9081_v2 = vsel %vm1071_vm4, %v8771_v13, %v3991_v27  ;;  %7351 = vmatpush3.bf16.msra.mxu0 %v7610_v28 }
 0xdff   :  { %v9077_v51 = vsel %vm1071_vm4, %v8767_v37, %v3989_v32 }
 0xe00   :  { %7344 = vmatprep.mubr.msk.bf16.mxu0 %vm1713_vm5, %v9077_v51 }
 0xe01   :  { %7345 = vmatmul.mubr.msk.bf16.gmra.mrb[244].mxu0 %vm1713_vm5, %v9081_v2 }
 0xe67   :  { %v7306_v23 = vpop.f32.mrb[216].mxu1 }
 0xe68   :  { %v4034_v63 = vpop.f32.mrb[217].mxu1 }
 0xe69   :  { %v7307_v27 = vpop.f32.mrb[218].mxu1 }
 0xe6a   :  { %v4162_v32 = vpack.c.bf16 %v7307_v27, %v7306_v23  ;;  %v4037_v33 = vpop.f32.mrb[219].mxu1 }
 0xe6b   :  { %v4161_v62 = vpack.c.bf16 %v4037_v33, %v4034_v63 }
 0xe6c   :  { %4195 = vrot.lane.b32.xlu1 %v4162_v32, %s7672_s13  ;;  %v7611_v32 = vld [vmem:[%s9600_s5 + $0x18] sm:$0xff]  }
 0xe6d   :  { %4193 = vrot.lane.b32.xlu0 %v4161_v62, %s7672_s13  ;;  %7408 = vmatprep.subr.bf16.mxu0 %v7611_v32 }
 0xe6f   :  { %v7310_v16 = vpop.f32.mrb[220].mxu1 }
 0xe70   :  { %v4050_v38 = vpop.f32.mrb[221].mxu1 }
 0xe71   :  { %v7311_v12 = vpop.f32.mrb[222].mxu1 }
 0xe72   :  { %v4164_v11 = vpack.c.bf16 %v7311_v12, %v7310_v16  ;;  %v4053_v20 = vpop.f32.mrb[223].mxu1 }
 0xe73   :  { %v4163_v54 = vpack.c.bf16 %v4053_v20, %v4050_v38 }
 0xe74   :  { %4199 = vrot.lane.b32.xlu1 %v4164_v11, %s7672_s13 }
 0xe75   :  { %4197 = vrot.lane.b32.xlu0 %v4163_v54, %s7672_s13 }
 0xe77   :  { %v7314_v10 = vpop.f32.mrb[224].mxu1 }
 0xe78   :  { %v4066_v48 = vpop.f32.mrb[225].mxu1 }
 0xe79   :  { %v7315_v15 = vpop.f32.mrb[226].mxu1 }
 0xe7a   :  { %v4166_v35 = vpack.c.bf16 %v7315_v15, %v7314_v10  ;;  %v4069_v45 = vpop.f32.mrb[227].mxu1 }
 0xe7b   :  { %v4165_v44 = vpack.c.bf16 %v4069_v45, %v4066_v48 }
 0xe7c   :  { %4203 = vrot.lane.b32.xlu1 %v4166_v35, %s7672_s13 }
 0xe7d   :  { %4201 = vrot.lane.b32.xlu0 %v4165_v44, %s7672_s13 }
 0xe7f   :  { %v7318_v41 = vpop.f32.mrb[228].mxu1 }
 0xe80   :  { %v4082_v0 = vpop.f32.mrb[229].mxu1 }
 0xe81   :  { %v7319_v40 = vpop.f32.mrb[230].mxu1 }
 0xe82   :  { %v4168_v19 = vpack.c.bf16 %v7319_v40, %v7318_v41  ;;  %v4085_v14 = vpop.f32.mrb[231].mxu1 }
 0xe83   :  { %v4167_v17 = vpack.c.bf16 %v4085_v14, %v4082_v0 }
 0xe84   :  { %4207 = vrot.lane.b32.xlu1 %v4168_v19, %s7672_s13 }
 0xe85   :  { %4205 = vrot.lane.b32.xlu0 %v4167_v17, %s7672_s13 }
 0xe87   :  { %v7322_v55 = vpop.f32.mrb[232].mxu1 }
 0xe88   :  { %v4098_v36 = vpop.f32.mrb[233].mxu1 }
 0xe89   :  { %v7323_v1 = vpop.f32.mrb[234].mxu1 }
 0xe8a   :  { %v4170_v56 = vpack.c.bf16 %v7323_v1, %v7322_v55  ;;  %v4101_v8 = vpop.f32.mrb[235].mxu1 }
 0xe8b   :  { %v4169_v61 = vpack.c.bf16 %v4101_v8, %v4098_v36  ;;  %v9712_v36 = vld [vmem:[#allocation12_spill] sm:$0xff] }
 0xe8c   :  { %4211 = vrot.lane.b32.xlu1 %v4170_v56, %s7672_s13  ;;  %v9713_v56 = vld [vmem:[#allocation13_spill] sm:$0xff] }
 0xe8d   :  { %4209 = vrot.lane.b32.xlu0 %v4169_v61, %s7672_s13 }
 0xe8f   :  { %v7326_v7 = vpop.f32.mrb[236].mxu1 }
 0xe90   :  { %v4114_v4 = vpop.f32.mrb[237].mxu1 }
 0xe91   :  { %v7327_v29 = vpop.f32.mrb[238].mxu1 }
 0xe92   :  { %v4172_v22 = vpack.c.bf16 %v7327_v29, %v7326_v7  ;;  %v4117_v9 = vpop.f32.mrb[239].mxu1 }
 0xe93   :  { %v4171_v26 = vpack.c.bf16 %v4117_v9, %v4114_v4  ;;  %v9715_v4 = vld [vmem:[#allocation15_spill] sm:$0xff] }
 0xe94   :  { %4215 = vrot.lane.b32.xlu1 %v4172_v22, %s7672_s13 }
 0xe95   :  { %4213 = vrot.lane.b32.xlu0 %v4171_v26, %s7672_s13  ;;  %v9716_v26 = vld [vmem:[#allocation18_spill] sm:$0xff] }
 0xe97   :  { %v7330_v60 = vpop.f32.mrb[240].mxu1 }
 0xe98   :  { %v4130_v28 = vpop.f32.mrb[241].mxu1 }
 0xe99   :  { %v7331_v23 = vpop.f32.mrb[242].mxu1 }
 0xe9a   :  { %v4174_v63 = vpack.c.bf16 %v7331_v23, %v7330_v60  ;;  %v4133_v27 = vpop.f32.mrb[243].mxu1 }
 0xe9b   :  { %v4173_v33 = vpack.c.bf16 %v4133_v27, %v4130_v28  ;;  %v9717_v28 = vld [vmem:[#allocation16_spill] sm:$0xff] }
 0xe9c   :  { %4219 = vrot.lane.b32.xlu1 %v4174_v63, %s7672_s13 }
 0xe9d   :  { %4217 = vrot.lane.b32.xlu0 %v4173_v33, %s7672_s13 }
 0xe9f   :  { %v7334_v62 = vpop.f32.mrb[244].mxu1 }
 0xea0   :  { %v4146_v16 = vpop.f32.mrb[245].mxu1 }
 0xea1   :  { %v7335_v38 = vpop.f32.mrb[246].mxu1 }
 0xea2   :  { %v4176_v12 = vpack.c.bf16 %v7335_v38, %v7334_v62  ;;  %v4149_v11 = vpop.f32.mrb[247].mxu1  ;;  %v9719_v62 = vld [vmem:[#allocation17_spill] sm:$0xff] }
 0xea3   :  { %v4175_v20 = vpack.c.bf16 %v4149_v11, %v4146_v16  ;;  %v9720_v11 = vld [vmem:[#allocation19_spill] sm:$0xff] }
 0xea4   :  { %4223 = vrot.lane.b32.xlu1 %v4176_v12, %s7672_s13 }
 0xea5   :  { %4221 = vrot.lane.b32.xlu0 %v4175_v20, %s7672_s13 }
 0xecc   :  { %v9144_v54 = vpop.f32.mrb[240].mxu0 }
 0xecd   :  { %v9146_v10 = vpop.f32.mrb[241].mxu0 }
 0xece   :  { %v9148_v48 = vpop.f32.mrb[242].mxu0 }
 0xecf   :  { %v9150_v15 = vpop.f32.mrb[243].mxu0 }
 0xed4   :  { %v9152_v35 = vpop.f32.mrb[244].mxu0 }
 0xed5   :  { %v9154_v45 = vpop.f32.mrb[245].mxu0 }
 0xed6   :  { %v9156_v44 = vpop.f32.mrb[246].mxu0 }
 0xed7   :  { %v9158_v41 = vpop.f32.mrb[247].mxu0 }
 0xede   :  { %v4196_v0 = vpop.permute.xlu1 %4195 }
 0xedf   :  { %v4194_v40 = vpop.permute.xlu0 %4193  ;;  %v4228_v14 = vsel %vm1071_vm4, %v8937_v50, %v4196_v0  ;;  %v9714_v50 = vld [vmem:[#allocation14_spill] sm:$0xff]  ;;  %v9721_v0 = vld [vmem:[#allocation4_spill] sm:$0xff] }
 0xee0   :  { %v4226_v19 = vsel %vm1071_vm4, %v8939_v24, %v4194_v40 }
 0xee1   :  { %7352 = vmatprep.mubr.msk.bf16.mxu0 %vm1713_vm5, %v4226_v19 }
 0xee2   :  { %7353 = vmatmul.mubr.msk.bf16.vlgmr.msra.gmra.mrb[248].mxu0 %vm1713_vm5, %v4228_v14 }
 0xee3   :  { %7409 = vmatpush3.bf16.msra.mxu0 %v7611_v32  ;;  %v9718_v32 = vld [vmem:[#allocation6_spill] sm:$0xff] }
 0xee6   :  { %v4200_v17 = vpop.permute.xlu1 %4199 }
 0xee7   :  { %v4198_v55 = vpop.permute.xlu0 %4197  ;;  %v4232_v8 = vsel %vm1071_vm4, %v9713_v56, %v4200_v17  ;;  %v9722_v17 = vld [vmem:[#allocation21_spill] sm:$0xff] }
 0xee8   :  { %v4230_v1 = vsel %vm1071_vm4, %v9712_v36, %v4198_v55  ;;  %v9723_v36 = vld [vmem:[#allocation20_spill] sm:$0xff] }
 0xee9   :  { %7356 = vmatprep.mubr.msk.bf16.mxu0 %vm1713_vm5, %v4230_v1 }
 0xeea   :  { %7357 = vmatmul.mubr.msk.bf16.gmra.mrb[252].mxu0 %vm1713_vm5, %v4232_v8 }
 0xeee   :  { %v4204_v24 = vpop.permute.xlu1 %4203 }
 0xeef   :  { %v4202_v61 = vpop.permute.xlu0 %4201  ;;  %v4236_v29 = vsel %vm1071_vm4, %v9715_v4, %v4204_v24  ;;  %v9724_v24 = vld [vmem:[#allocation23_spill] sm:$0xff]  ;;  %v7612_v4 = vld [vmem:[%s9603_s7 + $0x30] sm:$0xff]  }
 0xef0   :  { %v4234_v7 = vsel %vm1071_vm4, %v9714_v50, %v4202_v61  ;;  %v9725_v50 = vld [vmem:[#allocation22_spill] sm:$0xff]  ;;  %7384 = vmatprep.subr.bf16.mxu1 %v7612_v4 }
 0xef1   :  { %7360 = vmatprep.mubr.msk.bf16.mxu0 %vm1713_vm5, %v4234_v7  ;;  %7385 = vmatpush3.bf16.msra.mxu1 %v7612_v4 }
 0xef2   :  { %7361 = vmatmul.mubr.msk.bf16.gmra.mrb[0].mxu0 %vm1713_vm5, %v4236_v29  ;;  %v7613_v29 = vld [vmem:[%s9603_s7 + $0x38] sm:$0xff]  }
 0xef3   :  { %7386 = vmatprep.subr.bf16.mxu1 %v7613_v29 }
 0xef5   :  { %7387 = vmatpush3.bf16.msra.mxu1 %v7613_v29 }
 0xef6   :  { %v4208_v22 = vpop.permute.xlu1 %4207 }
 0xef7   :  { %v4206_v9 = vpop.permute.xlu0 %4205  ;;  %v4240_v23 = vsel %vm1071_vm4, %v9717_v28, %v4208_v22  ;;  %v7614_v22 = vld [vmem:[%s9603_s7 + $0x40] sm:$0xff]  }
 0xef8   :  { %v4238_v60 = vsel %vm1071_vm4, %v9716_v26, %v4206_v9  ;;  %7388 = vmatprep.subr.bf16.mxu1 %v7614_v22 }
 0xef9   :  { %7364 = vmatprep.mubr.msk.bf16.mxu0 %vm1713_vm5, %v4238_v60  ;;  %7389 = vmatpush3.bf16.msra.mxu1 %v7614_v22 }
 0xefa   :  { %7365 = vmatmul.mubr.msk.bf16.gmra.mrb[4].mxu0 %vm1713_vm5, %v4240_v23 }
 0xefe   :  { %v4212_v63 = vpop.permute.xlu1 %4211 }
 0xeff   :  { %v4210_v27 = vpop.permute.xlu0 %4209  ;;  %v4244_v16 = vsel %vm1071_vm4, %v9719_v62, %v4212_v63 }
 0xf00   :  { %v4242_v33 = vsel %vm1071_vm4, %v9718_v32, %v4210_v27 }
 0xf01   :  { %7368 = vmatprep.mubr.msk.bf16.mxu0 %vm1713_vm5, %v4242_v33 }
 0xf02   :  { %7369 = vmatmul.mubr.msk.bf16.gmra.mrb[8].mxu0 %vm1713_vm5, %v4244_v16 }
 0xf06   :  { %v4216_v38 = vpop.permute.xlu1 %4215 }
 0xf07   :  { %v4214_v12 = vpop.permute.xlu0 %4213  ;;  %v4248_v40 = vsel %vm1071_vm4, %v9721_v0, %v4216_v38 }
 0xf08   :  { %v4246_v20 = vsel %vm1071_vm4, %v9720_v11, %v4214_v12 }
 0xf09   :  { %7372 = vmatprep.mubr.msk.bf16.mxu0 %vm1713_vm5, %v4246_v20 }
 0xf0a   :  { %7373 = vmatmul.mubr.msk.bf16.gmra.mrb[12].mxu0 %vm1713_vm5, %v4248_v40 }
 0xf0e   :  { %v4220_v19 = vpop.permute.xlu1 %4219 }
 0xf0f   :  { %v4218_v14 = vpop.permute.xlu0 %4217  ;;  %v4252_v1 = vsel %vm1071_vm4, %v9723_v36, %v4220_v19 }
 0xf10   :  { %v4250_v55 = vsel %vm1071_vm4, %v9722_v17, %v4218_v14 }
 0xf11   :  { %7376 = vmatprep.mubr.msk.bf16.mxu0 %vm1713_vm5, %v4250_v55 }
 0xf12   :  { %7377 = vmatmul.mubr.msk.bf16.gmra.mrb[16].mxu0 %vm1713_vm5, %v4252_v1 }
 0xf16   :  { %v4224_v56 = vpop.permute.xlu1 %4223 }
 0xf17   :  { %v4222_v8 = vpop.permute.xlu0 %4221  ;;  %v4256_v7 = vsel %vm1071_vm4, %v9725_v50, %v4224_v56 }
 0xf18   :  { %v4254_v61 = vsel %vm1071_vm4, %v9724_v24, %v4222_v8 }
 0xf19   :  { %7380 = vmatprep.mubr.msk.bf16.mxu0 %vm1713_vm5, %v4254_v61 }
 0xf1a   :  { %7381 = vmatmul.mubr.msk.bf16.gmra.mrb[20].mxu0 %vm1713_vm5, %v4256_v7 }
 0xf1b   :  { %7410 = vmatprep.mubr.msk.bf16.mxu0 %vm1071_vm4, %v9089_v58 }
 0xf22   :  { %7411 = vmatmul.mubr.msk.bf16.vlgmr.msra.gmra.mrb[24].mxu0 %vm1071_vm4, %v9087_v46 }
 0xf23   :  { %7414 = vmatprep.mubr.msk.bf16.mxu0 %vm1071_vm4, %v9093_v39 }
 0xf2a   :  { %7415 = vmatmul.mubr.msk.bf16.gmra.mrb[28].mxu0 %vm1071_vm4, %v9091_v25 }
 0xf2b   :  { %7418 = vmatprep.mubr.msk.bf16.mxu0 %vm1071_vm4, %v9097_v42 }
 0xf32   :  { %7419 = vmatmul.mubr.msk.bf16.gmra.mrb[32].mxu0 %vm1071_vm4, %v9095_v53 }
 0xf33   :  { %7422 = vmatprep.mubr.msk.bf16.mxu0 %vm1071_vm4, %v9101_v59 }
 0xf3a   :  { %7423 = vmatmul.mubr.msk.bf16.gmra.mrb[36].mxu0 %vm1071_vm4, %v9099_v21 }
 0xf3b   :  { %7426 = vmatprep.mubr.msk.bf16.mxu0 %vm1071_vm4, %v9105_v31 }
 0xf42   :  { %7427 = vmatmul.mubr.msk.bf16.gmra.mrb[40].mxu0 %vm1071_vm4, %v9103_v6 }
 0xf43   :  { %7430 = vmatprep.mubr.msk.bf16.mxu0 %vm1071_vm4, %v9109_v3 }
 0xf4a   :  { %7431 = vmatmul.mubr.msk.bf16.gmra.mrb[44].mxu0 %vm1071_vm4, %v9107_v52 }
 0xf4b   :  { %7434 = vmatprep.mubr.msk.bf16.mxu0 %vm1071_vm4, %v9113_v47 }
 0xf52   :  { %7435 = vmatmul.mubr.msk.bf16.gmra.mrb[48].mxu0 %vm1071_vm4, %v9111_v5 }
 0xf53   :  { %7438 = vmatprep.mubr.msk.bf16.mxu0 %vm1071_vm4, %v9117_v18 }
 0xf5a   :  { %7439 = vmatmul.mubr.msk.bf16.gmra.mrb[52].mxu0 %vm1071_vm4, %v9115_v57 }
 0xfb5   :  { %v7354_v9 = vpop.f32.mrb[248].mxu0 }
 0xfb6   :  { %v4446_v26 = vpop.f32.mrb[249].mxu0 }
 0xfb7   :  { %v7355_v60 = vpop.f32.mrb[250].mxu0 }
 0xfb8   :  { %v4449_v28 = vpop.f32.mrb[251].mxu0 }
 0xfbd   :  { %v7358_v23 = vpop.f32.mrb[252].mxu0 }
 0xfbe   :  { %v9249_v63 = vpop.f32.mrb[253].mxu0 }
 0xfbf   :  { %v9251_v27 = vpop.f32.mrb[254].mxu0 }
 0xfc0   :  { %v9253_v32 = vpop.f32.mrb[255].mxu0 }
 0xfc5   :  { %v7362_v33 = vpop.f32.mrb[0].mxu0 }
 0xfc6   :  { %v4575_v62 = vmax.f32 %v7354_v9, %v7362_v33  ;;  %v4478_v16 = vpop.f32.mrb[1].mxu0  ;;  %v6235_v9 = vld [vmem:[%s9599_s8 + $0x8] ss:$0 sm:$0xff] }
 0xfc7   :  { %v4573_v38 = vmax.f32 %v4446_v26, %v4478_v16  ;;  %v7363_v12 = vpop.f32.mrb[2].mxu0  ;;  %v4361_v57 = vadd.f32 %v6235_v9, %v9150_v15 }
 0xfc8   :  { %v4576_v11 = vmax.f32 %v7355_v60, %v7363_v12  ;;  %v4481_v20 = vpop.f32.mrb[3].mxu0  ;;  %v4360_v12 = vadd.f32 %v6235_v9, %v9146_v10  ;;  %v9268_v10 = vld [vmem:[%s9598_s3 + $0x18] sm:$0xff]  }
 0xfc9   :  { %v4574_v0 = vmax.f32 %v4449_v28, %v4481_v20  ;;  %7398 = vmatprep.subr.bf16.mxu1 %v9268_v10 }
 0xfcd   :  { %v7366_v40 = vpop.f32.mrb[4].mxu0 }
 0xfce   :  { %v4579_v19 = vmax.f32 %v7358_v23, %v7366_v40  ;;  %v4494_v14 = vpop.f32.mrb[5].mxu0 }
 0xfcf   :  { %v4577_v17 = vmax.f32 %v9249_v63, %v4494_v14  ;;  %v7367_v55 = vpop.f32.mrb[6].mxu0  ;;  %v4363_v14 = vadd.f32 %v9148_v48, %v6235_v9  ;;  %v4366_v48 = vadd.f32 %v9152_v35, %v6235_v9 }
 0xfd0   :  { %v4580_v36 = vmax.f32 %v9251_v27, %v7367_v55  ;;  %v4497_v1 = vpop.f32.mrb[7].mxu0  ;;  %v4362_v27 = vadd.f32 %v9144_v54, %v6235_v9 }
 0xfd1   :  { %v4578_v56 = vmax.f32 %v9253_v32, %v4497_v1 }
 0xfd5   :  { %v7370_v8 = vpop.f32.mrb[8].mxu0 }
 0xfd6   :  { %v4510_v24 = vpop.f32.mrb[9].mxu0 }
 0xfd7   :  { %v7371_v61 = vpop.f32.mrb[10].mxu0 }
 0xfd8   :  { %v4513_v50 = vpop.f32.mrb[11].mxu0 }
 0xfdd   :  { %v7374_v7 = vpop.f32.mrb[12].mxu0 }
 0xfde   :  { %v4526_v4 = vpop.f32.mrb[13].mxu0 }
 0xfdf   :  { %v7375_v29 = vpop.f32.mrb[14].mxu0 }
 0xfe0   :  { %v4529_v22 = vpop.f32.mrb[15].mxu0 }
 0xfe5   :  { %v7378_v26 = vpop.f32.mrb[16].mxu0 }
 0xfe6   :  { %v4583_v60 = vmax.f32 %v7370_v8, %v7378_v26  ;;  %v4542_v28 = vpop.f32.mrb[17].mxu0 }
 0xfe7   :  { %v4581_v23 = vmax.f32 %v4510_v24, %v4542_v28  ;;  %v7379_v63 = vpop.f32.mrb[18].mxu0 }
 0xfe8   :  { %v4591_v32 = vmax.f32 %v4575_v62, %v4583_v60  ;;  %v4584_v33 = vmax.f32 %v7371_v61, %v7379_v63  ;;  %v4545_v16 = vpop.f32.mrb[19].mxu0 }
 0xfe9   :  { %v4589_v20 = vmax.f32 %v4573_v38, %v4581_v23  ;;  %v4582_v40 = vmax.f32 %v4513_v50, %v4545_v16  ;;  %v4365_v23 = vadd.f32 %v6235_v9, %v9158_v41 }
 0xfea   :  { %v4599_v55 = vadd.f32 %v4591_v32, %v4362_v27  ;;  %v4592_v1 = vmax.f32 %v4576_v11, %v4584_v33 }
 0xfeb   :  { %v4597_v18 = vadd.f32 %v4589_v20, %v4360_v12  ;;  %v4590_v8 = vmax.f32 %v4574_v0, %v4582_v40 }
 0xfec   :  { %v4600_v26 = vadd.f32 %v4592_v1, %v4363_v14 }
 0xfed   :  { %v4598_v24 = vadd.f32 %v4590_v8, %v4361_v57  ;;  %v7382_v28 = vpop.f32.mrb[20].mxu0  ;;  %v4364_v57 = vadd.f32 %v6235_v9, %v9154_v45 }
 0xfee   :  { %v4587_v5 = vmax.f32 %v7374_v7, %v7382_v28  ;;  %v4558_v54 = vpop.f32.mrb[21].mxu0  ;;  %v4606_v62 = vpack.c.bf16 %v4600_v26, %v4599_v55 }
 0xfef   :  { %v4585_v61 = vmax.f32 %v4526_v4, %v4558_v54  ;;  %v7383_v60 = vpop.f32.mrb[22].mxu0  ;;  %v4605_v63 = vpack.c.bf16 %v4598_v24, %v4597_v18  ;;  %v4367_v18 = vadd.f32 %v9156_v44, %v6235_v9 }
 0xff0   :  { %v4595_v38 = vmax.f32 %v4579_v19, %v4587_v5  ;;  %v4588_v15 = vmax.f32 %v7375_v29, %v7383_v60  ;;  %4615 = vrot.lane.b32.xlu1 %v4606_v62, %s7673_s29  ;;  %v4561_v11 = vpop.f32.mrb[23].mxu0 }
 0xff1   :  { %v4593_v0 = vmax.f32 %v4577_v17, %v4585_v61  ;;  %v4586_v50 = vmax.f32 %v4529_v22, %v4561_v11  ;;  %4613 = vrot.lane.b32.xlu0 %v4605_v63, %s7673_s29 }
 0xff2   :  { %v4603_v7 = vadd.f32 %v4595_v38, %v4366_v48  ;;  %v4596_v4 = vmax.f32 %v4580_v36, %v4588_v15 }
 0xff3   :  { %v4601_v35 = vadd.f32 %v4593_v0, %v4364_v57  ;;  %v4594_v5 = vmax.f32 %v4578_v56, %v4586_v50 }
 0xff4   :  { %v4604_v19 = vadd.f32 %v4596_v4, %v4367_v18 }
 0xff5   :  { %v4602_v29 = vadd.f32 %v4594_v5, %v4365_v23  ;;  %v7412_v27 = vpop.f32.mrb[24].mxu0 }
 0xff6   :  { %v4608_v32 = vpack.c.bf16 %v4604_v19, %v4603_v7  ;;  %v4924_v33 = vpop.f32.mrb[25].mxu0 }
 0xff7   :  { %v4607_v45 = vpack.c.bf16 %v4602_v29, %v4601_v35  ;;  %v7413_v17 = vpop.f32.mrb[26].mxu0 }
 0xff8   :  { %4619 = vrot.lane.b32.xlu1 %v4608_v32, %s7673_s29  ;;  %v4927_v22 = vpop.f32.mrb[27].mxu0 }
 0xff9   :  { %4617 = vrot.lane.b32.xlu0 %v4607_v45, %s7673_s29 }
 0xffd   :  { %v7416_v16 = vpop.f32.mrb[28].mxu0 }
 0xffe   :  { %v4940_v44 = vpop.f32.mrb[29].mxu0 }
 0xfff   :  { %v7417_v12 = vpop.f32.mrb[30].mxu0 }
0x1000   :  { %v4943_v36 = vpop.f32.mrb[31].mxu0 }
0x1005   :  { %v7420_v20 = vpop.f32.mrb[32].mxu0 }
0x1006   :  { %v5053_v41 = vmax.f32 %v7412_v27, %v7420_v20  ;;  %v4956_v9 = vpop.f32.mrb[33].mxu0 }
0x1007   :  { %v5051_v56 = vmax.f32 %v4924_v33, %v4956_v9  ;;  %v7421_v40 = vpop.f32.mrb[34].mxu0 }
0x1008   :  { %v5054_v14 = vmax.f32 %v7413_v17, %v7421_v40  ;;  %v4959_v55 = vpop.f32.mrb[35].mxu0 }
0x1009   :  { %v5052_v1 = vmax.f32 %v4927_v22, %v4959_v55 }
0x100d   :  { %v7424_v8 = vpop.f32.mrb[36].mxu0 }
0x100e   :  { %v5057_v26 = vmax.f32 %v7416_v16, %v7424_v8  ;;  %v4972_v24 = vpop.f32.mrb[37].mxu0 }
0x100f   :  { %v5055_v28 = vmax.f32 %v4940_v44, %v4972_v24  ;;  %v7425_v54 = vpop.f32.mrb[38].mxu0 }
0x1010   :  { %v5058_v62 = vmax.f32 %v7417_v12, %v7425_v54  ;;  %v4975_v61 = vpop.f32.mrb[39].mxu0 }
0x1011   :  { %v5056_v60 = vmax.f32 %v4943_v36, %v4975_v61 }
0x1015   :  { %v7428_v63 = vpop.f32.mrb[40].mxu0 }
0x1016   :  { %v4988_v48 = vpop.f32.mrb[41].mxu0 }
0x1017   :  { %v7429_v38 = vpop.f32.mrb[42].mxu0 }
0x1018   :  { %v4991_v15 = vpop.f32.mrb[43].mxu0 }
0x101d   :  { %v7432_v11 = vpop.f32.mrb[44].mxu0 }
0x101e   :  { %v5004_v57 = vpop.f32.mrb[45].mxu0 }
0x101f   :  { %v7433_v0 = vpop.f32.mrb[46].mxu0 }
0x1020   :  { %v5007_v50 = vpop.f32.mrb[47].mxu0 }
0x1025   :  { %v7436_v18 = vpop.f32.mrb[48].mxu0 }
0x1026   :  { %v5061_v7 = vmax.f32 %v7428_v63, %v7436_v18  ;;  %v5020_v4 = vpop.f32.mrb[49].mxu0 }
0x1027   :  { %v5059_v23 = vmax.f32 %v4988_v48, %v5020_v4  ;;  %v7437_v35 = vpop.f32.mrb[50].mxu0 }
0x1028   :  { %v5069_v5 = vmax.f32 %v5053_v41, %v5061_v7  ;;  %v5062_v19 = vmax.f32 %v7429_v38, %v7437_v35  ;;  %v5023_v29 = vpop.f32.mrb[51].mxu0  ;;  %v6279_v38 = vld [vmem:[%s9599_s8 + $0xa] ss:$0 sm:$0xff] }
0x1029   :  { %v5067_v27 = vmax.f32 %v5051_v56, %v5059_v23  ;;  %v5060_v32 = vmax.f32 %v4991_v15, %v5023_v29 }
0x102a   :  { %v5070_v33 = vmax.f32 %v5054_v14, %v5062_v19 }
0x102b   :  { %v5068_v45 = vmax.f32 %v5052_v1, %v5060_v32 }
0x102d   :  { %v7440_v17 = vpop.f32.mrb[52].mxu0 }
0x102e   :  { %v5065_v22 = vmax.f32 %v7432_v11, %v7440_v17  ;;  %v5036_v16 = vpop.f32.mrb[53].mxu0 }
0x102f   :  { %v5063_v44 = vmax.f32 %v5004_v57, %v5036_v16  ;;  %v7441_v12 = vpop.f32.mrb[54].mxu0 }
0x1030   :  { %v5073_v36 = vmax.f32 %v5057_v26, %v5065_v22  ;;  %v5066_v20 = vmax.f32 %v7433_v0, %v7441_v12  ;;  %v5039_v9 = vpop.f32.mrb[55].mxu0 }
0x1031   :  { %v5071_v40 = vmax.f32 %v5055_v28, %v5063_v44  ;;  %v5064_v55 = vmax.f32 %v5007_v50, %v5039_v9 }
0x1032   :  { %v5074_v8 = vmax.f32 %v5058_v62, %v5066_v20 }
0x1033   :  { %v5072_v24 = vmax.f32 %v5056_v60, %v5064_v55 }
0x1062   :  { %v4616_v54 = vpop.permute.xlu1 %4615 }
0x1063   :  { %v4614_v41 = vpop.permute.xlu0 %4613  ;;  %v4624_v14 = vsel %vm1713_vm5, %v9069_v43, %v4616_v54 }
0x1064   :  { %v4622_v56 = vsel %vm1713_vm5, %v9065_v49, %v4614_v41  ;;  %v7655_v49 = vld [vmem:[%s9597_s1 + $0x80] sm:$0xff]  }
0x1065   :  { %7390 = vmatprep.mubr.msk.bf16.mxu1 %vm2088_vm6, %v4622_v56 }
0x1066   :  { %7391 = vmatmul.mubr.msk.bf16.vlgmr.msra.gmra.mrb[248].mxu1 %vm2088_vm6, %v4624_v14  ;;  %v7660_v14 = vld [vmem:[%s9597_s1 + $0xa8] sm:$0xff]  }
0x1067   :  { %7399 = vmatpush3.bf16.msra.mxu1 %v9268_v10 }
0x106a   :  { %v4620_v1 = vpop.permute.xlu1 %4619 }
0x106b   :  { %v4618_v26 = vpop.permute.xlu0 %4617  ;;  %v4628_v62 = vsel %vm1713_vm5, %v9081_v2, %v4620_v1  ;;  %v7661_v1 = vld [vmem:[%s9597_s1 + $0xb0] sm:$0xff]  }
0x106c   :  { %v4626_v28 = vsel %vm1713_vm5, %v9077_v51, %v4618_v26  ;;  %v7662_v26 = vld [vmem:[%s9597_s1 + $0xb8] sm:$0xff]  }
0x106d   :  { %7394 = vmatprep.mubr.msk.bf16.mxu1 %vm2088_vm6, %v4626_v28  ;;  %v7663_v28 = vld [vmem:[%s9597_s1 + $0xc0] sm:$0xff]  }
0x106e   :  { %7395 = vmatmul.mubr.msk.bf16.gmra.mrb[252].mxu1 %vm2088_vm6, %v4628_v62  ;;  %v7664_v62 = vld [vmem:[%s9597_s1 + $0xc8] sm:$0xff]  }
0x106f   :  { %7400 = vmatprep.mubr.msk.bf16.mxu1 %vm1071_vm4, %v8739_v30 }
0x1076   :  { %7401 = vmatmul.mubr.msk.bf16.vlgmr.msra.gmra.mrb[0].mxu1 %vm1071_vm4, %v8744_v34 }
0x1077   :  { %7404 = vmatprep.mubr.msk.bf16.mxu1 %vm1071_vm4, %v8767_v37 }
0x107e   :  { %7405 = vmatmul.mubr.msk.bf16.gmra.mrb[4].mxu1 %vm1071_vm4, %v8771_v13 }
0x107f   :  { %7450 = vmatprep.mubr.msk.bf16.mxu1 %vm364_vm3, %v7655_v49  ;;  %v7665_v49 = vld [vmem:[%s9597_s1 + $0xd0] sm:$0xff]  }
0x1139   :  { %v9304_v43 = vpop.f32.mrb[248].mxu1 }
0x113a   :  { %v9306_v51 = vpop.f32.mrb[249].mxu1 }
0x113b   :  { %v9308_v2 = vpop.f32.mrb[250].mxu1 }
0x113c   :  { %v9310_v10 = vpop.f32.mrb[251].mxu1 }
0x1141   :  { %v9312_v61 = vpop.f32.mrb[252].mxu1 }
0x1142   :  { %v9314_v60 = vpop.f32.mrb[253].mxu1 }
0x1143   :  { %v9316_v63 = vpop.f32.mrb[254].mxu1 }
0x1144   :  { %v9318_v48 = vpop.f32.mrb[255].mxu1 }
0x1149   :  { %v7402_v15 = vpop.f32.mrb[0].mxu1 }
0x114a   :  { %v4830_v11 = vadd.f32 %v7402_v15, %v6279_v38  ;;  %v4791_v57 = vpop.f32.mrb[1].mxu1  ;;  %v7667_v15 = vld [vmem:[%s9597_s1 + $0xe0] sm:$0xff]  }
0x114b   :  { %v4828_v0 = vadd.f32 %v6279_v38, %v4791_v57  ;;  %v7403_v50 = vpop.f32.mrb[2].mxu1  ;;  %v7669_v57 = vld [vmem:[%s9597_s1 + $0xf0] sm:$0xff]  }
0x114c   :  { %v5077_v18 = vadd.f32 %v5069_v5, %v4830_v11  ;;  %v4831_v7 = vadd.f32 %v7403_v50, %v6279_v38  ;;  %v4794_v4 = vpop.f32.mrb[3].mxu1  ;;  %v7668_v11 = vld [vmem:[%s9597_s1 + $0xe8] sm:$0xff]   ;;  %v7616_v50 = vld [vmem:[%s9602_s6 + $0x30] sm:$0xff]  }
0x114d   :  { %v5075_v23 = vadd.f32 %v5067_v27, %v4828_v0  ;;  %v4829_v35 = vadd.f32 %v6279_v38, %v4794_v4  ;;  %v7670_v0 = vld [vmem:[%s9597_s1 + $0xf8] sm:$0xff]  }
0x114e   :  { %v5078_v19 = vadd.f32 %v5070_v33, %v4831_v7 }
0x114f   :  { %v5076_v29 = vadd.f32 %v5068_v45, %v4829_v35 }
0x1150   :  { %v9323_v32 = vpack.c.bf16 %v5078_v19, %v5077_v18  ;;  %v7617_v18 = vld [vmem:[%s9602_s6 + $0x38] sm:$0xff]  }
0x1151   :  { %v7406_v17 = vpop.f32.mrb[4].mxu1  ;;  %v9325_v22 = vpack.c.bf16 %v5076_v29, %v5075_v23 }
0x1152   :  { %v4834_v16 = vadd.f32 %v7406_v17, %v6279_v38  ;;  %v4807_v44 = vpop.f32.mrb[5].mxu1 }
0x1153   :  { %v4832_v12 = vadd.f32 %v6279_v38, %v4807_v44  ;;  %v7407_v20 = vpop.f32.mrb[6].mxu1  ;;  %7442 = vmatprep.subr.bf16.mxu1 %v9325_v22 }
0x1154   :  { %v5081_v9 = vadd.f32 %v5073_v36, %v4834_v16  ;;  %v4835_v55 = vadd.f32 %v7407_v20, %v6279_v38  ;;  %v4810_v5 = vpop.f32.mrb[7].mxu1  ;;  %7443 = vmatpush3.bf16.msra.mxu1 %v9325_v22  ;;  %v7656_v36 = vld [vmem:[%s9597_s1 + $0x88] sm:$0xff]  }
0x1155   :  { %v5079_v27 = vadd.f32 %v5071_v40, %v4832_v12  ;;  %v4833_v54 = vadd.f32 %v6279_v38, %v4810_v5  ;;  %7444 = vmatprep.subr.bf16.mxu1 %v9323_v32  ;;  %v7657_v40 = vld [vmem:[%s9597_s1 + $0x90] sm:$0xff]   ;;  %v7666_v38 = vld [vmem:[%s9597_s1 + $0xd8] sm:$0xff]  }
0x1156   :  { %v5082_v33 = vadd.f32 %v5074_v8, %v4835_v55  ;;  %v7658_v8 = vld [vmem:[%s9597_s1 + $0x98] sm:$0xff]  }
0x1157   :  { %v5080_v45 = vadd.f32 %v5072_v24, %v4833_v54  ;;  %v7659_v24 = vld [vmem:[%s9597_s1 + $0xa0] sm:$0xff]  }
0x1158   :  { %7445 = vmatpush3.bf16.msra.mxu1 %v9323_v32  ;;  %v9331_v41 = vpack.c.bf16 %v5082_v33, %v5081_v9 }
0x1159   :  { %v9333_v56 = vpack.c.bf16 %v5080_v45, %v5079_v27 }
0x115b   :  { %7446 = vmatprep.subr.bf16.mxu1 %v9333_v56 }
0x115c   :  { %7447 = vmatpush3.bf16.msra.mxu1 %v9333_v56 }
0x115d   :  { %7448 = vmatprep.subr.bf16.mxu1 %v9331_v41 }
0x1160   :  { %7449 = vmatpush3.bf16.msra.mxu1 %v9331_v41 }
0x1161   :  { %7494 = vmatprep.subr.bf16.mxu1 %v7616_v50 }
0x1163   :  { %7451 = vmatmul.mubr.msk.bf16.vlgmr.msra.gmra.mrb[8].mxu1 %vm364_vm3, %v7656_v36 }
0x1164   :  { %7454 = vmatprep.mubr.msk.bf16.mxu1 %vm364_vm3, %v7657_v40  ;;  %7495 = vmatpush3.bf16.msra.mxu1 %v7616_v50  ;;  %v7619_v50 = vld [vmem:[%s9601_s4 + $0x38] sm:$0xff]  }
0x1165   :  { %7496 = vmatprep.subr.bf16.mxu1 %v7617_v18 }
0x1168   :  { %7497 = vmatpush3.bf16.msra.mxu1 %v7617_v18 }
0x116b   :  { %7455 = vmatmul.mubr.msk.bf16.gmra.mrb[12].mxu1 %vm364_vm3, %v7658_v8 }
0x116c   :  { %7458 = vmatprep.mubr.msk.bf16.mxu1 %vm364_vm3, %v7659_v24 }
0x1173   :  { %7459 = vmatmul.mubr.msk.bf16.gmra.mrb[16].mxu1 %vm364_vm3, %v7660_v14 }
0x1174   :  { %7462 = vmatprep.mubr.msk.bf16.mxu1 %vm364_vm3, %v7661_v1 }
0x117b   :  { %7463 = vmatmul.mubr.msk.bf16.gmra.mrb[20].mxu1 %vm364_vm3, %v7662_v26 }
0x117c   :  { %7466 = vmatprep.mubr.msk.bf16.mxu1 %vm364_vm3, %v7663_v28 }
0x1183   :  { %7467 = vmatmul.mubr.msk.bf16.gmra.mrb[24].mxu1 %vm364_vm3, %v7664_v62 }
0x1184   :  { %7470 = vmatprep.mubr.msk.bf16.mxu1 %vm364_vm3, %v7665_v49 }
0x118b   :  { %7471 = vmatmul.mubr.msk.bf16.gmra.mrb[28].mxu1 %vm364_vm3, %v7666_v38 }
0x118c   :  { %7474 = vmatprep.mubr.msk.bf16.mxu1 %vm364_vm3, %v7667_v15  ;;  %v7618_v15 = vld [vmem:[%s9601_s4 + $0x30] sm:$0xff]  }
0x118d   :  { %7482 = vmatprep.subr.bf16.mxu0 %v7618_v15 }
0x118e   :  { %7483 = vmatpush3.bf16.msra.mxu0 %v7618_v15 }
0x118f   :  { %7484 = vmatprep.subr.bf16.mxu0 %v7619_v50 }
0x1192   :  { %7485 = vmatpush3.bf16.msra.mxu0 %v7619_v50  ;;  %v9727_v50 = vld [vmem:[#allocation26_spill] sm:$0xff] }
0x1193   :  { %7475 = vmatmul.mubr.msk.bf16.gmra.mrb[32].mxu1 %vm364_vm3, %v7668_v11 }
0x1194   :  { %7478 = vmatprep.mubr.msk.bf16.mxu1 %vm364_vm3, %v7669_v57 }
0x119b   :  { %7479 = vmatmul.mubr.msk.bf16.gmra.mrb[36].mxu1 %vm364_vm3, %v7670_v0 }
0x1236   :  { %v7452_v7 = vpop.f32.mrb[8].mxu1 }
0x1237   :  { %v5141_v4 = vpop.f32.mrb[9].mxu1 }
0x1238   :  { %v7453_v23 = vpop.f32.mrb[10].mxu1 }
0x1239   :  { %v5269_v35 = vpack.c.bf16 %v7453_v23, %v7452_v7  ;;  %v5144_v19 = vpop.f32.mrb[11].mxu1 }
0x123a   :  { %v5268_v29 = vpack.c.bf16 %v5144_v19, %v5141_v4 }
0x123b   :  { %5302 = vrot.lane.b32.xlu1 %v5269_v35, %s7672_s13 }
0x123c   :  { %5300 = vrot.lane.b32.xlu0 %v5268_v29, %s7672_s13 }
0x123e   :  { %v7456_v17 = vpop.f32.mrb[12].mxu1 }
0x123f   :  { %v5157_v16 = vpop.f32.mrb[13].mxu1 }
0x1240   :  { %v7457_v44 = vpop.f32.mrb[14].mxu1 }
0x1241   :  { %v5271_v12 = vpack.c.bf16 %v7457_v44, %v7456_v17  ;;  %v5160_v20 = vpop.f32.mrb[15].mxu1 }
0x1242   :  { %v5270_v9 = vpack.c.bf16 %v5160_v20, %v5157_v16 }
0x1243   :  { %5306 = vrot.lane.b32.xlu1 %v5271_v12, %s7672_s13 }
0x1244   :  { %5304 = vrot.lane.b32.xlu0 %v5270_v9, %s7672_s13 }
0x1246   :  { %v7460_v55 = vpop.f32.mrb[16].mxu1 }
0x1247   :  { %v5173_v5 = vpop.f32.mrb[17].mxu1 }
0x1248   :  { %v7461_v27 = vpop.f32.mrb[18].mxu1 }
0x1249   :  { %v5273_v54 = vpack.c.bf16 %v7461_v27, %v7460_v55  ;;  %v5176_v33 = vpop.f32.mrb[19].mxu1 }
0x124a   :  { %v5272_v45 = vpack.c.bf16 %v5176_v33, %v5173_v5 }
0x124b   :  { %5310 = vrot.lane.b32.xlu1 %v5273_v54, %s7672_s13 }
0x124c   :  { %5308 = vrot.lane.b32.xlu0 %v5272_v45, %s7672_s13 }
0x124e   :  { %v7464_v36 = vpop.f32.mrb[20].mxu1 }
0x124f   :  { %v5189_v40 = vpop.f32.mrb[21].mxu1 }
0x1250   :  { %v7465_v8 = vpop.f32.mrb[22].mxu1 }
0x1251   :  { %v5275_v24 = vpack.c.bf16 %v7465_v8, %v7464_v36  ;;  %v5192_v14 = vpop.f32.mrb[23].mxu1 }
0x1252   :  { %v5274_v1 = vpack.c.bf16 %v5192_v14, %v5189_v40 }
0x1253   :  { %5314 = vrot.lane.b32.xlu1 %v5275_v24, %s7672_s13 }
0x1254   :  { %5312 = vrot.lane.b32.xlu0 %v5274_v1, %s7672_s13 }
0x1256   :  { %v7468_v26 = vpop.f32.mrb[24].mxu1 }
0x1257   :  { %v5205_v28 = vpop.f32.mrb[25].mxu1 }
0x1258   :  { %v7469_v62 = vpop.f32.mrb[26].mxu1 }
0x1259   :  { %v5277_v49 = vpack.c.bf16 %v7469_v62, %v7468_v26  ;;  %v5208_v38 = vpop.f32.mrb[27].mxu1 }
0x125a   :  { %v5276_v11 = vpack.c.bf16 %v5208_v38, %v5205_v28  ;;  %v9726_v38 = vld [vmem:[#allocation24_spill] sm:$0xff] }
0x125b   :  { %5318 = vrot.lane.b32.xlu1 %v5277_v49, %s7672_s13 }
0x125c   :  { %5316 = vrot.lane.b32.xlu0 %v5276_v11, %s7672_s13 }
0x125e   :  { %v7472_v57 = vpop.f32.mrb[28].mxu1 }
0x125f   :  { %v5221_v0 = vpop.f32.mrb[29].mxu1 }
0x1260   :  { %v7473_v18 = vpop.f32.mrb[30].mxu1 }
0x1261   :  { %v5279_v7 = vpack.c.bf16 %v7473_v18, %v7472_v57  ;;  %v5224_v4 = vpop.f32.mrb[31].mxu1 }
0x1262   :  { %v5278_v23 = vpack.c.bf16 %v5224_v4, %v5221_v0 }
0x1263   :  { %5322 = vrot.lane.b32.xlu1 %v5279_v7, %s7672_s13  ;;  %v9728_v7 = vld [vmem:[#allocation25_spill] sm:$0xff] }
0x1264   :  { %5320 = vrot.lane.b32.xlu0 %v5278_v23, %s7672_s13 }
0x1266   :  { %v7476_v35 = vpop.f32.mrb[32].mxu1 }
0x1267   :  { %v5237_v19 = vpop.f32.mrb[33].mxu1 }
0x1268   :  { %v7477_v29 = vpop.f32.mrb[34].mxu1 }
0x1269   :  { %v5281_v17 = vpack.c.bf16 %v7477_v29, %v7476_v35  ;;  %v5240_v16 = vpop.f32.mrb[35].mxu1  ;;  %v7621_v29 = vld [vmem:[%s9603_s7 + $0x50] sm:$0xff]  }
0x126a   :  { %v5280_v44 = vpack.c.bf16 %v5240_v16, %v5237_v19  ;;  %v7620_v19 = vld [vmem:[%s9603_s7 + $0x48] sm:$0xff]  }
0x126b   :  { %5326 = vrot.lane.b32.xlu1 %v5281_v17, %s7672_s13  ;;  %7530 = vmatprep.subr.bf16.mxu0 %v7620_v19 }
0x126c   :  { %5324 = vrot.lane.b32.xlu0 %v5280_v44, %s7672_s13 }
0x126e   :  { %v7480_v12 = vpop.f32.mrb[36].mxu1 }
0x126f   :  { %5093 = vrot.lane.b32.xlu1 %v9323_v32, %s7672_s13  ;;  %v5253_v20 = vpop.f32.mrb[37].mxu1 }
0x1270   :  { %5091 = vrot.lane.b32.xlu0 %v9325_v22, %s7672_s13  ;;  %v7481_v9 = vpop.f32.mrb[38].mxu1 }
0x1271   :  { %v5283_v55 = vpack.c.bf16 %v7481_v9, %v7480_v12  ;;  %v5256_v5 = vpop.f32.mrb[39].mxu1 }
0x1272   :  { %v5282_v27 = vpack.c.bf16 %v5256_v5, %v5253_v20 }
0x1273   :  { %5330 = vrot.lane.b32.xlu1 %v5283_v55, %s7672_s13 }
0x1274   :  { %5328 = vrot.lane.b32.xlu0 %v5282_v27, %s7672_s13 }
0x1277   :  { %5097 = vrot.lane.b32.xlu1 %v9331_v41, %s7672_s13 }
0x1278   :  { %5095 = vrot.lane.b32.xlu0 %v9333_v56, %s7672_s13 }
0x12ad   :  { %v5303_v54 = vpop.permute.xlu1 %5302 }
0x12ae   :  { %v5301_v32 = vpop.permute.xlu0 %5300  ;;  %v5335_v22 = vsel %vm1071_vm4, %v9087_v46, %v5303_v54 }
0x12af   :  { %v5333_v33 = vsel %vm1071_vm4, %v9089_v58, %v5301_v32 }
0x12b0   :  { %7498 = vmatprep.mubr.msk.bf16.mxu1 %vm1713_vm5, %v5333_v33 }
0x12b1   :  { %7499 = vmatmul.mubr.msk.bf16.vlgmr.msra.gmra.mrb[40].mxu1 %vm1713_vm5, %v5335_v22 }
0x12b5   :  { %v5307_v45 = vpop.permute.xlu1 %5306 }
0x12b6   :  { %v5305_v36 = vpop.permute.xlu0 %5304  ;;  %v5339_v56 = vsel %vm1071_vm4, %v9091_v25, %v5307_v45 }
0x12b7   :  { %v5337_v41 = vsel %vm1071_vm4, %v9093_v39, %v5305_v36 }
0x12b8   :  { %7502 = vmatprep.mubr.msk.bf16.mxu1 %vm1713_vm5, %v5337_v41 }
0x12b9   :  { %7503 = vmatmul.mubr.msk.bf16.gmra.mrb[44].mxu1 %vm1713_vm5, %v5339_v56 }
0x12bd   :  { %v5311_v58 = vpop.permute.xlu1 %5310 }
0x12be   :  { %v5309_v40 = vpop.permute.xlu0 %5308  ;;  %v5343_v8 = vsel %vm1071_vm4, %v9095_v53, %v5311_v58 }
0x12bf   :  { %v5341_v46 = vsel %vm1071_vm4, %v9097_v42, %v5309_v40 }
0x12c0   :  { %7506 = vmatprep.mubr.msk.bf16.mxu1 %vm1713_vm5, %v5341_v46 }
0x12c1   :  { %7507 = vmatmul.mubr.msk.bf16.gmra.mrb[48].mxu1 %vm1713_vm5, %v5343_v8 }
0x12c5   :  { %v5315_v39 = vpop.permute.xlu1 %5314 }
0x12c6   :  { %v5313_v24 = vpop.permute.xlu0 %5312  ;;  %v5347_v14 = vsel %vm1071_vm4, %v9099_v21, %v5315_v39 }
0x12c7   :  { %v5345_v25 = vsel %vm1071_vm4, %v9101_v59, %v5313_v24 }
0x12c8   :  { %7510 = vmatprep.mubr.msk.bf16.mxu1 %vm1713_vm5, %v5345_v25 }
0x12c9   :  { %7511 = vmatmul.mubr.msk.bf16.gmra.mrb[52].mxu1 %vm1713_vm5, %v5347_v14 }
0x12cd   :  { %v5319_v42 = vpop.permute.xlu1 %5318 }
0x12ce   :  { %v5317_v1 = vpop.permute.xlu0 %5316  ;;  %v5351_v26 = vsel %vm1071_vm4, %v9103_v6, %v5319_v42 }
0x12cf   :  { %v5349_v53 = vsel %vm1071_vm4, %v9105_v31, %v5317_v1 }
0x12d0   :  { %7514 = vmatprep.mubr.msk.bf16.mxu1 %vm1713_vm5, %v5349_v53 }
0x12d1   :  { %7515 = vmatmul.mubr.msk.bf16.gmra.mrb[56].mxu1 %vm1713_vm5, %v5351_v26 }
0x12d5   :  { %v5323_v59 = vpop.permute.xlu1 %5322 }
0x12d6   :  { %v5321_v28 = vpop.permute.xlu0 %5320  ;;  %v5355_v62 = vsel %vm1071_vm4, %v9107_v52, %v5323_v59 }
0x12d7   :  { %v5353_v21 = vsel %vm1071_vm4, %v9109_v3, %v5321_v28 }
0x12d8   :  { %7518 = vmatprep.mubr.msk.bf16.mxu1 %vm1713_vm5, %v5353_v21 }
0x12d9   :  { %7519 = vmatmul.mubr.msk.bf16.gmra.mrb[60].mxu1 %vm1713_vm5, %v5355_v62 }
0x12dd   :  { %v5327_v31 = vpop.permute.xlu1 %5326 }
0x12de   :  { %v5325_v49 = vpop.permute.xlu0 %5324  ;;  %v5359_v15 = vsel %vm1071_vm4, %v9726_v38, %v5327_v31  ;;  %v6328_v38 = vld [vmem:[%s9599_s8 + $0xb] ss:$0 sm:$0xff] }
0x12df   :  { %v5357_v6 = vsel %vm1071_vm4, %v9113_v47, %v5325_v49 }
0x12e0   :  { %7522 = vmatprep.mubr.msk.bf16.mxu1 %vm1713_vm5, %v5357_v6 }
0x12e1   :  { %v5094_v11 = vpop.permute.xlu1 %5093  ;;  %7523 = vmatmul.mubr.msk.bf16.gmra.mrb[64].mxu1 %vm1713_vm5, %v5359_v15 }
0x12e2   :  { %v5092_v3 = vpop.permute.xlu0 %5091  ;;  %v9483_v57 = vsel %vm1071_vm4, %v8744_v34, %v5094_v11 }
0x12e3   :  { %v9479_v52 = vsel %vm1071_vm4, %v8739_v30, %v5092_v3 }
0x12e4   :  { %7486 = vmatprep.mubr.msk.bf16.mxu0 %vm1713_vm5, %v9479_v52 }
0x12e5   :  { %7487 = vmatmul.mubr.msk.bf16.vlgmr.msra.gmra.mrb[56].mxu0 %vm1713_vm5, %v9483_v57  ;;  %v5331_v47 = vpop.permute.xlu1 %5330 }
0x12e6   :  { %v5329_v0 = vpop.permute.xlu0 %5328  ;;  %v5363_v4 = vsel %vm1071_vm4, %v9728_v7, %v5331_v47  ;;  %7531 = vmatpush3.bf16.msra.mxu0 %v7620_v19 }
0x12e7   :  { %v5361_v18 = vsel %vm1071_vm4, %v9727_v50, %v5329_v0  ;;  %7532 = vmatprep.subr.bf16.mxu0 %v7621_v29 }
0x12e8   :  { %7526 = vmatprep.mubr.msk.bf16.mxu1 %vm1713_vm5, %v5361_v18 }
0x12e9   :  { %v5098_v30 = vpop.permute.xlu1 %5097  ;;  %7527 = vmatmul.mubr.msk.bf16.gmra.mrb[68].mxu1 %vm1713_vm5, %v5363_v4 }
0x12ea   :  { %v5096_v34 = vpop.permute.xlu0 %5095  ;;  %v9501_v35 = vsel %vm1071_vm4, %v8771_v13, %v5098_v30  ;;  %7533 = vmatpush3.bf16.msra.mxu0 %v7621_v29 }
0x12eb   :  { %v9497_v23 = vsel %vm1071_vm4, %v8767_v37, %v5096_v34  ;;  %v7622_v37 = vld [vmem:[%s9603_s7 + $0x58] sm:$0xff]  }
0x12ec   :  { %7490 = vmatprep.mubr.msk.bf16.mxu0 %vm1713_vm5, %v9497_v23  ;;  %7534 = vmatprep.subr.bf16.mxu0 %v7622_v37 }
0x12ed   :  { %7491 = vmatmul.mubr.msk.bf16.gmra.mrb[60].mxu0 %vm1713_vm5, %v9501_v35 }
0x12ee   :  { %7535 = vmatpush3.bf16.msra.mxu0 %v7622_v37 }
0x1384   :  { %v7500_v13 = vpop.f32.mrb[40].mxu1 }
0x1385   :  { %v5553_v17 = vpop.f32.mrb[41].mxu1 }
0x1386   :  { %v7501_v16 = vpop.f32.mrb[42].mxu1 }
0x1387   :  { %v5556_v44 = vpop.f32.mrb[43].mxu1 }
0x138c   :  { %v7504_v12 = vpop.f32.mrb[44].mxu1 }
0x138d   :  { %v5569_v20 = vpop.f32.mrb[45].mxu1 }
0x138e   :  { %v9516_v9 = vpop.f32.mrb[46].mxu1 }
0x138f   :  { %v9518_v55 = vpop.f32.mrb[47].mxu1 }
0x1394   :  { %v7508_v5 = vpop.f32.mrb[48].mxu1 }
0x1395   :  { %v5682_v27 = vmax.f32 %v7500_v13, %v7508_v5  ;;  %v5585_v54 = vpop.f32.mrb[49].mxu1 }
0x1396   :  { %v5680_v32 = vmax.f32 %v5553_v17, %v5585_v54  ;;  %v7509_v33 = vpop.f32.mrb[50].mxu1 }
0x1397   :  { %v5683_v22 = vmax.f32 %v7501_v16, %v7509_v33  ;;  %v5588_v45 = vpop.f32.mrb[51].mxu1 }
0x1398   :  { %v5681_v36 = vmax.f32 %v5556_v44, %v5588_v45 }
0x139c   :  { %v7512_v41 = vpop.f32.mrb[52].mxu1 }
0x139d   :  { %v5686_v56 = vmax.f32 %v7504_v12, %v7512_v41  ;;  %v5601_v58 = vpop.f32.mrb[53].mxu1 }
0x139e   :  { %v5684_v40 = vmax.f32 %v5569_v20, %v5601_v58  ;;  %v7513_v46 = vpop.f32.mrb[54].mxu1 }
0x139f   :  { %v5687_v8 = vmax.f32 %v9516_v9, %v7513_v46  ;;  %v5604_v39 = vpop.f32.mrb[55].mxu1 }
0x13a0   :  { %v5685_v24 = vmax.f32 %v9518_v55, %v5604_v39 }
0x13a4   :  { %v7516_v25 = vpop.f32.mrb[56].mxu1 }
0x13a5   :  { %v5617_v14 = vpop.f32.mrb[57].mxu1 }
0x13a6   :  { %v7517_v42 = vpop.f32.mrb[58].mxu1 }
0x13a7   :  { %v5620_v1 = vpop.f32.mrb[59].mxu1 }
0x13ac   :  { %v7520_v53 = vpop.f32.mrb[60].mxu1 }
0x13ad   :  { %v5633_v26 = vpop.f32.mrb[61].mxu1 }
0x13ae   :  { %v7521_v59 = vpop.f32.mrb[62].mxu1 }
0x13af   :  { %v5636_v28 = vpop.f32.mrb[63].mxu1 }
0x13b4   :  { %v7524_v21 = vpop.f32.mrb[64].mxu1 }
0x13b5   :  { %v5690_v62 = vmax.f32 %v7516_v25, %v7524_v21  ;;  %v5649_v31 = vpop.f32.mrb[65].mxu1 }
0x13b6   :  { %v5688_v49 = vmax.f32 %v5617_v14, %v5649_v31  ;;  %v7525_v6 = vpop.f32.mrb[66].mxu1 }
0x13b7   :  { %v5698_v15 = vmax.f32 %v5682_v27, %v5690_v62  ;;  %v5691_v11 = vmax.f32 %v7517_v42, %v7525_v6  ;;  %v5652_v3 = vpop.f32.mrb[67].mxu1 }
0x13b8   :  { %v5696_v47 = vmax.f32 %v5680_v32, %v5688_v49  ;;  %v5689_v0 = vmax.f32 %v5620_v1, %v5652_v3  ;;  %v7488_v50 = vpop.f32.mrb[56].mxu0 }
0x13b9   :  { %v5699_v18 = vmax.f32 %v5683_v22, %v5691_v11  ;;  %v5469_v7 = vadd.f32 %v7488_v50, %v6328_v38  ;;  %v5430_v4 = vpop.f32.mrb[57].mxu0 }
0x13ba   :  { %v5697_v30 = vmax.f32 %v5681_v36, %v5689_v0  ;;  %v5467_v34 = vadd.f32 %v6328_v38, %v5430_v4  ;;  %v7489_v19 = vpop.f32.mrb[58].mxu0 }
0x13bb   :  { %v5706_v29 = vadd.f32 %v5698_v15, %v5469_v7  ;;  %v5470_v37 = vadd.f32 %v7489_v19, %v6328_v38  ;;  %v5433_v13 = vpop.f32.mrb[59].mxu0 }
0x13bc   :  { %v5704_v17 = vadd.f32 %v5696_v47, %v5467_v34  ;;  %v5468_v16 = vadd.f32 %v6328_v38, %v5433_v13  ;;  %v7528_v44 = vpop.f32.mrb[68].mxu1 }
0x13bd   :  { %v5707_v12 = vadd.f32 %v5699_v18, %v5470_v37  ;;  %v5694_v20 = vmax.f32 %v7520_v53, %v7528_v44  ;;  %v5665_v9 = vpop.f32.mrb[69].mxu1 }
0x13be   :  { %v5705_v55 = vadd.f32 %v5697_v30, %v5468_v16  ;;  %v5692_v5 = vmax.f32 %v5633_v26, %v5665_v9  ;;  %v7529_v27 = vpop.f32.mrb[70].mxu1 }
0x13bf   :  { %v5702_v54 = vmax.f32 %v5686_v56, %v5694_v20  ;;  %v5695_v32 = vmax.f32 %v7521_v59, %v7529_v27  ;;  %v5668_v33 = vpop.f32.mrb[71].mxu1  ;;  %v5713_v22 = vpack.c.bf16 %v5707_v12, %v5706_v29  ;;  %v9730_v12 = vld [vmem:[#allocation2_spill] sm:$0xff]  ;;  %v9732_v27 = vld [vmem:[#allocation5_spill] sm:$0xff] }
0x13c0   :  { %v5700_v45 = vmax.f32 %v5684_v40, %v5692_v5  ;;  %v5693_v36 = vmax.f32 %v5636_v28, %v5668_v33  ;;  %v7492_v41 = vpop.f32.mrb[60].mxu0  ;;  %v5712_v58 = vpack.c.bf16 %v5705_v55, %v5704_v17  ;;  %v9729_v17 = vld [vmem:[#allocation3_spill] sm:$0xff] }
0x13c1   :  { %v5703_v46 = vmax.f32 %v5687_v8, %v5695_v32  ;;  %v5473_v39 = vadd.f32 %v7492_v41, %v6328_v38  ;;  %5722 = vrot.lane.b32.xlu1 %v5713_v22, %s7673_s29  ;;  %v5446_v25 = vpop.f32.mrb[61].mxu0  ;;  %v9731_v55 = vld [vmem:[#allocation7_spill] sm:$0xff] }
0x13c2   :  { %v5701_v14 = vmax.f32 %v5685_v24, %v5693_v36  ;;  %v5471_v42 = vadd.f32 %v6328_v38, %v5446_v25  ;;  %5720 = vrot.lane.b32.xlu0 %v5712_v58, %s7673_s29  ;;  %v7493_v1 = vpop.f32.mrb[62].mxu0 }
0x13c3   :  { %v5710_v53 = vadd.f32 %v5702_v54, %v5473_v39  ;;  %v5474_v26 = vadd.f32 %v7493_v1, %v6328_v38  ;;  %v5449_v56 = vpop.f32.mrb[63].mxu0  ;;  %v9733_v1 = vld [vmem:[#allocation9_spill] sm:$0xff] }
0x13c4   :  { %v5708_v59 = vadd.f32 %v5700_v45, %v5471_v42  ;;  %v5472_v21 = vadd.f32 %v6328_v38, %v5449_v56 }
0x13c5   :  { %v5711_v62 = vadd.f32 %v5703_v46, %v5474_v26  ;;  %v9734_v26 = vld [vmem:[#allocation8_spill] sm:$0xff] }
0x13c6   :  { %v5709_v40 = vadd.f32 %v5701_v14, %v5472_v21 }
0x13c7   :  { %v5715_v28 = vpack.c.bf16 %v5711_v62, %v5710_v53  ;;  %v9735_v62 = vld [vmem:[#allocation11_spill] sm:$0xff] }
0x13c8   :  { %v5714_v31 = vpack.c.bf16 %v5709_v40, %v5708_v59 }
0x13c9   :  { %5726 = vrot.lane.b32.xlu1 %v5715_v28, %s7673_s29 }
0x13ca   :  { %5724 = vrot.lane.b32.xlu0 %v5714_v31, %s7673_s29  ;;  %v9736_v31 = vld [vmem:[#allocation10_spill] sm:$0xff] }
0x1433   :  { %v5723_v8 = vpop.permute.xlu1 %5722 }
0x1434   :  { %v5721_v49 = vpop.permute.xlu0 %5720  ;;  %v5731_v6 = vsel %vm1713_vm5, %v9483_v57, %v5723_v8  ;;  %v6361_v57 = vld [vmem:[%s9599_s8 + $0xc] ss:$0 sm:$0xff] }
0x1435   :  { %v5729_v24 = vsel %vm1713_vm5, %v9479_v52, %v5721_v49  ;;  %v6268_v52 = vld [vmem:[%s9599_s8 + $0x9] ss:$0 sm:$0xff] }
0x1436   :  { %7536 = vmatprep.mubr.msk.bf16.mxu0 %vm2088_vm6, %v5729_v24  ;;  %v4737_v0 = vadd.f32 %v9304_v43, %v6268_v52  ;;  %v4735_v18 = vadd.f32 %v6268_v52, %v9306_v51  ;;  %v4738_v4 = vadd.f32 %v9308_v2, %v6268_v52  ;;  %v4736_v29 = vadd.f32 %v6268_v52, %v9310_v10 }
0x1437   :  { %7537 = vmatmul.mubr.msk.bf16.vlgmr.msra.gmra.mrb[64].mxu0 %vm2088_vm6, %v5731_v6  ;;  %v4741_v32 = vadd.f32 %v9312_v61, %v6268_v52  ;;  %v4739_v45 = vadd.f32 %v6268_v52, %v9314_v60  ;;  %v4742_v61 = vadd.f32 %v9316_v63, %v6268_v52  ;;  %v4740_v60 = vadd.f32 %v6268_v52, %v9318_v48 }
0x143b   :  { %v5727_v38 = vpop.permute.xlu1 %5726 }
0x143c   :  { %v5725_v15 = vpop.permute.xlu0 %5724  ;;  %v5735_v3 = vsel %vm1713_vm5, %v9501_v35, %v5727_v38 }
0x143d   :  { %v5733_v11 = vsel %vm1713_vm5, %v9497_v23, %v5725_v15 }
0x143e   :  { %7540 = vmatprep.mubr.msk.bf16.mxu0 %vm2088_vm6, %v5733_v11 }
0x143f   :  { %7541 = vmatmul.mubr.msk.bf16.gmra.mrb[68].mxu0 %vm2088_vm6, %v5735_v3 }
0x150a   :  { %v7538_v47 = vpop.f32.mrb[64].mxu0 }
0x150b   :  { %v5844_v50 = vadd.f32 %v7538_v47, %v6361_v57  ;;  %v5805_v23 = vpop.f32.mrb[65].mxu0 }
0x150c   :  { %v5842_v35 = vadd.f32 %v6361_v57, %v5805_v23  ;;  %v7539_v7 = vpop.f32.mrb[66].mxu0 }
0x150d   :  { %v5852_v30 = vmax.f32 %v4737_v0, %v5844_v50  ;;  %v5845_v34 = vadd.f32 %v7539_v7, %v6361_v57  ;;  %v5808_v19 = vpop.f32.mrb[67].mxu0 }
0x150e   :  { %v5850_v37 = vmax.f32 %v4735_v18, %v5842_v35  ;;  %v5843_v13 = vadd.f32 %v6361_v57, %v5808_v19 }
0x150f   :  { %v5860_v16 = vadd.f32 %v5852_v30, %v9729_v17  ;;  %v5853_v44 = vmax.f32 %v4738_v4, %v5845_v34 }
0x1510   :  { %v5858_v43 = vadd.f32 %v5850_v37, %v9730_v12  ;;  %v5851_v20 = vmax.f32 %v4736_v29, %v5843_v13 }
0x1511   :  { %v5868_v9 = vmul.f32 0.5, %v5860_v16  ;;  %v5861_v51 = vadd.f32 %v5853_v44, %v9731_v55 }
0x1512   :  { %v5866_v5 = vmul.f32 0.5, %v5858_v43  ;;  %v5859_v54 = vadd.f32 %v5851_v20, %v9732_v27  ;;  %v7542_v2 = vpop.f32.mrb[68].mxu0 }
0x1513   :  { %5876 = vst.msk [vmem:[%s9604_s9 + $0x10] sm:$0xff] %vm1071_vm4, %v5868_v9  ;;  %v5869_v10 = vmul.f32 0.5, %v5861_v51  ;;  %v5848_v33 = vadd.f32 %v7542_v2, %v6361_v57  ;;  %v5821_v22 = vpop.f32.mrb[69].mxu0 }
0x1514   :  { %5874 = vst.msk [vmem:[%s9604_s9] sm:$0xff] %vm1071_vm4, %v5866_v5  ;;  %v5867_v36 = vmul.f32 0.5, %v5859_v54  ;;  %v5846_v41 = vadd.f32 %v6361_v57, %v5821_v22  ;;  %v7543_v58 = vpop.f32.mrb[70].mxu0 }
0x1515   :  { %5877 = vst.msk [vmem:[%s9604_s9 + $0x18] sm:$0xff] %vm1071_vm4, %v5869_v10  ;;  %v5856_v46 = vmax.f32 %v4741_v32, %v5848_v33  ;;  %v5849_v39 = vadd.f32 %v7543_v58, %v6361_v57  ;;  %v5824_v25 = vpop.f32.mrb[71].mxu0 }
0x1516   :  { %5875 = vst.msk [vmem:[%s9604_s9 + $0x8] sm:$0xff] %vm1071_vm4, %v5867_v36  ;;  %v5854_v14 = vmax.f32 %v4739_v45, %v5846_v41  ;;  %v5847_v42 = vadd.f32 %v6361_v57, %v5824_v25 }
0x1517   :  { %v5864_v53 = vadd.f32 %v5856_v46, %v9733_v1  ;;  %v5857_v63 = vmax.f32 %v4742_v61, %v5849_v39 }
0x1518   :  { %v5862_v56 = vadd.f32 %v5854_v14, %v9734_v26  ;;  %v5855_v59 = vmax.f32 %v4740_v60, %v5847_v42 }
0x1519   :  { %v5872_v21 = vmul.f32 0.5, %v5864_v53  ;;  %v5865_v40 = vadd.f32 %v5857_v63, %v9735_v62 }
0x151a   :  { %v5870_v28 = vmul.f32 0.5, %v5862_v56  ;;  %v5863_v8 = vadd.f32 %v5855_v59, %v9736_v31 }
0x151b   :  { %5880 = vst.msk [vmem:[%s9604_s9 + $0x30] sm:$0xff] %vm1071_vm4, %v5872_v21  ;;  %v5873_v48 = vmul.f32 0.5, %v5865_v40 }
0x151c   :  { %5878 = vst.msk [vmem:[%s9604_s9 + $0x20] sm:$0xff] %vm1071_vm4, %v5870_v28  ;;  %v5871_v49 = vmul.f32 0.5, %v5863_v8 }
0x151d   :  { %5881 = vst.msk [vmem:[%s9604_s9 + $0x38] sm:$0xff] %vm1071_vm4, %v5873_v48 }
0x151e   :  { %5879 = vst.msk [vmem:[%s9604_s9 + $0x28] sm:$0xff] %vm1071_vm4, %v5871_v49 }

</bundles_post_ra>
